<compile_context>
chip_gen: v7x
topology: tpu7x:2x2x1
jax: 0.10.0
libtpu: 0.0.40
codegen_flags: <defaults>
</compile_context>

<pallas_src>
import functools

import jax
import jax.numpy as jnp
from jax.experimental import pallas as pl
from jax.experimental.pallas import tpu as pltpu

LANE = 128          # lane width: last-dim padding target (lane-dense stores / full MXU width)
BF16_SUBLANE = 16   # bf16 packs 16 rows per sublane tile

GCN_HIDDEN = [64, 64, 128, 128, 256, 256, 512, 512]   # per-block output channels
FC1_OUT = 128


def _round_up(x, m):
    return (x + m - 1) // m * m


PADDED_HIDDEN = [_round_up(d, LANE) for d in GCN_HIDDEN]   # [128,128,128,128,256,256,512,512]


# ----------------------------- fused Pallas kernel ----------------------------

def fused_gnn_kernel(*refs):
    """8x relu(A_hat @ (h @ W^T) + b) -> mean-pool -> fc1+relu -> fc2, fully VMEM-resident.

    refs layout:
      [0]  a_ref   (Np, Np)        bf16  normalized adjacency (zero-padded)
      [1]  h0_ref  (Np, 128)       bf16  pre-projected x @ W0^T (zero-padded)
      [2]  b0_ref  (1, 128)        f32   layer-0 bias
      [3:17]  7 x (wT (Cin_p, Cout_p) bf16, b (1, Cout_p) f32)   layers 1..7
      [17] p_ref   (Gp, Np)        bf16  mean-pool matrix (zero-padded)
      [18] w1t_ref (512, 128)      bf16
      [19] b1_ref  (1, 128)        f32
      [20] w2t_ref (128, Ccls_p)   bf16
      [21] b2_ref  (1, Ccls_p)     f32
      [22] o_ref   (Gp, Ccls_p)    f32   output
    """
    a_ref = refs[0]
    h0_ref = refs[1]
    b0_ref = refs[2]
    layer_refs = refs[3:3 + 2 * 7]
    p_ref, w1t_ref, b1_ref, w2t_ref, b2_ref = refs[17:22]
    o_ref = refs[22]

    # Layer 0: feature projection x @ W0^T was done host-side (true K=4); only A @ h0 + b here.
    agg0 = jnp.dot(a_ref[...], h0_ref[...], preferred_element_type=jnp.float32)
    # NOTE: padded node rows become relu(bias) != 0 after each layer; this is inert because
    # A_hat's and P's padded *columns* are zero, so padded rows never feed real outputs.
    h = jnp.maximum(agg0 + b0_ref[...], 0.0).astype(jnp.bfloat16)

    # Layers 1..7, unrolled. bf16 operands, fp32 accumulation.
    for i in range(1, 8):
        wt = layer_refs[2 * (i - 1)][...]
        b = layer_refs[2 * (i - 1) + 1][...]
        cin_p, cout_p = PADDED_HIDDEN[i - 1], PADDED_HIDDEN[i]
        if cin_p < cout_p:
            # Channel-expanding layer: A-first runs the dominant O(Np^2*C) matmul over the
            # smaller Cin instead of Cout -> ~half the MXU FLOPs for this layer.
            agg = jnp.dot(a_ref[...], h, preferred_element_type=jnp.float32)
            out = jnp.dot(agg.astype(jnp.bfloat16), wt, preferred_element_type=jnp.float32)
        else:
            xw = jnp.dot(h, wt, preferred_element_type=jnp.float32)
            out = jnp.dot(a_ref[...], xw.astype(jnp.bfloat16),
                          preferred_element_type=jnp.float32)
        h = jnp.maximum(out + b, 0.0).astype(jnp.bfloat16)

    # global_mean_pool fused as an epilogue: pooled = P @ h  (Gp, 512)
    pooled = jnp.dot(p_ref[...], h, preferred_element_type=jnp.float32)

    # fc1 + ReLU
    h1 = jnp.dot(pooled.astype(jnp.bfloat16), w1t_ref[...],
                 preferred_element_type=jnp.float32) + b1_ref[...]
    h1 = jnp.maximum(h1, 0.0)

    # TODO(synk): dropout(0.5) between fc1 and fc2 is identity (eval/inference semantics);
    # stochastic training-mode dropout (pltpu.prng_seed / prng_random_bits) omitted.

    # fc2 (single lane-dense fp32 store of the final result)
    o_ref[...] = jnp.dot(h1.astype(jnp.bfloat16), w2t_ref[...],
                         preferred_element_type=jnp.float32) + b2_ref[...]


_VMEM_SPEC = pl.BlockSpec(memory_space=pltpu.MemorySpace.VMEM)


def _vmem_limit_bytes():
    """~80% of this generation's physical VMEM (leaves headroom for Mosaic scratch)."""
    cap = 64 * 1024 * 1024
    try:
        info = pltpu.get_tpu_info()
        cap = int(getattr(info, "vmem_capacity_bytes", cap))
    except Exception:
        pass
    return max(int(cap * 0.8), 32 * 1024 * 1024)


# ----------------------------- JAX glue (setup) -------------------------------

def build_gcn_adjacency_padded(edge_index, edge_weight, num_nodes, n_p):
    """Dense symmetrically-normalized adjacency with self-loops (PyG gcn_norm), built
    directly into the (n_p, n_p) padded buffer and cast to bf16 once.

    Assumes edge_index contains no pre-existing self-loops; duplicate edges sum (PyG default).
    """
    row = edge_index[0]
    col = edge_index[1]
    loop = jnp.arange(num_nodes, dtype=edge_index.dtype)
    row = jnp.concatenate([row, loop])
    col = jnp.concatenate([col, loop])
    ew = jnp.concatenate(
        [edge_weight.astype(jnp.float32), jnp.ones((num_nodes,), jnp.float32)])
    deg = jnp.zeros((num_nodes,), jnp.float32).at[col].add(ew)
    deg_inv_sqrt = jnp.where(deg > 0.0, jax.lax.rsqrt(deg), 0.0)
    norm = deg_inv_sqrt[row] * ew * deg_inv_sqrt[col]
    # messages flow source(row) -> target(col):  out[col] += norm * x[row]
    a_hat = jnp.zeros((n_p, n_p), jnp.float32).at[col, row].add(norm)
    return a_hat.astype(jnp.bfloat16)


def build_mean_pool_matrix_padded(batch, num_graphs, num_nodes, g_p, n_p):
    """P (g_p, n_p) bf16 s.t. P @ H == global_mean_pool(H, batch) on the real rows/cols."""
    batch_pad = jnp.full((n_p,), -1, batch.dtype).at[:num_nodes].set(batch)
    graph_ids = jnp.arange(g_p, dtype=batch.dtype)
    one_hot = (batch_pad[None, :] == graph_ids[:, None]).astype(jnp.float32)
    counts = jnp.maximum(one_hot.sum(axis=1, keepdims=True), 1.0)
    return (one_hot / counts).astype(jnp.bfloat16)


def init_params(key, num_node_features, num_classes):
    """PyTorch-layout parameters: W (out, in), b (out,)."""
    dims = [num_node_features] + GCN_HIDDEN
    params = {"gcn": []}
    keys = jax.random.split(key, 2 * len(dims) + 4)
    k = 0
    for i in range(8):
        c_in, c_out = dims[i], dims[i + 1]
        w = jax.random.normal(keys[k], (c_out, c_in), jnp.float32) * (1.0 / jnp.sqrt(c_in))
        k += 1
        b = jax.random.normal(keys[k], (c_out,), jnp.float32) * 0.01
        k += 1
        params["gcn"].append((w, b))
    params["fc1_w"] = jax.random.normal(keys[k], (FC1_OUT, 512), jnp.float32) * (1.0 / jnp.sqrt(512.0)); k += 1
    params["fc1_b"] = jax.random.normal(keys[k], (FC1_OUT,), jnp.float32) * 0.01; k += 1
    params["fc2_w"] = jax.random.normal(keys[k], (num_classes, FC1_OUT), jnp.float32) * (1.0 / jnp.sqrt(float(FC1_OUT))); k += 1
    params["fc2_b"] = jax.random.normal(keys[k], (num_classes,), jnp.float32) * 0.01
    return params


def pack_params(params, num_node_features, num_classes):
    """One-time: transpose, zero-pad channel dims to 128, cast weights to bf16.

    Layer-0 weight is kept in fp32 (it is applied host-side over the true K=num_node_features
    contraction to avoid a ~97%-zeros padded K=128 MXU contraction inside the kernel)."""
    w0, b0 = params["gcn"][0]
    packed = {
        "w0": w0.astype(jnp.float32),                                   # (64, C0) fp32
        "b0": jnp.zeros((1, PADDED_HIDDEN[0]), jnp.float32).at[0, :GCN_HIDDEN[0]].set(b0),
    }
    gcn_flat = []
    for i in range(1, 8):
        w, b = params["gcn"][i]
        c_in, c_out = GCN_HIDDEN[i - 1], GCN_HIDDEN[i]
        c_in_p, c_out_p = PADDED_HIDDEN[i - 1], PADDED_HIDDEN[i]
        wt = jnp.zeros((c_in_p, c_out_p), jnp.float32).at[:c_in, :c_out].set(jnp.transpose(w))
        bp = jnp.zeros((1, c_out_p), jnp.float32).at[0, :c_out].set(b)
        gcn_flat += [wt.astype(jnp.bfloat16), bp]
    ncls_p = _round_up(num_classes, LANE)
    packed["gcn_flat"] = gcn_flat
    packed["w1t"] = jnp.transpose(params["fc1_w"]).astype(jnp.bfloat16)          # (512, 128)
    packed["b1"] = params["fc1_b"].reshape(1, -1).astype(jnp.float32)            # (1, 128)
    packed["w2t"] = jnp.zeros((FC1_OUT, ncls_p), jnp.float32).at[:, :num_classes].set(
        jnp.transpose(params["fc2_w"])).astype(jnp.bfloat16)
    packed["b2"] = jnp.zeros((1, ncls_p), jnp.float32).at[0, :num_classes].set(params["fc2_b"])
    return packed


# ----------------------------- forward pass -----------------------------------

def directional_gnn_forward(packed, x, edge_index, edge_weight, batch, *,
                            num_graphs, num_classes):
    num_nodes, num_node_features = x.shape
    n_p = _round_up(num_nodes, LANE)            # N padded for lane-dense A_hat / MXU
    g_p = _round_up(num_graphs, BF16_SUBLANE)   # graph rows padded to bf16 sublane pack (16)
    c1_p = PADDED_HIDDEN[0]                     # 128
    ncls_p = _round_up(num_classes, LANE)

    # sparse -> dense normalized adjacency and mean-pool matrix, built directly padded+bf16
    a_pad = build_gcn_adjacency_padded(edge_index, edge_weight, num_nodes, n_p)
    p_pad = build_mean_pool_matrix_padded(batch, num_graphs, num_nodes, g_p, n_p)

    # Layer-0 feature projection on host: contraction over the TRUE feature count (e.g. 4),
    # instead of a zero-padded K=128 contraction inside the kernel.
    h0 = jnp.dot(x.astype(jnp.float32), packed["w0"].T)                 # (N, 64) fp32
    h0_pad = jnp.zeros((n_p, c1_p), jnp.bfloat16).at[
        :num_nodes, :GCN_HIDDEN[0]].set(h0.astype(jnp.bfloat16))

    inputs = ([a_pad, h0_pad, packed["b0"]] + list(packed["gcn_flat"]) +
              [p_pad, packed["w1t"], packed["b1"], packed["w2t"], packed["b2"]])

    # advisory cost hint for the XLA scheduler (matches the A-first / W-first ordering used)
    flops = 2 * n_p * n_p * PADDED_HIDDEN[0]                            # layer 0: A @ h0
    for i in range(1, 8):
        cin_p, cout_p = PADDED_HIDDEN[i - 1], PADDED_HIDDEN[i]
        if cin_p < cout_p:
            flops += 2 * n_p * n_p * cin_p + 2 * n_p * cin_p * cout_p
        else:
            flops += 2 * n_p * cin_p * cout_p + 2 * n_p * n_p * cout_p
    flops += 2 * g_p * n_p * PADDED_HIDDEN[-1]                          # pooling
    flops += 2 * g_p * 512 * FC1_OUT + 2 * g_p * FC1_OUT * ncls_p
    bytes_accessed = sum(int(a.size) * a.dtype.itemsize for a in inputs)
    bytes_accessed += g_p * ncls_p * 4
    cost = pl.CostEstimate(flops=flops, transcendentals=0, bytes_accessed=bytes_accessed)

    out_p = pl.pallas_call(
        fused_gnn_kernel,
        out_shape=jax.ShapeDtypeStruct((g_p, ncls_p), jnp.float32),
        in_specs=[_VMEM_SPEC] * len(inputs),
        out_specs=_VMEM_SPEC,
        compiler_params=pltpu.CompilerParams(vmem_limit_bytes=_vmem_limit_bytes()),
        cost_estimate=cost,
    )(*inputs)

    return out_p[:num_graphs, :num_classes]


# ----------------------------------- main -------------------------------------

if __name__ == "__main__":
    num_node_features = 4
    num_classes = 3
    num_nodes = 16
    num_edges = 32
    num_graphs = 2

    key = jax.random.PRNGKey(0)
    k_x, k_src, k_off, k_w, k_params = jax.random.split(key, 5)

    x = jax.random.normal(k_x, (num_nodes, num_node_features), jnp.float32)

    # random edges with no self-loops: target = (source + offset) % N, offset in [1, N-1]
    src = jax.random.randint(k_src, (num_edges,), 0, num_nodes, dtype=jnp.int32)
    off = jax.random.randint(k_off, (num_edges,), 1, num_nodes, dtype=jnp.int32)
    dst = (src + off) % num_nodes
    edge_index = jnp.stack([src, dst], axis=0)                       # (2, E)
    edge_weight = jax.random.uniform(k_w, (num_edges,), jnp.float32, 0.1, 1.0)

    # nodes 0..7 -> graph 0, nodes 8..15 -> graph 1
    batch = jnp.concatenate([jnp.zeros((8,), jnp.int32), jnp.ones((8,), jnp.int32)])

    params = init_params(k_params, num_node_features, num_classes)
    packed = pack_params(params, num_node_features, num_classes)     # one-time transpose/pad/cast

    fwd = jax.jit(functools.partial(directional_gnn_forward,
                                    num_graphs=num_graphs, num_classes=num_classes))
    out = fwd(packed, x, edge_index, edge_weight, batch)
    out = jax.block_until_ready(out)
    assert out.shape == (num_graphs, num_classes)
    assert out.dtype == jnp.float32
    print("KERNEL_OK")
</pallas_src>

<mosaic_0001>
module attributes {stable_mosaic.version = 11 : i64} {
  func.func private @main(%arg0: i32) attributes {dimension_semantics = [#tpu.dimension_semantics<core_parallel>], iteration_bounds = array<i64: 2>, tpu.core_type = #tpu.core_type<sc_scalar_subcore>, window_params = []} {
    return
  }
}

module attributes {stable_mosaic.version = 11 : i64} {
  func.func private @main(%arg0: i32) attributes {dimension_semantics = [#tpu.dimension_semantics<core_parallel>], iteration_bounds = array<i64: 2>, tpu.core_type = #tpu.core_type<sc_scalar_subcore>, window_params = []} {
    return
  }
}

module attributes {stable_mosaic.version = 11 : i64} {
  func.func @fused_gnn_kernel(%arg0: memref<128x128xbf16, #tpu.memory_space<vmem>>, %arg1: memref<128x128xbf16, #tpu.memory_space<vmem>>, %arg2: memref<1x128xf32, #tpu.memory_space<vmem>>, %arg3: memref<128x128xbf16, #tpu.memory_space<vmem>>, %arg4: memref<1x128xf32, #tpu.memory_space<vmem>>, %arg5: memref<128x128xbf16, #tpu.memory_space<vmem>>, %arg6: memref<1x128xf32, #tpu.memory_space<vmem>>, %arg7: memref<128x128xbf16, #tpu.memory_space<vmem>>, %arg8: memref<1x128xf32, #tpu.memory_space<vmem>>, %arg9: memref<128x256xbf16, #tpu.memory_space<vmem>>, %arg10: memref<1x256xf32, #tpu.memory_space<vmem>>, %arg11: memref<256x256xbf16, #tpu.memory_space<vmem>>, %arg12: memref<1x256xf32, #tpu.memory_space<vmem>>, %arg13: memref<256x512xbf16, #tpu.memory_space<vmem>>, %arg14: memref<1x512xf32, #tpu.memory_space<vmem>>, %arg15: memref<512x512xbf16, #tpu.memory_space<vmem>>, %arg16: memref<1x512xf32, #tpu.memory_space<vmem>>, %arg17: memref<16x128xbf16, #tpu.memory_space<vmem>>, %arg18: memref<512x128xbf16, #tpu.memory_space<vmem>>, %arg19: memref<1x128xf32, #tpu.memory_space<vmem>>, %arg20: memref<128x128xbf16, #tpu.memory_space<vmem>>, %arg21: memref<1x128xf32, #tpu.memory_space<vmem>>, %arg22: memref<16x128xf32, #tpu.memory_space<vmem>>) attributes {dimension_semantics = [], scalar_prefetch = 0 : i64, scratch_operands = 0 : i64, tpu.core_type = #tpu.core_type<tc>} {
    %c0 = arith.constant 0 : index
    %c0_0 = arith.constant 0 : index
    %0 = vector.load %arg0[%c0, %c0_0] : memref<128x128xbf16, #tpu.memory_space<vmem>>, vector<128x128xbf16>
    %c0_1 = arith.constant 0 : index
    %c0_2 = arith.constant 0 : index
    %1 = vector.load %arg1[%c0_1, %c0_2] : memref<128x128xbf16, #tpu.memory_space<vmem>>, vector<128x128xbf16>
    %cst = arith.constant dense<0.000000e+00> : vector<128x128xf32>
    %2 = tpu.matmul %0, %1, %cst {dimension_numbers = #tpu.dot_dimension_numbers<[1], [0], [0], [1], [0, 0, 1, 1], [], []>} : vector<128x128xbf16>, vector<128x128xbf16>, vector<128x128xf32> -> vector<128x128xf32>
    %c0_3 = arith.constant 0 : index
    %c0_4 = arith.constant 0 : index
    %3 = vector.load %arg2[%c0_3, %c0_4] : memref<1x128xf32, #tpu.memory_space<vmem>>, vector<1x128xf32>
    %4 = vector.broadcast %3 : vector<1x128xf32> to vector<128x128xf32>
    %5 = arith.addf %2, %4 : vector<128x128xf32>
    %cst_5 = arith.constant 0.000000e+00 : f32
    %6 = vector.broadcast %cst_5 : f32 to vector<128x128xf32>
    %7 = arith.maximumf %5, %6 : vector<128x128xf32>
    %8 = arith.truncf %7 : vector<128x128xf32> to vector<128x128xbf16>
    %c0_6 = arith.constant 0 : index
    %c0_7 = arith.constant 0 : index
    %9 = vector.load %arg3[%c0_6, %c0_7] : memref<128x128xbf16, #tpu.memory_space<vmem>>, vector<128x128xbf16>
    %c0_8 = arith.constant 0 : index
    %c0_9 = arith.constant 0 : index
    %10 = vector.load %arg4[%c0_8, %c0_9] : memref<1x128xf32, #tpu.memory_space<vmem>>, vector<1x128xf32>
    %cst_10 = arith.constant dense<0.000000e+00> : vector<128x128xf32>
    %11 = tpu.matmul %8, %9, %cst_10 {dimension_numbers = #tpu.dot_dimension_numbers<[1], [0], [0], [1], [0, 0, 1, 1], [], []>} : vector<128x128xbf16>, vector<128x128xbf16>, vector<128x128xf32> -> vector<128x128xf32>
    %c0_11 = arith.constant 0 : index
    %c0_12 = arith.constant 0 : index
    %12 = vector.load %arg0[%c0_11, %c0_12] : memref<128x128xbf16, #tpu.memory_space<vmem>>, vector<128x128xbf16>
    %13 = arith.truncf %11 : vector<128x128xf32> to vector<128x128xbf16>
    %cst_13 = arith.constant dense<0.000000e+00> : vector<128x128xf32>
    %14 = tpu.matmul %12, %13, %cst_13 {dimension_numbers = #tpu.dot_dimension_numbers<[1], [0], [0], [1], [0, 0, 1, 1], [], []>} : vector<128x128xbf16>, vector<128x128xbf16>, vector<128x128xf32> -> vector<128x128xf32>
    %15 = vector.broadcast %10 : vector<1x128xf32> to vector<128x128xf32>
    %16 = arith.addf %14, %15 : vector<128x128xf32>
    %cst_14 = arith.constant 0.000000e+00 : f32
    %17 = vector.broadcast %cst_14 : f32 to vector<128x128xf32>
    %18 = arith.maximumf %16, %17 : vector<128x128xf32>
    %19 = arith.truncf %18 : vector<128x128xf32> to vector<128x128xbf16>
    %c0_15 = arith.constant 0 : index
    %c0_16 = arith.constant 0 : index
    %20 = vector.load %arg5[%c0_15, %c0_16] : memref<128x128xbf16, #tpu.memory_space<vmem>>, vector<128x128xbf16>
    %c0_17 = arith.constant 0 : index
    %c0_18 = arith.constant 0 : index
    %21 = vector.load %arg6[%c0_17, %c0_18] : memref<1x128xf32, #tpu.memory_space<vmem>>, vector<1x128xf32>
    %cst_19 = arith.constant dense<0.000000e+00> : vector<128x128xf32>
    %22 = tpu.matmul %19, %20, %cst_19 {dimension_numbers = #tpu.dot_dimension_numbers<[1], [0], [0], [1], [0, 0, 1, 1], [], []>} : vector<128x128xbf16>, vector<128x128xbf16>, vector<128x128xf32> -> vector<128x128xf32>
    %c0_20 = arith.constant 0 : index
    %c0_21 = arith.constant 0 : index
    %23 = vector.load %arg0[%c0_20, %c0_21] : memref<128x128xbf16, #tpu.memory_space<vmem>>, vector<128x128xbf16>
    %24 = arith.truncf %22 : vector<128x128xf32> to vector<128x128xbf16>
    %cst_22 = arith.constant dense<0.000000e+00> : vector<128x128xf32>
    %25 = tpu.matmul %23, %24, %cst_22 {dimension_numbers = #tpu.dot_dimension_numbers<[1], [0], [0], [1], [0, 0, 1, 1], [], []>} : vector<128x128xbf16>, vector<128x128xbf16>, vector<128x128xf32> -> vector<128x128xf32>
    %26 = vector.broadcast %21 : vector<1x128xf32> to vector<128x128xf32>
    %27 = arith.addf %25, %26 : vector<128x128xf32>
    %cst_23 = arith.constant 0.000000e+00 : f32
    %28 = vector.broadcast %cst_23 : f32 to vector<128x128xf32>
    %29 = arith.maximumf %27, %28 : vector<128x128xf32>
    %30 = arith.truncf %29 : vector<128x128xf32> to vector<128x128xbf16>
    %c0_24 = arith.constant 0 : index
    %c0_25 = arith.constant 0 : index
    %31 = vector.load %arg7[%c0_24, %c0_25] : memref<128x128xbf16, #tpu.memory_space<vmem>>, vector<128x128xbf16>
    %c0_26 = arith.constant 0 : index
    %c0_27 = arith.constant 0 : index
    %32 = vector.load %arg8[%c0_26, %c0_27] : memref<1x128xf32, #tpu.memory_space<vmem>>, vector<1x128xf32>
    %cst_28 = arith.constant dense<0.000000e+00> : vector<128x128xf32>
    %33 = tpu.matmul %30, %31, %cst_28 {dimension_numbers = #tpu.dot_dimension_numbers<[1], [0], [0], [1], [0, 0, 1, 1], [], []>} : vector<128x128xbf16>, vector<128x128xbf16>, vector<128x128xf32> -> vector<128x128xf32>
    %c0_29 = arith.constant 0 : index
    %c0_30 = arith.constant 0 : index
    %34 = vector.load %arg0[%c0_29, %c0_30] : memref<128x128xbf16, #tpu.memory_space<vmem>>, vector<128x128xbf16>
    %35 = arith.truncf %33 : vector<128x128xf32> to vector<128x128xbf16>
    %cst_31 = arith.constant dense<0.000000e+00> : vector<128x128xf32>
    %36 = tpu.matmul %34, %35, %cst_31 {dimension_numbers = #tpu.dot_dimension_numbers<[1], [0], [0], [1], [0, 0, 1, 1], [], []>} : vector<128x128xbf16>, vector<128x128xbf16>, vector<128x128xf32> -> vector<128x128xf32>
    %37 = vector.broadcast %32 : vector<1x128xf32> to vector<128x128xf32>
    %38 = arith.addf %36, %37 : vector<128x128xf32>
    %cst_32 = arith.constant 0.000000e+00 : f32
    %39 = vector.broadcast %cst_32 : f32 to vector<128x128xf32>
    %40 = arith.maximumf %38, %39 : vector<128x128xf32>
    %41 = arith.truncf %40 : vector<128x128xf32> to vector<128x128xbf16>
    %c0_33 = arith.constant 0 : index
    %c0_34 = arith.constant 0 : index
    %42 = vector.load %arg9[%c0_33, %c0_34] : memref<128x256xbf16, #tpu.memory_space<vmem>>, vector<128x256xbf16>
    %c0_35 = arith.constant 0 : index
    %c0_36 = arith.constant 0 : index
    %43 = vector.load %arg10[%c0_35, %c0_36] : memref<1x256xf32, #tpu.memory_space<vmem>>, vector<1x256xf32>
    %c0_37 = arith.constant 0 : index
    %c0_38 = arith.constant 0 : index
    %44 = vector.load %arg0[%c0_37, %c0_38] : memref<128x128xbf16, #tpu.memory_space<vmem>>, vector<128x128xbf16>
    %cst_39 = arith.constant dense<0.000000e+00> : vector<128x128xf32>
    %45 = tpu.matmul %44, %41, %cst_39 {dimension_numbers = #tpu.dot_dimension_numbers<[1], [0], [0], [1], [0, 0, 1, 1], [], []>} : vector<128x128xbf16>, vector<128x128xbf16>, vector<128x128xf32> -> vector<128x128xf32>
    %46 = arith.truncf %45 : vector<128x128xf32> to vector<128x128xbf16>
    %cst_40 = arith.constant dense<0.000000e+00> : vector<128x256xf32>
    %47 = tpu.matmul %46, %42, %cst_40 {dimension_numbers = #tpu.dot_dimension_numbers<[1], [0], [0], [1], [0, 0, 1, 1], [], []>} : vector<128x128xbf16>, vector<128x256xbf16>, vector<128x256xf32> -> vector<128x256xf32>
    %48 = vector.broadcast %43 : vector<1x256xf32> to vector<128x256xf32>
    %49 = arith.addf %47, %48 : vector<128x256xf32>
    %cst_41 = arith.constant 0.000000e+00 : f32
    %50 = vector.broadcast %cst_41 : f32 to vector<128x256xf32>
    %51 = arith.maximumf %49, %50 : vector<128x256xf32>
    %52 = arith.truncf %51 : vector<128x256xf32> to vector<128x256xbf16>
    %c0_42 = arith.constant 0 : index
    %c0_43 = arith.constant 0 : index
    %53 = vector.load %arg11[%c0_42, %c0_43] : memref<256x256xbf16, #tpu.memory_space<vmem>>, vector<256x256xbf16>
    %c0_44 = arith.constant 0 : index
    %c0_45 = arith.constant 0 : index
    %54 = vector.load %arg12[%c0_44, %c0_45] : memref<1x256xf32, #tpu.memory_space<vmem>>, vector<1x256xf32>
    %cst_46 = arith.constant dense<0.000000e+00> : vector<128x256xf32>
    %55 = tpu.matmul %52, %53, %cst_46 {dimension_numbers = #tpu.dot_dimension_numbers<[1], [0], [0], [1], [0, 0, 1, 1], [], []>} : vector<128x256xbf16>, vector<256x256xbf16>, vector<128x256xf32> -> vector<128x256xf32>
    %c0_47 = arith.constant 0 : index
    %c0_48 = arith.constant 0 : index
    %56 = vector.load %arg0[%c0_47, %c0_48] : memref<128x128xbf16, #tpu.memory_space<vmem>>, vector<128x128xbf16>
    %57 = arith.truncf %55 : vector<128x256xf32> to vector<128x256xbf16>
    %cst_49 = arith.constant dense<0.000000e+00> : vector<128x256xf32>
    %58 = tpu.matmul %56, %57, %cst_49 {dimension_numbers = #tpu.dot_dimension_numbers<[1], [0], [0], [1], [0, 0, 1, 1], [], []>} : vector<128x128xbf16>, vector<128x256xbf16>, vector<128x256xf32> -> vector<128x256xf32>
    %59 = vector.broadcast %54 : vector<1x256xf32> to vector<128x256xf32>
    %60 = arith.addf %58, %59 : vector<128x256xf32>
    %cst_50 = arith.constant 0.000000e+00 : f32
    %61 = vector.broadcast %cst_50 : f32 to vector<128x256xf32>
    %62 = arith.maximumf %60, %61 : vector<128x256xf32>
    %63 = arith.truncf %62 : vector<128x256xf32> to vector<128x256xbf16>
    %c0_51 = arith.constant 0 : index
    %c0_52 = arith.constant 0 : index
    %64 = vector.load %arg13[%c0_51, %c0_52] : memref<256x512xbf16, #tpu.memory_space<vmem>>, vector<256x512xbf16>
    %c0_53 = arith.constant 0 : index
    %c0_54 = arith.constant 0 : index
    %65 = vector.load %arg14[%c0_53, %c0_54] : memref<1x512xf32, #tpu.memory_space<vmem>>, vector<1x512xf32>
    %c0_55 = arith.constant 0 : index
    %c0_56 = arith.constant 0 : index
    %66 = vector.load %arg0[%c0_55, %c0_56] : memref<128x128xbf16, #tpu.memory_space<vmem>>, vector<128x128xbf16>
    %cst_57 = arith.constant dense<0.000000e+00> : vector<128x256xf32>
    %67 = tpu.matmul %66, %63, %cst_57 {dimension_numbers = #tpu.dot_dimension_numbers<[1], [0], [0], [1], [0, 0, 1, 1], [], []>} : vector<128x128xbf16>, vector<128x256xbf16>, vector<128x256xf32> -> vector<128x256xf32>
    %68 = arith.truncf %67 : vector<128x256xf32> to vector<128x256xbf16>
    %cst_58 = arith.constant dense<0.000000e+00> : vector<128x512xf32>
    %69 = tpu.matmul %68, %64, %cst_58 {dimension_numbers = #tpu.dot_dimension_numbers<[1], [0], [0], [1], [0, 0, 1, 1], [], []>} : vector<128x256xbf16>, vector<256x512xbf16>, vector<128x512xf32> -> vector<128x512xf32>
    %70 = vector.broadcast %65 : vector<1x512xf32> to vector<128x512xf32>
    %71 = arith.addf %69, %70 : vector<128x512xf32>
    %cst_59 = arith.constant 0.000000e+00 : f32
    %72 = vector.broadcast %cst_59 : f32 to vector<128x512xf32>
    %73 = arith.maximumf %71, %72 : vector<128x512xf32>
    %74 = arith.truncf %73 : vector<128x512xf32> to vector<128x512xbf16>
    %c0_60 = arith.constant 0 : index
    %c0_61 = arith.constant 0 : index
    %75 = vector.load %arg15[%c0_60, %c0_61] : memref<512x512xbf16, #tpu.memory_space<vmem>>, vector<512x512xbf16>
    %c0_62 = arith.constant 0 : index
    %c0_63 = arith.constant 0 : index
    %76 = vector.load %arg16[%c0_62, %c0_63] : memref<1x512xf32, #tpu.memory_space<vmem>>, vector<1x512xf32>
    %cst_64 = arith.constant dense<0.000000e+00> : vector<128x512xf32>
    %77 = tpu.matmul %74, %75, %cst_64 {dimension_numbers = #tpu.dot_dimension_numbers<[1], [0], [0], [1], [0, 0, 1, 1], [], []>} : vector<128x512xbf16>, vector<512x512xbf16>, vector<128x512xf32> -> vector<128x512xf32>
    %c0_65 = arith.constant 0 : index
    %c0_66 = arith.constant 0 : index
    %78 = vector.load %arg0[%c0_65, %c0_66] : memref<128x128xbf16, #tpu.memory_space<vmem>>, vector<128x128xbf16>
    %79 = arith.truncf %77 : vector<128x512xf32> to vector<128x512xbf16>
    %cst_67 = arith.constant dense<0.000000e+00> : vector<128x512xf32>
    %80 = tpu.matmul %78, %79, %cst_67 {dimension_numbers = #tpu.dot_dimension_numbers<[1], [0], [0], [1], [0, 0, 1, 1], [], []>} : vector<128x128xbf16>, vector<128x512xbf16>, vector<128x512xf32> -> vector<128x512xf32>
    %81 = vector.broadcast %76 : vector<1x512xf32> to vector<128x512xf32>
    %82 = arith.addf %80, %81 : vector<128x512xf32>
    %cst_68 = arith.constant 0.000000e+00 : f32
    %83 = vector.broadcast %cst_68 : f32 to vector<128x512xf32>
    %84 = arith.maximumf %82, %83 : vector<128x512xf32>
    %85 = arith.truncf %84 : vector<128x512xf32> to vector<128x512xbf16>
    %c0_69 = arith.constant 0 : index
    %c0_70 = arith.constant 0 : index
    %86 = vector.load %arg17[%c0_69, %c0_70] : memref<16x128xbf16, #tpu.memory_space<vmem>>, vector<16x128xbf16>
    %cst_71 = arith.constant dense<0.000000e+00> : vector<16x512xf32>
    %87 = tpu.matmul %86, %85, %cst_71 {dimension_numbers = #tpu.dot_dimension_numbers<[1], [0], [0], [1], [0, 0, 1, 1], [], []>} : vector<16x128xbf16>, vector<128x512xbf16>, vector<16x512xf32> -> vector<16x512xf32>
    %88 = arith.truncf %87 : vector<16x512xf32> to vector<16x512xbf16>
    %c0_72 = arith.constant 0 : index
    %c0_73 = arith.constant 0 : index
    %89 = vector.load %arg18[%c0_72, %c0_73] : memref<512x128xbf16, #tpu.memory_space<vmem>>, vector<512x128xbf16>
    %cst_74 = arith.constant dense<0.000000e+00> : vector<16x128xf32>
    %90 = tpu.matmul %88, %89, %cst_74 {dimension_numbers = #tpu.dot_dimension_numbers<[1], [0], [0], [1], [0, 0, 1, 1], [], []>} : vector<16x512xbf16>, vector<512x128xbf16>, vector<16x128xf32> -> vector<16x128xf32>
    %c0_75 = arith.constant 0 : index
    %c0_76 = arith.constant 0 : index
    %91 = vector.load %arg19[%c0_75, %c0_76] : memref<1x128xf32, #tpu.memory_space<vmem>>, vector<1x128xf32>
    %92 = vector.broadcast %91 : vector<1x128xf32> to vector<16x128xf32>
    %93 = arith.addf %90, %92 : vector<16x128xf32>
    %cst_77 = arith.constant 0.000000e+00 : f32
    %94 = vector.broadcast %cst_77 : f32 to vector<16x128xf32>
    %95 = arith.maximumf %93, %94 : vector<16x128xf32>
    %96 = arith.truncf %95 : vector<16x128xf32> to vector<16x128xbf16>
    %c0_78 = arith.constant 0 : index
    %c0_79 = arith.constant 0 : index
    %97 = vector.load %arg20[%c0_78, %c0_79] : memref<128x128xbf16, #tpu.memory_space<vmem>>, vector<128x128xbf16>
    %cst_80 = arith.constant dense<0.000000e+00> : vector<16x128xf32>
    %98 = tpu.matmul %96, %97, %cst_80 {dimension_numbers = #tpu.dot_dimension_numbers<[1], [0], [0], [1], [0, 0, 1, 1], [], []>} : vector<16x128xbf16>, vector<128x128xbf16>, vector<16x128xf32> -> vector<16x128xf32>
    %c0_81 = arith.constant 0 : index
    %c0_82 = arith.constant 0 : index
    %99 = vector.load %arg21[%c0_81, %c0_82] : memref<1x128xf32, #tpu.memory_space<vmem>>, vector<1x128xf32>
    %100 = vector.broadcast %99 : vector<1x128xf32> to vector<16x128xf32>
    %101 = arith.addf %98, %100 : vector<16x128xf32>
    %c0_83 = arith.constant 0 : index
    %c0_84 = arith.constant 0 : index
    %102 = vector.load %arg22[%c0_83, %c0_84] : memref<16x128xf32, #tpu.memory_space<vmem>>, vector<16x128xf32>
    tpu.vector_store %arg22[%c0_83, %c0_84], %101 {strides = array<i32>} : memref<16x128xf32, #tpu.memory_space<vmem>>, vector<16x128xf32>,
    return
  }
}

</mosaic_0001>

<bundles_post_ra>
// kernel: directional_gnn_forward.1
= control target key start
LH: loop header
LB: loop body
LE: loop exit
PB: predicated region body
PF: predicated region fallthrough
CT: control target
= control target key end

     0   :  { %vm6421_vm0 = vmmov 0   ;;  %s8062_s1 = inlined_call_operand.vmem [shape: bf16[128,128], index: 1, kind: input, shape index: {}]   ;;  %s8063_s0 = inlined_call_operand.vmem [shape: bf16[128,128], index: 0, kind: input, shape index: {}]   ;;  %s8064_s3 = inlined_call_operand.vmem [shape: bf16[128,128], index: 3, kind: input, shape index: {}]   ;;  %s8065_s2 = inlined_call_operand.vmem [shape: f32[1,128], index: 2, kind: input, shape index: {}]   ;;  %s8066_s5 = inlined_call_operand.vmem [shape: bf16[128,128], index: 5, kind: input, shape index: {}]   ;;  %s8067_s4 = inlined_call_operand.vmem [shape: f32[1,128], index: 4, kind: input, shape index: {}]   ;;  %s8068_s7 = inlined_call_operand.vmem [shape: bf16[128,128], index: 7, kind: input, shape index: {}]   ;;  %s8069_s6 = inlined_call_operand.vmem [shape: f32[1,128], index: 6, kind: input, shape index: {}]   ;;  %s8070_s9 = inlined_call_operand.vmem [shape: bf16[128,256], index: 9, kind: input, shape index: {}]   ;;  %s8071_s8 = inlined_call_operand.vmem [shape: f32[1,128], index: 8, kind: input, shape index: {}]   ;;  %s8072_s11 = inlined_call_operand.vmem [shape: bf16[256,256], index: 11, kind: input, shape index: {}]   ;;  %s8073_s10 = inlined_call_operand.vmem [shape: f32[1,256], index: 10, kind: input, shape index: {}]   ;;  %s8074_s12 = inlined_call_operand.vmem [shape: f32[1,256], index: 12, kind: input, shape index: {}]   ;;  %s8075_s13 = inlined_call_operand.vmem [shape: bf16[256,512], index: 13, kind: input, shape index: {}]   ;;  %s8076_s15 = inlined_call_operand.vmem [shape: bf16[512,512], index: 15, kind: input, shape index: {}]   ;;  %s8077_s14 = inlined_call_operand.vmem [shape: f32[1,512], index: 14, kind: input, shape index: {}]   ;;  %s8078_s17 = inlined_call_operand.vmem [shape: bf16[16,128], index: 17, kind: input, shape index: {}]   ;;  %s8079_s18 = inlined_call_operand.vmem [shape: bf16[512,128], index: 18, kind: input, shape index: {}]   ;;  %s8080_s16 = inlined_call_operand.vmem [shape: f32[1,512], index: 16, kind: input, shape index: {}]   ;;  %s8081_s20 = inlined_call_operand.vmem [shape: bf16[128,128], index: 20, kind: input, shape index: {}]   ;;  %s8082_s19 = inlined_call_operand.vmem [shape: f32[1,128], index: 19, kind: input, shape index: {}]   ;;  %s8083_s21 = inlined_call_operand.vmem [shape: f32[1,128], index: 21, kind: input, shape index: {}]   ;;  %s8084_s22 = inlined_call_operand.vmem [shape: f32[16,128], index: 22, kind: output, shape index: {}]  }
   0x1   :  { %8090 = sst [smem:[#allocation2_spill]] %s8062_s1 }
   0x2   :  { %8091 = sst [smem:[#allocation3_spill]] %s8063_s0  ;;  %s8097_s29 = sld [smem:[#allocation2_spill]] }
   0x3   :  { %8092 = sst [smem:[#allocation4_spill]] %s8064_s3  ;;  %s8098_s25 = sld [smem:[#allocation3_spill]] }
   0x4   :  { %8093 = sst [smem:[#allocation5_spill]] %s8065_s2 }
   0x5   :  { %8094 = sst [smem:[#allocation6_spill]] %s8066_s5  ;;  %s8099_s5 = sld [smem:[#allocation4_spill]] }
   0x6   :  { %8095 = sst [smem:[#allocation7_spill]] %s8067_s4  ;;  %s8100_s27 = sld [smem:[#allocation5_spill]] }
   0x7   :  { %8096 = sst [smem:[#allocation8_spill]] %s8068_s7  ;;  %s8101_s28 = sld [smem:[#allocation6_spill]] }
   0x8   :  { %v5955_v0 = vld [vmem:[%s8097_s29] sm:$0xff]   ;;  %v5956_v1 = vld [vmem:[%s8097_s29 + $0x8] sm:$0xff]   ;;  %v5957_v2 = vld [vmem:[%s8097_s29 + $0x10] sm:$0xff]   ;;  %s8103_s4 = sld [smem:[#allocation8_spill]] }
   0x9   :  { %5612 = vmatprep.subr.bf16.mxu0 %v5955_v0  ;;  %v5958_v3 = vld [vmem:[%s8097_s29 + $0x18] sm:$0xff]   ;;  %v6552_v4 = vld [vmem:[%s8098_s25] sm:$0xff]   ;;  %v5960_v6 = vld [vmem:[%s8097_s29 + $0x28] sm:$0xff]  }
   0xa   :  { %5613 = vmatpush3.bf16.msra.mxu0 %v5955_v0  ;;  %5628 = vmatprep.mubr.bf16.mxu0 %v6552_v4  ;;  %v5959_v5 = vld [vmem:[%s8097_s29 + $0x20] sm:$0xff]   ;;  %v5961_v9 = vld [vmem:[%s8097_s29 + $0x30] sm:$0xff]   ;;  %v5962_v11 = vld [vmem:[%s8097_s29 + $0x38] sm:$0xff]   ;;  %s8102_s29 = sld [smem:[#allocation7_spill]] }
   0xb   :  { %5614 = vmatprep.subr.bf16.mxu0 %v5956_v1  ;;  %v5971_v7 = vld [vmem:[%s8099_s5] sm:$0xff]   ;;  %v5972_v8 = vld [vmem:[%s8099_s5 + $0x8] sm:$0xff]   ;;  %v5973_v10 = vld [vmem:[%s8099_s5 + $0x10] sm:$0xff]  }
   0xc   :  { %5644 = vmatprep.subr.bf16.mxu1 %v5971_v7  ;;  %v5974_v12 = vld [vmem:[%s8099_s5 + $0x18] sm:$0xff]   ;;  %v5975_v13 = vld [vmem:[%s8099_s5 + $0x20] sm:$0xff]   ;;  %v6585_v14 = vld [vmem:[%s8098_s25 + $0x8] sm:$0xff]  }
   0xd   :  { %5645 = vmatpush3.bf16.msra.mxu1 %v5971_v7  ;;  %v6590_v15 = vld [vmem:[%s8098_s25 + $0x10] sm:$0xff]   ;;  %v5976_v16 = vld [vmem:[%s8099_s5 + $0x28] sm:$0xff]   ;;  %v6600_v17 = vld [vmem:[%s8098_s25 + $0x18] sm:$0xff]  }
   0xe   :  { %5615 = vmatpush3.bf16.msra.mxu0 %v5956_v1  ;;  %5646 = vmatprep.subr.bf16.mxu1 %v5972_v8  ;;  %v6605_v18 = vld [vmem:[%s8098_s25 + $0x20] sm:$0xff]   ;;  %v6612_v19 = vld [vmem:[%s8098_s25 + $0x28] sm:$0xff]   ;;  %v6617_v20 = vld [vmem:[%s8098_s25 + $0x30] sm:$0xff]  }
   0xf   :  { %5616 = vmatprep.subr.bf16.mxu0 %v5957_v2  ;;  %v6624_v21 = vld [vmem:[%s8098_s25 + $0x38] sm:$0xff]   ;;  %v5977_v22 = vld [vmem:[%s8099_s5 + $0x30] sm:$0xff]   ;;  %v5104_v24 = vld [vmem:[%s8100_s27] ss:$0 sm:$0xff] }
  0x10   :  { %v5978_v23 = vld [vmem:[%s8099_s5 + $0x38] sm:$0xff]  }
  0x11   :  { %5647 = vmatpush3.bf16.msra.mxu1 %v5972_v8 }
  0x12   :  { %5617 = vmatpush3.bf16.msra.mxu0 %v5957_v2  ;;  %5648 = vmatprep.subr.bf16.mxu1 %v5973_v10 }
  0x13   :  { %5618 = vmatprep.subr.bf16.mxu0 %v5958_v3 }
  0x15   :  { %5649 = vmatpush3.bf16.msra.mxu1 %v5973_v10 }
  0x16   :  { %5619 = vmatpush3.bf16.msra.mxu0 %v5958_v3  ;;  %5650 = vmatprep.subr.bf16.mxu1 %v5974_v12 }
  0x17   :  { %5620 = vmatprep.subr.bf16.mxu0 %v5959_v5 }
  0x19   :  { %5651 = vmatpush3.bf16.msra.mxu1 %v5974_v12 }
  0x1a   :  { %5621 = vmatpush3.bf16.msra.mxu0 %v5959_v5  ;;  %5652 = vmatprep.subr.bf16.mxu1 %v5975_v13 }
  0x1b   :  { %5622 = vmatprep.subr.bf16.mxu0 %v5960_v6 }
  0x1d   :  { %5653 = vmatpush3.bf16.msra.mxu1 %v5975_v13 }
  0x1e   :  { %5623 = vmatpush3.bf16.msra.mxu0 %v5960_v6  ;;  %5654 = vmatprep.subr.bf16.mxu1 %v5976_v16 }
  0x1f   :  { %5624 = vmatprep.subr.bf16.mxu0 %v5961_v9 }
  0x21   :  { %5655 = vmatpush3.bf16.msra.mxu1 %v5976_v16 }
  0x22   :  { %5625 = vmatpush3.bf16.msra.mxu0 %v5961_v9  ;;  %5656 = vmatprep.subr.bf16.mxu1 %v5977_v22 }
  0x23   :  { %5626 = vmatprep.subr.bf16.mxu0 %v5962_v11 }
  0x25   :  { %5657 = vmatpush3.bf16.msra.mxu1 %v5977_v22 }
  0x26   :  { %5627 = vmatpush3.bf16.msra.mxu0 %v5962_v11  ;;  %5658 = vmatprep.subr.bf16.mxu1 %v5978_v23 }
  0x29   :  { %5629 = vmatmul.mubr.bf16.vlgmr.msra.gmra.mrb[0].mxu0 %v6585_v14  ;;  %5659 = vmatpush3.bf16.msra.mxu1 %v5978_v23 }
  0x2a   :  { %5632 = vmatprep.mubr.bf16.mxu0 %v6590_v15 }
  0x31   :  { %5633 = vmatmul.mubr.bf16.gmra.mrb[4].mxu0 %v6600_v17 }
  0x32   :  { %5636 = vmatprep.mubr.bf16.mxu0 %v6605_v18 }
  0x39   :  { %5637 = vmatmul.mubr.bf16.gmra.mrb[8].mxu0 %v6612_v19 }
  0x3a   :  { %5640 = vmatprep.mubr.bf16.mxu0 %v6617_v20 }
  0x41   :  { %5641 = vmatmul.mubr.bf16.gmra.mrb[12].mxu0 %v6624_v21 }
  0x42   :  { %5692 = vmatprep.mubr.bf16.mxu0 %v6552_v4 }
  0xfc   :  { %v5630_v25 = vpop.f32.mrb[0].mxu0 }
  0xfd   :  { %v250_v26 = vadd.f32 %v5630_v25, %v5104_v24  ;;  %v241_v27 = vpop.f32.mrb[1].mxu0 }
  0xfe   :  { %v242_v28 = vadd.f32 %v5104_v24, %v241_v27  ;;  %v5631_v29 = vpop.f32.mrb[2].mxu0  ;;  %v5980_v27 = vld [vmem:[%s8101_s28 + $0x8] sm:$0xff]  }
  0xff   :  { %v253_v30 = vadd.f32 %v5631_v29, %v5104_v24  ;;  %v244_v31 = vpop.f32.mrb[3].mxu0  ;;  %v306_v33 = vmax.f32 %v250_v26, 0.0  ;;  %v5979_v26 = vld [vmem:[%s8101_s28] sm:$0xff]  }
 0x100   :  { %v245_v32 = vadd.f32 %v5104_v24, %v244_v31  ;;  %v304_v35 = vmax.f32 %v242_v28, 0.0  ;;  %5708 = vmatprep.subr.bf16.mxu1 %v5979_v26  ;;  %v5982_v28 = vld [vmem:[%s8101_s28 + $0x18] sm:$0xff]   ;;  %v5983_v29 = vld [vmem:[%s8101_s28 + $0x20] sm:$0xff]  }
 0x101   :  { %v307_v34 = vmax.f32 %v253_v30, 0.0  ;;  %v5984_v30 = vld [vmem:[%s8101_s28 + $0x28] sm:$0xff]  }
 0x102   :  { %v305_v36 = vmax.f32 %v245_v32, 0.0 }
 0x103   :  { %v321_v37 = vpack.c.bf16 %v307_v34, %v306_v33 }
 0x104   :  { %v5634_v38 = vpop.f32.mrb[4].mxu0  ;;  %v320_v39 = vpack.c.bf16 %v305_v36, %v304_v35 }
 0x105   :  { %v266_v40 = vadd.f32 %v5634_v38, %v5104_v24  ;;  %v257_v41 = vpop.f32.mrb[5].mxu0 }
 0x106   :  { %v258_v42 = vadd.f32 %v5104_v24, %v257_v41  ;;  %v5635_v43 = vpop.f32.mrb[6].mxu0  ;;  %5660 = vmatprep.mubr.bf16.mxu1 %v320_v39 }
 0x107   :  { %v269_v44 = vadd.f32 %v5635_v43, %v5104_v24  ;;  %v260_v45 = vpop.f32.mrb[7].mxu0  ;;  %5661 = vmatmul.mubr.bf16.vlgmr.msra.gmra.mrb[0].mxu1 %v321_v37  ;;  %v310_v47 = vmax.f32 %v266_v40, 0.0 }
 0x108   :  { %v261_v46 = vadd.f32 %v5104_v24, %v260_v45  ;;  %v308_v49 = vmax.f32 %v258_v42, 0.0  ;;  %5709 = vmatpush3.bf16.msra.mxu1 %v5979_v26 }
 0x109   :  { %v311_v48 = vmax.f32 %v269_v44, 0.0  ;;  %5710 = vmatprep.subr.bf16.mxu1 %v5980_v27 }
 0x10a   :  { %v309_v50 = vmax.f32 %v261_v46, 0.0 }
 0x10b   :  { %v323_v51 = vpack.c.bf16 %v311_v48, %v310_v47 }
 0x10c   :  { %v322_v52 = vpack.c.bf16 %v309_v50, %v308_v49  ;;  %v5638_v53 = vpop.f32.mrb[8].mxu0  ;;  %5711 = vmatpush3.bf16.msra.mxu1 %v5980_v27 }
 0x10d   :  { %v282_v54 = vadd.f32 %v5638_v53, %v5104_v24  ;;  %v273_v55 = vpop.f32.mrb[9].mxu0 }
 0x10e   :  { %v274_v56 = vadd.f32 %v5104_v24, %v273_v55  ;;  %v5639_v57 = vpop.f32.mrb[10].mxu0  ;;  %5664 = vmatprep.mubr.bf16.mxu1 %v322_v52  ;;  %v5985_v55 = vld [vmem:[%s8101_s28 + $0x30] sm:$0xff]  }
 0x10f   :  { %v285_v58 = vadd.f32 %v5639_v57, %v5104_v24  ;;  %v276_v59 = vpop.f32.mrb[11].mxu0  ;;  %5665 = vmatmul.mubr.bf16.gmra.mrb[4].mxu1 %v323_v51  ;;  %v314_v61 = vmax.f32 %v282_v54, 0.0  ;;  %v5129_v57 = vld [vmem:[%s8102_s29] ss:$0 sm:$0xff] }
 0x110   :  { %v277_v60 = vadd.f32 %v5104_v24, %v276_v59  ;;  %v312_v63 = vmax.f32 %v274_v56, 0.0  ;;  %v5986_v56 = vld [vmem:[%s8101_s28 + $0x38] sm:$0xff]  }
 0x111   :  { %v315_v62 = vmax.f32 %v285_v58, 0.0 }
 0x112   :  { %v313_v0 = vmax.f32 %v277_v60, 0.0 }
 0x113   :  { %v325_v1 = vpack.c.bf16 %v315_v62, %v314_v61 }
 0x114   :  { %v324_v2 = vpack.c.bf16 %v313_v0, %v312_v63  ;;  %v5642_v3 = vpop.f32.mrb[12].mxu0 }
 0x115   :  { %v298_v5 = vadd.f32 %v5642_v3, %v5104_v24  ;;  %v289_v6 = vpop.f32.mrb[13].mxu0 }
 0x116   :  { %v290_v7 = vadd.f32 %v5104_v24, %v289_v6  ;;  %v5643_v8 = vpop.f32.mrb[14].mxu0  ;;  %5668 = vmatprep.mubr.bf16.mxu1 %v324_v2 }
 0x117   :  { %v301_v9 = vadd.f32 %v5643_v8, %v5104_v24  ;;  %v292_v10 = vpop.f32.mrb[15].mxu0  ;;  %5669 = vmatmul.mubr.bf16.gmra.mrb[8].mxu1 %v325_v1  ;;  %v318_v12 = vmax.f32 %v298_v5, 0.0 }
 0x118   :  { %v293_v11 = vadd.f32 %v5104_v24, %v292_v10  ;;  %v316_v16 = vmax.f32 %v290_v7, 0.0  ;;  %v5981_v24 = vld [vmem:[%s8101_s28 + $0x10] sm:$0xff]  }
 0x119   :  { %v319_v13 = vmax.f32 %v301_v9, 0.0  ;;  %5712 = vmatprep.subr.bf16.mxu1 %v5981_v24 }
 0x11a   :  { %v317_v22 = vmax.f32 %v293_v11, 0.0  ;;  %5713 = vmatpush3.bf16.msra.mxu1 %v5981_v24 }
 0x11b   :  { %v327_v23 = vpack.c.bf16 %v319_v13, %v318_v12  ;;  %5714 = vmatprep.subr.bf16.mxu1 %v5982_v28 }
 0x11c   :  { %v326_v25 = vpack.c.bf16 %v317_v22, %v316_v16 }
 0x11e   :  { %5672 = vmatprep.mubr.bf16.mxu1 %v326_v25  ;;  %5715 = vmatpush3.bf16.msra.mxu1 %v5982_v28 }
 0x11f   :  { %5673 = vmatmul.mubr.bf16.gmra.mrb[12].mxu1 %v327_v23  ;;  %5716 = vmatprep.subr.bf16.mxu1 %v5983_v29 }
 0x122   :  { %5717 = vmatpush3.bf16.msra.mxu1 %v5983_v29 }
 0x123   :  { %5718 = vmatprep.subr.bf16.mxu1 %v5984_v30 }
 0x126   :  { %5719 = vmatpush3.bf16.msra.mxu1 %v5984_v30 }
 0x127   :  { %5720 = vmatprep.subr.bf16.mxu1 %v5985_v55 }
 0x12a   :  { %5721 = vmatpush3.bf16.msra.mxu1 %v5985_v55 }
 0x12b   :  { %5722 = vmatprep.subr.bf16.mxu1 %v5986_v56 }
 0x12e   :  { %5723 = vmatpush3.bf16.msra.mxu1 %v5986_v56 }
 0x1da   :  { %v5662_v31 = vpop.f32.mrb[0].mxu1 }
 0x1db   :  { %v427_v32 = vpop.f32.mrb[1].mxu1 }
 0x1dc   :  { %v5663_v33 = vpop.f32.mrb[2].mxu1 }
 0x1dd   :  { %v491_v34 = vpack.c.bf16 %v5663_v33, %v5662_v31  ;;  %v430_v35 = vpop.f32.mrb[3].mxu1 }
 0x1de   :  { %v490_v36 = vpack.c.bf16 %v430_v35, %v427_v32 }
 0x1e0   :  { %5676 = vmatprep.subr.bf16.mxu0 %v490_v36 }
 0x1e1   :  { %5677 = vmatpush3.bf16.msra.mxu0 %v490_v36 }
 0x1e2   :  { %v5666_v37 = vpop.f32.mrb[4].mxu1  ;;  %5678 = vmatprep.subr.bf16.mxu0 %v491_v34 }
 0x1e3   :  { %v443_v38 = vpop.f32.mrb[5].mxu1 }
 0x1e4   :  { %v5667_v39 = vpop.f32.mrb[6].mxu1 }
 0x1e5   :  { %v493_v40 = vpack.c.bf16 %v5667_v39, %v5666_v37  ;;  %v446_v41 = vpop.f32.mrb[7].mxu1  ;;  %5679 = vmatpush3.bf16.msra.mxu0 %v491_v34 }
 0x1e6   :  { %v492_v42 = vpack.c.bf16 %v446_v41, %v443_v38 }
 0x1e8   :  { %5680 = vmatprep.subr.bf16.mxu0 %v492_v42 }
 0x1e9   :  { %5681 = vmatpush3.bf16.msra.mxu0 %v492_v42 }
 0x1ea   :  { %v5670_v43 = vpop.f32.mrb[8].mxu1  ;;  %5682 = vmatprep.subr.bf16.mxu0 %v493_v40 }
 0x1eb   :  { %v459_v44 = vpop.f32.mrb[9].mxu1 }
 0x1ec   :  { %v5671_v45 = vpop.f32.mrb[10].mxu1 }
 0x1ed   :  { %v495_v46 = vpack.c.bf16 %v5671_v45, %v5670_v43  ;;  %v462_v47 = vpop.f32.mrb[11].mxu1  ;;  %5683 = vmatpush3.bf16.msra.mxu0 %v493_v40 }
 0x1ee   :  { %v494_v48 = vpack.c.bf16 %v462_v47, %v459_v44 }
 0x1f0   :  { %5684 = vmatprep.subr.bf16.mxu0 %v494_v48 }
 0x1f1   :  { %5685 = vmatpush3.bf16.msra.mxu0 %v494_v48 }
 0x1f2   :  { %v5674_v49 = vpop.f32.mrb[12].mxu1  ;;  %5686 = vmatprep.subr.bf16.mxu0 %v495_v46 }
 0x1f3   :  { %v475_v50 = vpop.f32.mrb[13].mxu1 }
 0x1f4   :  { %v5675_v51 = vpop.f32.mrb[14].mxu1 }
 0x1f5   :  { %v497_v52 = vpack.c.bf16 %v5675_v51, %v5674_v49  ;;  %v478_v53 = vpop.f32.mrb[15].mxu1  ;;  %5687 = vmatpush3.bf16.msra.mxu0 %v495_v46 }
 0x1f6   :  { %v496_v54 = vpack.c.bf16 %v478_v53, %v475_v50 }
 0x1f8   :  { %5688 = vmatprep.subr.bf16.mxu0 %v496_v54 }
 0x1f9   :  { %5689 = vmatpush3.bf16.msra.mxu0 %v496_v54 }
 0x1fa   :  { %5690 = vmatprep.subr.bf16.mxu0 %v497_v52 }
 0x1fd   :  { %5691 = vmatpush3.bf16.msra.mxu0 %v497_v52 }
 0x200   :  { %5693 = vmatmul.mubr.bf16.vlgmr.msra.gmra.mrb[16].mxu0 %v6585_v14 }
 0x201   :  { %5696 = vmatprep.mubr.bf16.mxu0 %v6590_v15 }
 0x208   :  { %5697 = vmatmul.mubr.bf16.gmra.mrb[20].mxu0 %v6600_v17 }
 0x209   :  { %5700 = vmatprep.mubr.bf16.mxu0 %v6605_v18 }
 0x210   :  { %5701 = vmatmul.mubr.bf16.gmra.mrb[24].mxu0 %v6612_v19 }
 0x211   :  { %5704 = vmatprep.mubr.bf16.mxu0 %v6617_v20 }
 0x218   :  { %5705 = vmatmul.mubr.bf16.gmra.mrb[28].mxu0 %v6624_v21 }
 0x219   :  { %5756 = vmatprep.mubr.bf16.mxu0 %v6552_v4 }
 0x2d3   :  { %v5694_v58 = vpop.f32.mrb[16].mxu0 }
 0x2d4   :  { %v547_v59 = vadd.f32 %v5694_v58, %v5129_v57  ;;  %v538_v60 = vpop.f32.mrb[17].mxu0 }
 0x2d5   :  { %v539_v61 = vadd.f32 %v5129_v57, %v538_v60  ;;  %v5695_v62 = vpop.f32.mrb[18].mxu0  ;;  %v5988_v60 = vld [vmem:[%s8103_s4 + $0x8] sm:$0xff]  }
 0x2d6   :  { %v550_v63 = vadd.f32 %v5695_v62, %v5129_v57  ;;  %v541_v0 = vpop.f32.mrb[19].mxu0  ;;  %v603_v2 = vmax.f32 %v547_v59, 0.0  ;;  %v5987_v59 = vld [vmem:[%s8103_s4] sm:$0xff]  }
 0x2d7   :  { %v542_v1 = vadd.f32 %v5129_v57, %v541_v0  ;;  %v601_v5 = vmax.f32 %v539_v61, 0.0  ;;  %5772 = vmatprep.subr.bf16.mxu1 %v5987_v59  ;;  %v5990_v61 = vld [vmem:[%s8103_s4 + $0x18] sm:$0xff]   ;;  %v5991_v62 = vld [vmem:[%s8103_s4 + $0x20] sm:$0xff]  }
 0x2d8   :  { %v604_v3 = vmax.f32 %v550_v63, 0.0  ;;  %v5992_v63 = vld [vmem:[%s8103_s4 + $0x28] sm:$0xff]  }
 0x2d9   :  { %v602_v6 = vmax.f32 %v542_v1, 0.0 }
 0x2da   :  { %v618_v7 = vpack.c.bf16 %v604_v3, %v603_v2 }
 0x2db   :  { %v617_v8 = vpack.c.bf16 %v602_v6, %v601_v5  ;;  %v5698_v9 = vpop.f32.mrb[20].mxu0 }
 0x2dc   :  { %v563_v10 = vadd.f32 %v5698_v9, %v5129_v57  ;;  %v554_v11 = vpop.f32.mrb[21].mxu0 }
 0x2dd   :  { %v555_v12 = vadd.f32 %v5129_v57, %v554_v11  ;;  %v5699_v13 = vpop.f32.mrb[22].mxu0  ;;  %5724 = vmatprep.mubr.bf16.mxu1 %v617_v8 }
 0x2de   :  { %v566_v16 = vadd.f32 %v5699_v13, %v5129_v57  ;;  %v557_v22 = vpop.f32.mrb[23].mxu0  ;;  %5725 = vmatmul.mubr.bf16.vlgmr.msra.gmra.mrb[16].mxu1 %v618_v7  ;;  %v607_v25 = vmax.f32 %v563_v10, 0.0 }
 0x2df   :  { %v558_v23 = vadd.f32 %v5129_v57, %v557_v22  ;;  %v605_v27 = vmax.f32 %v555_v12, 0.0  ;;  %5773 = vmatpush3.bf16.msra.mxu1 %v5987_v59 }
 0x2e0   :  { %v608_v26 = vmax.f32 %v566_v16, 0.0  ;;  %5774 = vmatprep.subr.bf16.mxu1 %v5988_v60 }
 0x2e1   :  { %v606_v24 = vmax.f32 %v558_v23, 0.0 }
 0x2e2   :  { %v620_v28 = vpack.c.bf16 %v608_v26, %v607_v25 }
 0x2e3   :  { %v619_v29 = vpack.c.bf16 %v606_v24, %v605_v27  ;;  %v5702_v30 = vpop.f32.mrb[24].mxu0  ;;  %5775 = vmatpush3.bf16.msra.mxu1 %v5988_v60 }
 0x2e4   :  { %v579_v31 = vadd.f32 %v5702_v30, %v5129_v57  ;;  %v570_v32 = vpop.f32.mrb[25].mxu0 }
 0x2e5   :  { %v571_v33 = vadd.f32 %v5129_v57, %v570_v32  ;;  %v5703_v34 = vpop.f32.mrb[26].mxu0  ;;  %5728 = vmatprep.mubr.bf16.mxu1 %v619_v29  ;;  %v5993_v32 = vld [vmem:[%s8103_s4 + $0x30] sm:$0xff]  }
 0x2e6   :  { %v582_v35 = vadd.f32 %v5703_v34, %v5129_v57  ;;  %v573_v36 = vpop.f32.mrb[27].mxu0  ;;  %5729 = vmatmul.mubr.bf16.gmra.mrb[20].mxu1 %v620_v28  ;;  %v611_v38 = vmax.f32 %v579_v31, 0.0  ;;  %v5138_v34 = vld [vmem:[%s8069_s6] ss:$0 sm:$0xff] }
 0x2e7   :  { %v574_v37 = vadd.f32 %v5129_v57, %v573_v36  ;;  %v609_v40 = vmax.f32 %v571_v33, 0.0  ;;  %v5994_v33 = vld [vmem:[%s8103_s4 + $0x38] sm:$0xff]  }
 0x2e8   :  { %v612_v39 = vmax.f32 %v582_v35, 0.0 }
 0x2e9   :  { %v610_v41 = vmax.f32 %v574_v37, 0.0 }
 0x2ea   :  { %v622_v42 = vpack.c.bf16 %v612_v39, %v611_v38 }
 0x2eb   :  { %v621_v43 = vpack.c.bf16 %v610_v41, %v609_v40  ;;  %v5706_v44 = vpop.f32.mrb[28].mxu0 }
 0x2ec   :  { %v595_v45 = vadd.f32 %v5706_v44, %v5129_v57  ;;  %v586_v46 = vpop.f32.mrb[29].mxu0 }
 0x2ed   :  { %v587_v47 = vadd.f32 %v5129_v57, %v586_v46  ;;  %v5707_v48 = vpop.f32.mrb[30].mxu0  ;;  %5732 = vmatprep.mubr.bf16.mxu1 %v621_v43 }
 0x2ee   :  { %v598_v49 = vadd.f32 %v5707_v48, %v5129_v57  ;;  %v589_v50 = vpop.f32.mrb[31].mxu0  ;;  %5733 = vmatmul.mubr.bf16.gmra.mrb[24].mxu1 %v622_v42  ;;  %v615_v52 = vmax.f32 %v595_v45, 0.0 }
 0x2ef   :  { %v590_v51 = vadd.f32 %v5129_v57, %v589_v50  ;;  %v613_v54 = vmax.f32 %v587_v47, 0.0  ;;  %v5989_v57 = vld [vmem:[%s8103_s4 + $0x10] sm:$0xff]  }
 0x2f0   :  { %v616_v53 = vmax.f32 %v598_v49, 0.0  ;;  %5776 = vmatprep.subr.bf16.mxu1 %v5989_v57 }
 0x2f1   :  { %v614_v55 = vmax.f32 %v590_v51, 0.0  ;;  %5777 = vmatpush3.bf16.msra.mxu1 %v5989_v57 }
 0x2f2   :  { %v624_v56 = vpack.c.bf16 %v616_v53, %v615_v52  ;;  %5778 = vmatprep.subr.bf16.mxu1 %v5990_v61 }
 0x2f3   :  { %v623_v58 = vpack.c.bf16 %v614_v55, %v613_v54 }
 0x2f5   :  { %5736 = vmatprep.mubr.bf16.mxu1 %v623_v58  ;;  %5779 = vmatpush3.bf16.msra.mxu1 %v5990_v61 }
 0x2f6   :  { %5737 = vmatmul.mubr.bf16.gmra.mrb[28].mxu1 %v624_v56  ;;  %5780 = vmatprep.subr.bf16.mxu1 %v5991_v62 }
 0x2f9   :  { %5781 = vmatpush3.bf16.msra.mxu1 %v5991_v62 }
 0x2fa   :  { %5782 = vmatprep.subr.bf16.mxu1 %v5992_v63 }
 0x2fd   :  { %5783 = vmatpush3.bf16.msra.mxu1 %v5992_v63 }
 0x2fe   :  { %5784 = vmatprep.subr.bf16.mxu1 %v5993_v32 }
 0x301   :  { %5785 = vmatpush3.bf16.msra.mxu1 %v5993_v32 }
 0x302   :  { %5786 = vmatprep.subr.bf16.mxu1 %v5994_v33 }
 0x305   :  { %5787 = vmatpush3.bf16.msra.mxu1 %v5994_v33 }
 0x3b1   :  { %v5726_v0 = vpop.f32.mrb[16].mxu1 }
 0x3b2   :  { %v724_v1 = vpop.f32.mrb[17].mxu1 }
 0x3b3   :  { %v5727_v2 = vpop.f32.mrb[18].mxu1 }
 0x3b4   :  { %v788_v3 = vpack.c.bf16 %v5727_v2, %v5726_v0  ;;  %v727_v5 = vpop.f32.mrb[19].mxu1 }
 0x3b5   :  { %v787_v6 = vpack.c.bf16 %v727_v5, %v724_v1 }
 0x3b7   :  { %5740 = vmatprep.subr.bf16.mxu0 %v787_v6 }
 0x3b8   :  { %5741 = vmatpush3.bf16.msra.mxu0 %v787_v6 }
 0x3b9   :  { %v5730_v7 = vpop.f32.mrb[20].mxu1  ;;  %5742 = vmatprep.subr.bf16.mxu0 %v788_v3 }
 0x3ba   :  { %v740_v8 = vpop.f32.mrb[21].mxu1 }
 0x3bb   :  { %v5731_v9 = vpop.f32.mrb[22].mxu1 }
 0x3bc   :  { %v790_v10 = vpack.c.bf16 %v5731_v9, %v5730_v7  ;;  %v743_v11 = vpop.f32.mrb[23].mxu1  ;;  %5743 = vmatpush3.bf16.msra.mxu0 %v788_v3 }
 0x3bd   :  { %v789_v12 = vpack.c.bf16 %v743_v11, %v740_v8 }
 0x3bf   :  { %5744 = vmatprep.subr.bf16.mxu0 %v789_v12 }
 0x3c0   :  { %5745 = vmatpush3.bf16.msra.mxu0 %v789_v12 }
 0x3c1   :  { %v5734_v13 = vpop.f32.mrb[24].mxu1  ;;  %5746 = vmatprep.subr.bf16.mxu0 %v790_v10 }
 0x3c2   :  { %v756_v16 = vpop.f32.mrb[25].mxu1 }
 0x3c3   :  { %v5735_v22 = vpop.f32.mrb[26].mxu1 }
 0x3c4   :  { %v792_v23 = vpack.c.bf16 %v5735_v22, %v5734_v13  ;;  %v759_v25 = vpop.f32.mrb[27].mxu1  ;;  %5747 = vmatpush3.bf16.msra.mxu0 %v790_v10 }
 0x3c5   :  { %v791_v26 = vpack.c.bf16 %v759_v25, %v756_v16 }
 0x3c7   :  { %5748 = vmatprep.subr.bf16.mxu0 %v791_v26 }
 0x3c8   :  { %5749 = vmatpush3.bf16.msra.mxu0 %v791_v26 }
 0x3c9   :  { %v5738_v27 = vpop.f32.mrb[28].mxu1  ;;  %5750 = vmatprep.subr.bf16.mxu0 %v792_v23 }
 0x3ca   :  { %v772_v24 = vpop.f32.mrb[29].mxu1 }
 0x3cb   :  { %v5739_v28 = vpop.f32.mrb[30].mxu1 }
 0x3cc   :  { %v794_v29 = vpack.c.bf16 %v5739_v28, %v5738_v27  ;;  %v775_v30 = vpop.f32.mrb[31].mxu1  ;;  %5751 = vmatpush3.bf16.msra.mxu0 %v792_v23 }
 0x3cd   :  { %v793_v31 = vpack.c.bf16 %v775_v30, %v772_v24 }
 0x3cf   :  { %5752 = vmatprep.subr.bf16.mxu0 %v793_v31 }
 0x3d0   :  { %5753 = vmatpush3.bf16.msra.mxu0 %v793_v31 }
 0x3d1   :  { %5754 = vmatprep.subr.bf16.mxu0 %v794_v29 }
 0x3d4   :  { %5755 = vmatpush3.bf16.msra.mxu0 %v794_v29 }
 0x3d7   :  { %5757 = vmatmul.mubr.bf16.vlgmr.msra.gmra.mrb[32].mxu0 %v6585_v14 }
 0x3d8   :  { %5760 = vmatprep.mubr.bf16.mxu0 %v6590_v15 }
 0x3df   :  { %5761 = vmatmul.mubr.bf16.gmra.mrb[36].mxu0 %v6600_v17 }
 0x3e0   :  { %5764 = vmatprep.mubr.bf16.mxu0 %v6605_v18 }
 0x3e7   :  { %5765 = vmatmul.mubr.bf16.gmra.mrb[40].mxu0 %v6612_v19 }
 0x3e8   :  { %5768 = vmatprep.mubr.bf16.mxu0 %v6617_v20 }
 0x3ef   :  { %5769 = vmatmul.mubr.bf16.gmra.mrb[44].mxu0 %v6624_v21 }
 0x3f0   :  { %5820 = vmatprep.mubr.bf16.mxu0 %v6552_v4 }
 0x4aa   :  { %v5758_v35 = vpop.f32.mrb[32].mxu0 }
 0x4ab   :  { %v844_v36 = vadd.f32 %v5758_v35, %v5138_v34  ;;  %v835_v37 = vpop.f32.mrb[33].mxu0 }
 0x4ac   :  { %v836_v38 = vadd.f32 %v5138_v34, %v835_v37  ;;  %v5759_v39 = vpop.f32.mrb[34].mxu0 }
 0x4ad   :  { %v847_v40 = vadd.f32 %v5759_v39, %v5138_v34  ;;  %v838_v41 = vpop.f32.mrb[35].mxu0  ;;  %v900_v43 = vmax.f32 %v844_v36, 0.0 }
 0x4ae   :  { %v839_v42 = vadd.f32 %v5138_v34, %v838_v41  ;;  %v898_v45 = vmax.f32 %v836_v38, 0.0 }
 0x4af   :  { %v901_v44 = vmax.f32 %v847_v40, 0.0 }
 0x4b0   :  { %v899_v46 = vmax.f32 %v839_v42, 0.0 }
 0x4b1   :  { %v915_v47 = vpack.c.bf16 %v901_v44, %v900_v43 }
 0x4b2   :  { %v914_v48 = vpack.c.bf16 %v899_v46, %v898_v45  ;;  %v5762_v49 = vpop.f32.mrb[36].mxu0 }
 0x4b3   :  { %v860_v50 = vadd.f32 %v5762_v49, %v5138_v34  ;;  %v851_v51 = vpop.f32.mrb[37].mxu0 }
 0x4b4   :  { %v852_v52 = vadd.f32 %v5138_v34, %v851_v51  ;;  %v5763_v53 = vpop.f32.mrb[38].mxu0  ;;  %5788 = vmatprep.mubr.bf16.mxu1 %v914_v48 }
 0x4b5   :  { %v863_v54 = vadd.f32 %v5763_v53, %v5138_v34  ;;  %v854_v55 = vpop.f32.mrb[39].mxu0  ;;  %5789 = vmatmul.mubr.bf16.vlgmr.msra.gmra.mrb[32].mxu1 %v915_v47  ;;  %v904_v58 = vmax.f32 %v860_v50, 0.0 }
 0x4b6   :  { %v855_v56 = vadd.f32 %v5138_v34, %v854_v55  ;;  %v902_v60 = vmax.f32 %v852_v52, 0.0 }
 0x4b7   :  { %v905_v59 = vmax.f32 %v863_v54, 0.0 }
 0x4b8   :  { %v903_v57 = vmax.f32 %v855_v56, 0.0 }
 0x4b9   :  { %v917_v61 = vpack.c.bf16 %v905_v59, %v904_v58  ;;  %v5995_v59 = vld [vmem:[%s8070_s9] ss:$8 sps:$4 sm:$0xff]  }
 0x4ba   :  { %v916_v62 = vpack.c.bf16 %v903_v57, %v902_v60  ;;  %v5766_v63 = vpop.f32.mrb[40].mxu0  ;;  %v6009_v60 = vld [vmem:[%s8070_s9 + $0x44] ss:$8 sps:$4 sm:$0xff]   ;;  %v6007_v57 = vld [vmem:[%s8070_s9 + $0x40] ss:$8 sps:$4 sm:$0xff]  }
 0x4bb   :  { %v876_v0 = vadd.f32 %v5766_v63, %v5138_v34  ;;  %v867_v1 = vpop.f32.mrb[41].mxu0  ;;  %v6015_v63 = vld [vmem:[%s8070_s9 + $0x64] ss:$8 sps:$4 sm:$0xff]  }
 0x4bc   :  { %v868_v2 = vadd.f32 %v5138_v34, %v867_v1  ;;  %v5767_v3 = vpop.f32.mrb[42].mxu0  ;;  %5792 = vmatprep.mubr.bf16.mxu1 %v916_v62  ;;  %v6010_v62 = vld [vmem:[%s8070_s9 + $0x50] ss:$8 sps:$4 sm:$0xff]   ;;  %v5147_v1 = vld [vmem:[%s8071_s8] ss:$0 sm:$0xff] }
 0x4bd   :  { %v879_v5 = vadd.f32 %v5767_v3, %v5138_v34  ;;  %v870_v6 = vpop.f32.mrb[43].mxu0  ;;  %5793 = vmatmul.mubr.bf16.gmra.mrb[36].mxu1 %v917_v61  ;;  %v908_v8 = vmax.f32 %v876_v0, 0.0  ;;  %v6012_v61 = vld [vmem:[%s8070_s9 + $0x54] ss:$8 sps:$4 sm:$0xff]   ;;  %v6013_v0 = vld [vmem:[%s8070_s9 + $0x60] ss:$8 sps:$4 sm:$0xff]  }
 0x4be   :  { %v871_v7 = vadd.f32 %v5138_v34, %v870_v6  ;;  %v906_v10 = vmax.f32 %v868_v2, 0.0 }
 0x4bf   :  { %v909_v9 = vmax.f32 %v879_v5, 0.0 }
 0x4c0   :  { %v907_v11 = vmax.f32 %v871_v7, 0.0 }
 0x4c1   :  { %v919_v12 = vpack.c.bf16 %v909_v9, %v908_v8 }
 0x4c2   :  { %v918_v13 = vpack.c.bf16 %v907_v11, %v906_v10  ;;  %v5770_v16 = vpop.f32.mrb[44].mxu0 }
 0x4c3   :  { %v892_v22 = vadd.f32 %v5770_v16, %v5138_v34  ;;  %v883_v23 = vpop.f32.mrb[45].mxu0 }
 0x4c4   :  { %v884_v25 = vadd.f32 %v5138_v34, %v883_v23  ;;  %v5771_v26 = vpop.f32.mrb[46].mxu0  ;;  %5796 = vmatprep.mubr.bf16.mxu1 %v918_v13 }
 0x4c5   :  { %v895_v27 = vadd.f32 %v5771_v26, %v5138_v34  ;;  %v886_v24 = vpop.f32.mrb[47].mxu0  ;;  %5797 = vmatmul.mubr.bf16.gmra.mrb[40].mxu1 %v919_v12  ;;  %v912_v29 = vmax.f32 %v892_v22, 0.0 }
 0x4c6   :  { %v887_v28 = vadd.f32 %v5138_v34, %v886_v24  ;;  %v910_v31 = vmax.f32 %v884_v25, 0.0 }
 0x4c7   :  { %v913_v30 = vmax.f32 %v895_v27, 0.0 }
 0x4c8   :  { %v911_v32 = vmax.f32 %v887_v28, 0.0 }
 0x4c9   :  { %v921_v33 = vpack.c.bf16 %v913_v30, %v912_v29 }
 0x4ca   :  { %v920_v35 = vpack.c.bf16 %v911_v32, %v910_v31 }
 0x4cc   :  { %5800 = vmatprep.mubr.bf16.mxu1 %v920_v35 }
 0x4cd   :  { %5801 = vmatmul.mubr.bf16.gmra.mrb[44].mxu1 %v921_v33 }
 0x4ce   :  { %5852 = vmatprep.mubr.bf16.mxu1 %v6552_v4 }
 0x588   :  { %v5790_v36 = vpop.f32.mrb[32].mxu1 }
 0x589   :  { %v1021_v37 = vpop.f32.mrb[33].mxu1 }
 0x58a   :  { %v5791_v38 = vpop.f32.mrb[34].mxu1 }
 0x58b   :  { %v1085_v39 = vpack.c.bf16 %v5791_v38, %v5790_v36  ;;  %v1024_v40 = vpop.f32.mrb[35].mxu1 }
 0x58c   :  { %v1084_v41 = vpack.c.bf16 %v1024_v40, %v1021_v37 }
 0x58e   :  { %5804 = vmatprep.subr.bf16.mxu0 %v1084_v41 }
 0x58f   :  { %5805 = vmatpush3.bf16.msra.mxu0 %v1084_v41 }
 0x590   :  { %v5794_v42 = vpop.f32.mrb[36].mxu1  ;;  %5806 = vmatprep.subr.bf16.mxu0 %v1085_v39 }
 0x591   :  { %v1037_v34 = vpop.f32.mrb[37].mxu1 }
 0x592   :  { %v5795_v43 = vpop.f32.mrb[38].mxu1 }
 0x593   :  { %v1087_v44 = vpack.c.bf16 %v5795_v43, %v5794_v42  ;;  %v1040_v45 = vpop.f32.mrb[39].mxu1  ;;  %5807 = vmatpush3.bf16.msra.mxu0 %v1085_v39 }
 0x594   :  { %v1086_v46 = vpack.c.bf16 %v1040_v45, %v1037_v34 }
 0x596   :  { %5808 = vmatprep.subr.bf16.mxu0 %v1086_v46 }
 0x597   :  { %5809 = vmatpush3.bf16.msra.mxu0 %v1086_v46 }
 0x598   :  { %v5798_v47 = vpop.f32.mrb[40].mxu1  ;;  %5810 = vmatprep.subr.bf16.mxu0 %v1087_v44 }
 0x599   :  { %v1053_v4 = vpop.f32.mrb[41].mxu1 }
 0x59a   :  { %v5799_v48 = vpop.f32.mrb[42].mxu1 }
 0x59b   :  { %v1089_v49 = vpack.c.bf16 %v5799_v48, %v5798_v47  ;;  %v1056_v50 = vpop.f32.mrb[43].mxu1  ;;  %5811 = vmatpush3.bf16.msra.mxu0 %v1087_v44 }
 0x59c   :  { %v1088_v51 = vpack.c.bf16 %v1056_v50, %v1053_v4 }
 0x59e   :  { %5812 = vmatprep.subr.bf16.mxu0 %v1088_v51 }
 0x59f   :  { %5813 = vmatpush3.bf16.msra.mxu0 %v1088_v51 }
 0x5a0   :  { %v5802_v52 = vpop.f32.mrb[44].mxu1  ;;  %5814 = vmatprep.subr.bf16.mxu0 %v1089_v49 }
 0x5a1   :  { %v1069_v53 = vpop.f32.mrb[45].mxu1 }
 0x5a2   :  { %v5803_v54 = vpop.f32.mrb[46].mxu1 }
 0x5a3   :  { %v1091_v55 = vpack.c.bf16 %v5803_v54, %v5802_v52  ;;  %v1072_v56 = vpop.f32.mrb[47].mxu1  ;;  %5815 = vmatpush3.bf16.msra.mxu0 %v1089_v49 }
 0x5a4   :  { %v1090_v58 = vpack.c.bf16 %v1072_v56, %v1069_v53 }
 0x5a6   :  { %5816 = vmatprep.subr.bf16.mxu0 %v1090_v58 }
 0x5a7   :  { %5817 = vmatpush3.bf16.msra.mxu0 %v1090_v58 }
 0x5a8   :  { %5818 = vmatprep.subr.bf16.mxu0 %v1091_v55 }
 0x5ab   :  { %5819 = vmatpush3.bf16.msra.mxu0 %v1091_v55 }
 0x5ae   :  { %5821 = vmatmul.mubr.bf16.vlgmr.msra.gmra.mrb[48].mxu0 %v6585_v14  ;;  %v5997_v14 = vld [vmem:[%s8070_s9 + $0x4] ss:$8 sps:$4 sm:$0xff]  }
 0x5af   :  { %5824 = vmatprep.mubr.bf16.mxu0 %v6590_v15  ;;  %v6000_v15 = vld [vmem:[%s8070_s9 + $0x14] ss:$8 sps:$4 sm:$0xff]   ;;  %1432 = vmatprep.subr.bf16.mxu0 %v5997_v14 }
 0x5b0   :  { %1433 = vmatpush1.bf16.msra.mxu0 %v5995_v59 }
 0x5b1   :  { %1434 = vmatprep.subr.bf16.mxu0 %v6000_v15 }
 0x5b6   :  { %5825 = vmatmul.mubr.bf16.gmra.mrb[52].mxu0 %v6600_v17  ;;  %v5998_v17 = vld [vmem:[%s8070_s9 + $0x10] ss:$8 sps:$4 sm:$0xff]  }
 0x5b7   :  { %5828 = vmatprep.mubr.bf16.mxu0 %v6605_v18  ;;  %v6003_v18 = vld [vmem:[%s8070_s9 + $0x24] ss:$8 sps:$4 sm:$0xff]   ;;  %1435 = vmatpush1.bf16.msra.mxu0 %v5998_v17 }
 0x5b8   :  { %1436 = vmatprep.subr.bf16.mxu0 %v6003_v18 }
 0x5be   :  { %5829 = vmatmul.mubr.bf16.gmra.mrb[56].mxu0 %v6612_v19  ;;  %v6001_v19 = vld [vmem:[%s8070_s9 + $0x20] ss:$8 sps:$4 sm:$0xff]  }
 0x5bf   :  { %5832 = vmatprep.mubr.bf16.mxu0 %v6617_v20  ;;  %v6006_v20 = vld [vmem:[%s8070_s9 + $0x34] ss:$8 sps:$4 sm:$0xff]   ;;  %1437 = vmatpush1.bf16.msra.mxu0 %v6001_v19 }
 0x5c0   :  { %1438 = vmatprep.subr.bf16.mxu0 %v6006_v20 }
 0x5c6   :  { %5833 = vmatmul.mubr.bf16.gmra.mrb[60].mxu0 %v6624_v21  ;;  %v6004_v21 = vld [vmem:[%s8070_s9 + $0x30] ss:$8 sps:$4 sm:$0xff]  }
 0x5c7   :  { %1439 = vmatpush1.bf16.msra.mxu0 %v6004_v21  ;;  %v6763_v21 = vld [vmem:[%s8098_s25 + $0x8] sm:$0xff]  }
 0x5c8   :  { %1440 = vmatprep.subr.bf16.mxu0 %v6009_v60  ;;  %v6769_v60 = vld [vmem:[%s8098_s25 + $0x10] sm:$0xff]  }
 0x5cb   :  { %1441 = vmatpush1.bf16.msra.mxu0 %v6007_v57  ;;  %v6775_v57 = vld [vmem:[%s8098_s25 + $0x18] sm:$0xff]  }
 0x5cc   :  { %1442 = vmatprep.subr.bf16.mxu0 %v6012_v61  ;;  %v6781_v61 = vld [vmem:[%s8098_s25 + $0x20] sm:$0xff]  }
 0x5cf   :  { %1443 = vmatpush1.bf16.msra.mxu0 %v6010_v62  ;;  %v6787_v62 = vld [vmem:[%s8098_s25 + $0x28] sm:$0xff]  }
 0x5d0   :  { %1444 = vmatprep.subr.bf16.mxu0 %v6015_v63  ;;  %v6793_v63 = vld [vmem:[%s8098_s25 + $0x30] sm:$0xff]  }
 0x5d3   :  { %1445 = vmatpush1.bf16.msra.mxu0 %v6013_v0  ;;  %v6799_v0 = vld [vmem:[%s8098_s25 + $0x38] sm:$0xff]  }
 0x681   :  { %v5822_v2 = vpop.f32.mrb[48].mxu0 }
 0x682   :  { %v1141_v3 = vadd.f32 %v5822_v2, %v5147_v1  ;;  %v1132_v5 = vpop.f32.mrb[49].mxu0  ;;  %v6016_v2 = vld [vmem:[%s8070_s9 + $0x70] ss:$8 sps:$4 sm:$0xff]  }
 0x683   :  { %v1133_v6 = vadd.f32 %v5147_v1, %v1132_v5  ;;  %v5823_v7 = vpop.f32.mrb[50].mxu0  ;;  %v6019_v5 = vld [vmem:[%s8072_s11] ss:$8 sps:$4 sm:$0xff]  }
 0x684   :  { %v1144_v8 = vadd.f32 %v5823_v7, %v5147_v1  ;;  %v1135_v9 = vpop.f32.mrb[51].mxu0  ;;  %v1197_v11 = vmax.f32 %v1141_v3, 0.0  ;;  %v6419_v3 = vmov 0   ;;  %v6024_v7 = vld [vmem:[%s8072_s11 + $0x14] ss:$8 sps:$4 sm:$0xff]  }
 0x685   :  { %v1136_v10 = vadd.f32 %v5147_v1, %v1135_v9  ;;  %v1195_v13 = vmax.f32 %v1133_v6, 0.0  ;;  %1464 = vmatprep.mubr.bf16.mxu0 %v6419_v3  ;;  %v6021_v6 = vld [vmem:[%s8072_s11 + $0x4] ss:$8 sps:$4 sm:$0xff]  }
 0x686   :  { %v1198_v12 = vmax.f32 %v1144_v8, 0.0  ;;  %v6022_v8 = vld [vmem:[%s8072_s11 + $0x10] ss:$8 sps:$4 sm:$0xff]   ;;  %v6027_v9 = vld [vmem:[%s8072_s11 + $0x24] ss:$8 sps:$4 sm:$0xff]  }
 0x687   :  { %v1196_v16 = vmax.f32 %v1136_v10, 0.0  ;;  %v6025_v10 = vld [vmem:[%s8072_s11 + $0x20] ss:$8 sps:$4 sm:$0xff]  }
 0x688   :  { %v1212_v22 = vpack.c.bf16 %v1198_v12, %v1197_v11  ;;  %v6030_v11 = vld [vmem:[%s8072_s11 + $0x34] ss:$8 sps:$4 sm:$0xff]   ;;  %v6028_v12 = vld [vmem:[%s8072_s11 + $0x30] ss:$8 sps:$4 sm:$0xff]  }
 0x689   :  { %v1211_v23 = vpack.c.bf16 %v1196_v16, %v1195_v13  ;;  %v5826_v25 = vpop.f32.mrb[52].mxu0  ;;  %v6033_v13 = vld [vmem:[%s8072_s11 + $0x44] ss:$8 sps:$4 sm:$0xff]   ;;  %v6031_v16 = vld [vmem:[%s8072_s11 + $0x40] ss:$8 sps:$4 sm:$0xff]  }
 0x68a   :  { %v1157_v26 = vadd.f32 %v5826_v25, %v5147_v1  ;;  %v1148_v27 = vpop.f32.mrb[53].mxu0  ;;  %v6039_v25 = vld [vmem:[%s8072_s11 + $0x64] ss:$8 sps:$4 sm:$0xff]  }
 0x68b   :  { %v1149_v24 = vadd.f32 %v5147_v1, %v1148_v27  ;;  %v5827_v28 = vpop.f32.mrb[54].mxu0  ;;  %5836 = vmatprep.subr.bf16.mxu1 %v1211_v23  ;;  %v6042_v27 = vld [vmem:[%s8072_s11 + $0x74] ss:$8 sps:$4 sm:$0xff]  }
 0x68c   :  { %v1160_v29 = vadd.f32 %v5827_v28, %v5147_v1  ;;  %v1151_v30 = vpop.f32.mrb[55].mxu0  ;;  %5837 = vmatpush3.bf16.msra.mxu1 %v1211_v23  ;;  %v1201_v32 = vmax.f32 %v1157_v26, 0.0  ;;  %v6034_v23 = vld [vmem:[%s8072_s11 + $0x50] ss:$8 sps:$4 sm:$0xff]   ;;  %v6037_v26 = vld [vmem:[%s8072_s11 + $0x60] ss:$8 sps:$4 sm:$0xff]  }
 0x68d   :  { %v1152_v31 = vadd.f32 %v5147_v1, %v1151_v30  ;;  %5838 = vmatprep.subr.bf16.mxu1 %v1212_v22  ;;  %v1199_v35 = vmax.f32 %v1149_v24, 0.0  ;;  %v6040_v24 = vld [vmem:[%s8072_s11 + $0x70] ss:$8 sps:$4 sm:$0xff]   ;;  %v6045_v28 = vld [vmem:[%s8072_s11 + $0x84] ss:$8 sps:$4 sm:$0xff]  }
 0x68e   :  { %v1202_v33 = vmax.f32 %v1160_v29, 0.0  ;;  %v6043_v29 = vld [vmem:[%s8072_s11 + $0x80] ss:$8 sps:$4 sm:$0xff]   ;;  %v6048_v30 = vld [vmem:[%s8072_s11 + $0x94] ss:$8 sps:$4 sm:$0xff]  }
 0x68f   :  { %v1200_v36 = vmax.f32 %v1152_v31, 0.0  ;;  %v6046_v31 = vld [vmem:[%s8072_s11 + $0x90] ss:$8 sps:$4 sm:$0xff]  }
 0x690   :  { %v1214_v37 = vpack.c.bf16 %v1202_v33, %v1201_v32  ;;  %5839 = vmatpush3.bf16.msra.mxu1 %v1212_v22  ;;  %v6036_v22 = vld [vmem:[%s8072_s11 + $0x54] ss:$8 sps:$4 sm:$0xff]   ;;  %v6051_v32 = vld [vmem:[%s8072_s11 + $0xa4] ss:$8 sps:$4 sm:$0xff]   ;;  %v6049_v33 = vld [vmem:[%s8072_s11 + $0xa0] ss:$8 sps:$4 sm:$0xff]  }
 0x691   :  { %v1213_v38 = vpack.c.bf16 %v1200_v36, %v1199_v35  ;;  %v5830_v39 = vpop.f32.mrb[56].mxu0  ;;  %v6054_v35 = vld [vmem:[%s8072_s11 + $0xb4] ss:$8 sps:$4 sm:$0xff]   ;;  %v6052_v36 = vld [vmem:[%s8072_s11 + $0xb0] ss:$8 sps:$4 sm:$0xff]  }
 0x692   :  { %v1173_v40 = vadd.f32 %v5830_v39, %v5147_v1  ;;  %v1164_v41 = vpop.f32.mrb[57].mxu0  ;;  %v6060_v39 = vld [vmem:[%s8072_s11 + $0xd4] ss:$8 sps:$4 sm:$0xff]  }
 0x693   :  { %v1165_v42 = vadd.f32 %v5147_v1, %v1164_v41  ;;  %v5831_v34 = vpop.f32.mrb[58].mxu0  ;;  %5840 = vmatprep.subr.bf16.mxu1 %v1213_v38 }
 0x694   :  { %v1176_v43 = vadd.f32 %v5831_v34, %v5147_v1  ;;  %v1167_v44 = vpop.f32.mrb[59].mxu0  ;;  %5841 = vmatpush3.bf16.msra.mxu1 %v1213_v38  ;;  %v1205_v46 = vmax.f32 %v1173_v40, 0.0  ;;  %v6055_v38 = vld [vmem:[%s8072_s11 + $0xc0] ss:$8 sps:$4 sm:$0xff]   ;;  %v6058_v40 = vld [vmem:[%s8072_s11 + $0xd0] ss:$8 sps:$4 sm:$0xff]  }
 0x695   :  { %v1168_v45 = vadd.f32 %v5147_v1, %v1167_v44  ;;  %5842 = vmatprep.subr.bf16.mxu1 %v1214_v37  ;;  %v1203_v4 = vmax.f32 %v1165_v42, 0.0 }
 0x696   :  { %v1206_v47 = vmax.f32 %v1176_v43, 0.0 }
 0x697   :  { %v1204_v48 = vmax.f32 %v1168_v45, 0.0 }
 0x698   :  { %v1216_v49 = vpack.c.bf16 %v1206_v47, %v1205_v46  ;;  %5843 = vmatpush3.bf16.msra.mxu1 %v1214_v37  ;;  %v6057_v37 = vld [vmem:[%s8072_s11 + $0xc4] ss:$8 sps:$4 sm:$0xff]  }
 0x699   :  { %v1215_v50 = vpack.c.bf16 %v1204_v48, %v1203_v4  ;;  %v5834_v51 = vpop.f32.mrb[60].mxu0 }
 0x69a   :  { %v1189_v52 = vadd.f32 %v5834_v51, %v5147_v1  ;;  %v1180_v53 = vpop.f32.mrb[61].mxu0 }
 0x69b   :  { %v1181_v54 = vadd.f32 %v5147_v1, %v1180_v53  ;;  %v5835_v55 = vpop.f32.mrb[62].mxu0  ;;  %5844 = vmatprep.subr.bf16.mxu1 %v1215_v50 }
 0x69c   :  { %v1192_v56 = vadd.f32 %v5835_v55, %v5147_v1  ;;  %v1183_v58 = vpop.f32.mrb[63].mxu0  ;;  %5845 = vmatpush3.bf16.msra.mxu1 %v1215_v50  ;;  %v1209_v14 = vmax.f32 %v1189_v52, 0.0 }
 0x69d   :  { %v1184_v59 = vadd.f32 %v5147_v1, %v1183_v58  ;;  %5846 = vmatprep.subr.bf16.mxu1 %v1216_v49  ;;  %v1207_v17 = vmax.f32 %v1181_v54, 0.0  ;;  %v6018_v1 = vld [vmem:[%s8070_s9 + $0x74] ss:$8 sps:$4 sm:$0xff]  }
 0x69e   :  { %v1210_v15 = vmax.f32 %v1192_v56, 0.0  ;;  %1446 = vmatprep.subr.bf16.mxu0 %v6018_v1  ;;  %v6066_v1 = vld [vmem:[%s8072_s11 + $0xf4] ss:$8 sps:$4 sm:$0xff]  }
 0x69f   :  { %v1208_v18 = vmax.f32 %v1184_v59, 0.0  ;;  %1447 = vmatpush1.bf16.msra.mxu0 %v6016_v2  ;;  %v6064_v2 = vld [vmem:[%s8072_s11 + $0xf0] ss:$8 sps:$4 sm:$0xff]  }
 0x6a0   :  { %v1218_v19 = vpack.c.bf16 %v1210_v15, %v1209_v14  ;;  %5847 = vmatpush3.bf16.msra.mxu1 %v1216_v49 }
 0x6a1   :  { %v1217_v20 = vpack.c.bf16 %v1208_v18, %v1207_v17 }
 0x6a3   :  { %5848 = vmatprep.subr.bf16.mxu1 %v1217_v20 }
 0x6a4   :  { %5849 = vmatpush3.bf16.msra.mxu1 %v1217_v20  ;;  %v6061_v20 = vld [vmem:[%s8072_s11 + $0xe0] ss:$8 sps:$4 sm:$0xff]  }
 0x6a5   :  { %5850 = vmatprep.subr.bf16.mxu1 %v1218_v19 }
 0x6a8   :  { %5851 = vmatpush3.bf16.msra.mxu1 %v1218_v19  ;;  %v6063_v19 = vld [vmem:[%s8072_s11 + $0xe4] ss:$8 sps:$4 sm:$0xff]  }
 0x6a9   :  { %1786 = vmatprep.subr.bf16.mxu1 %v6021_v6 }
 0x6ab   :  { %5853 = vmatmul.mubr.bf16.vlgmr.msra.gmra.mrb[48].mxu1 %v6763_v21 }
 0x6ac   :  { %5856 = vmatprep.mubr.bf16.mxu1 %v6769_v60  ;;  %1787 = vmatpush1.bf16.msra.mxu1 %v6019_v5  ;;  %v1342_v5 = vlaneseq }
 0x6ad   :  { %1788 = vmatprep.subr.bf16.mxu1 %v6024_v7 }
 0x6ae   :  { %v6913_v6 = vshrl.u32 %v1342_v5, 7 }
 0x6b0   :  { %1789 = vmatpush1.bf16.msra.mxu1 %v6022_v8  ;;  %v6916_v7 = vsub.s32 0, %v6913_v6  ;;  %v1235_v8 = vld [vmem:[%s8073_s10] sm:$0x3] }
 0x6b1   :  { %1790 = vmatprep.subr.bf16.mxu1 %v6027_v9  ;;  %v6922_v9 = vsub.s32 1, %v6913_v6 }
 0x6b3   :  { %5857 = vmatmul.mubr.bf16.gmra.mrb[52].mxu1 %v6775_v57 }
 0x6b4   :  { %5860 = vmatprep.mubr.bf16.mxu1 %v6781_v61  ;;  %1791 = vmatpush1.bf16.msra.mxu1 %v6025_v10  ;;  %v6925_v10 = vrot.slane %v1235_v8, %v6916_v7 }
 0x6b5   :  { %1792 = vmatprep.subr.bf16.mxu1 %v6030_v11  ;;  %v6928_v11 = vrot.slane %v1235_v8, %v6922_v9 }
 0x6b8   :  { %1793 = vmatpush1.bf16.msra.mxu1 %v6028_v12 }
 0x6b9   :  { %1794 = vmatprep.subr.bf16.mxu1 %v6033_v13 }
 0x6bb   :  { %5861 = vmatmul.mubr.bf16.gmra.mrb[56].mxu1 %v6787_v62 }
 0x6bc   :  { %5864 = vmatprep.mubr.bf16.mxu1 %v6793_v63  ;;  %1795 = vmatpush1.bf16.msra.mxu1 %v6031_v16 }
 0x6bd   :  { %1796 = vmatprep.subr.bf16.mxu1 %v6036_v22 }
 0x6c0   :  { %1797 = vmatpush1.bf16.msra.mxu1 %v6034_v23 }
 0x6c1   :  { %1798 = vmatprep.subr.bf16.mxu1 %v6039_v25 }
 0x6c3   :  { %5865 = vmatmul.mubr.bf16.gmra.mrb[60].mxu1 %v6799_v0 }
 0x6c4   :  { %1799 = vmatpush1.bf16.msra.mxu1 %v6037_v26 }
 0x6c5   :  { %1800 = vmatprep.subr.bf16.mxu1 %v6042_v27 }
 0x6c8   :  { %1801 = vmatpush1.bf16.msra.mxu1 %v6040_v24 }
 0x6c9   :  { %1802 = vmatprep.subr.bf16.mxu1 %v6045_v28 }
 0x6cc   :  { %1803 = vmatpush1.bf16.msra.mxu1 %v6043_v29 }
 0x6cd   :  { %1804 = vmatprep.subr.bf16.mxu1 %v6048_v30 }
 0x6d0   :  { %1805 = vmatpush1.bf16.msra.mxu1 %v6046_v31 }
 0x6d1   :  { %1806 = vmatprep.subr.bf16.mxu1 %v6051_v32 }
 0x6d4   :  { %1807 = vmatpush1.bf16.msra.mxu1 %v6049_v33 }
 0x6d5   :  { %1808 = vmatprep.subr.bf16.mxu1 %v6054_v35 }
 0x6d8   :  { %1809 = vmatpush1.bf16.msra.mxu1 %v6052_v36 }
 0x6d9   :  { %1810 = vmatprep.subr.bf16.mxu1 %v6057_v37 }
 0x6dc   :  { %1811 = vmatpush1.bf16.msra.mxu1 %v6055_v38 }
 0x6dd   :  { %1812 = vmatprep.subr.bf16.mxu1 %v6060_v39 }
 0x6e0   :  { %1813 = vmatpush1.bf16.msra.mxu1 %v6058_v40 }
 0x6e1   :  { %1814 = vmatprep.subr.bf16.mxu1 %v6063_v19 }
 0x6e4   :  { %1815 = vmatpush1.bf16.msra.mxu1 %v6061_v20 }
 0x6e5   :  { %1816 = vmatprep.subr.bf16.mxu1 %v6066_v1 }
 0x6e8   :  { %1817 = vmatpush1.bf16.msra.mxu1 %v6064_v2 }
 0x77e   :  { %v5854_v41 = vpop.f32.mrb[48].mxu1 }
 0x77f   :  { %v1270_v42 = vpop.f32.mrb[49].mxu1 }
 0x780   :  { %v5855_v34 = vpop.f32.mrb[50].mxu1 }
 0x781   :  { %v1334_v43 = vpack.c.bf16 %v5855_v34, %v5854_v41  ;;  %v1273_v44 = vpop.f32.mrb[51].mxu1 }
 0x782   :  { %v1333_v45 = vpack.c.bf16 %v1273_v44, %v1270_v42 }
 0x784   :  { %1465 = vmatmul.mubr.bf16.vlgmr.msra.gmra.mrb[64].mxu0 %v1333_v45 }
 0x785   :  { %1474 = vmatprep.mubr.bf16.mxu0 %v6419_v3 }
 0x786   :  { %v5858_v46 = vpop.f32.mrb[52].mxu1 }
 0x787   :  { %v1286_v47 = vpop.f32.mrb[53].mxu1 }
 0x788   :  { %v5859_v4 = vpop.f32.mrb[54].mxu1 }
 0x789   :  { %v1336_v48 = vpack.c.bf16 %v5859_v4, %v5858_v46  ;;  %v1289_v49 = vpop.f32.mrb[55].mxu1 }
 0x78a   :  { %v1335_v50 = vpack.c.bf16 %v1289_v49, %v1286_v47 }
 0x78c   :  { %1475 = vmatmul.mubr.bf16.gmra.mrb[68].mxu0 %v1334_v43 }
 0x78d   :  { %1484 = vmatprep.mubr.bf16.mxu0 %v6419_v3 }
 0x78e   :  { %v5862_v51 = vpop.f32.mrb[56].mxu1 }
 0x78f   :  { %v1302_v52 = vpop.f32.mrb[57].mxu1 }
 0x790   :  { %v5863_v53 = vpop.f32.mrb[58].mxu1 }
 0x791   :  { %v1338_v54 = vpack.c.bf16 %v5863_v53, %v5862_v51  ;;  %v1305_v55 = vpop.f32.mrb[59].mxu1 }
 0x792   :  { %v1337_v56 = vpack.c.bf16 %v1305_v55, %v1302_v52 }
 0x794   :  { %1485 = vmatmul.mubr.bf16.gmra.mrb[72].mxu0 %v1335_v50 }
 0x795   :  { %1494 = vmatprep.mubr.bf16.mxu0 %v6419_v3 }
 0x796   :  { %v5866_v58 = vpop.f32.mrb[60].mxu1 }
 0x797   :  { %v1318_v59 = vpop.f32.mrb[61].mxu1 }
 0x798   :  { %v5867_v14 = vpop.f32.mrb[62].mxu1 }
 0x799   :  { %v1340_v15 = vpack.c.bf16 %v5867_v14, %v5866_v58  ;;  %v1321_v17 = vpop.f32.mrb[63].mxu1 }
 0x79a   :  { %v1339_v18 = vpack.c.bf16 %v1321_v17, %v1318_v59 }
 0x79c   :  { %1495 = vmatmul.mubr.bf16.gmra.mrb[76].mxu0 %v1336_v48 }
 0x79d   :  { %1504 = vmatprep.mubr.bf16.mxu0 %v6419_v3 }
 0x7a4   :  { %1505 = vmatmul.mubr.bf16.gmra.mrb[80].mxu0 %v1337_v56 }
 0x7a5   :  { %1514 = vmatprep.mubr.bf16.mxu0 %v6419_v3 }
 0x7ac   :  { %1515 = vmatmul.mubr.bf16.gmra.mrb[84].mxu0 %v1338_v54 }
 0x7ad   :  { %1524 = vmatprep.mubr.bf16.mxu0 %v6419_v3 }
 0x7b4   :  { %1525 = vmatmul.mubr.bf16.gmra.mrb[88].mxu0 %v1339_v18 }
 0x7b5   :  { %1534 = vmatprep.mubr.bf16.mxu0 %v6419_v3 }
 0x7bc   :  { %1535 = vmatmul.mubr.bf16.gmra.mrb[92].mxu0 %v1340_v15 }
 0x7bd   :  { %1958 = vmatprep.mubr.bf16.mxu0 %v6419_v3 }
 0x857   :  { %v1466_v12 = vpop.f32.mrb[64].mxu0 }
 0x858   :  { %v1467_v13 = vadd.f32 %v1466_v12, %v6925_v10  ;;  %v1468_v16 = vpop.f32.mrb[65].mxu0 }
 0x859   :  { %v1469_v22 = vadd.f32 %v1468_v16, %v6928_v11  ;;  %v1470_v23 = vpop.f32.mrb[66].mxu0 }
 0x85a   :  { %v1471_v25 = vadd.f32 %v1470_v23, %v6925_v10  ;;  %v1472_v26 = vpop.f32.mrb[67].mxu0  ;;  %v1545_v24 = vmax.f32 %v1467_v13, 0.0 }
 0x85b   :  { %v1473_v27 = vadd.f32 %v1472_v26, %v6928_v11  ;;  %v1546_v29 = vmax.f32 %v1469_v22, 0.0 }
 0x85c   :  { %v1547_v28 = vmax.f32 %v1471_v25, 0.0 }
 0x85d   :  { %v1548_v30 = vmax.f32 %v1473_v27, 0.0 }
 0x85e   :  { %v1577_v31 = vpack.c.bf16 %v1547_v28, %v1545_v24 }
 0x85f   :  { %v1578_v32 = vpack.c.bf16 %v1548_v30, %v1546_v29  ;;  %v1476_v33 = vpop.f32.mrb[68].mxu0 }
 0x860   :  { %v1477_v35 = vadd.f32 %v1476_v33, %v6925_v10  ;;  %v1478_v36 = vpop.f32.mrb[69].mxu0 }
 0x861   :  { %v1479_v37 = vadd.f32 %v1478_v36, %v6928_v11  ;;  %v1480_v38 = vpop.f32.mrb[70].mxu0  ;;  %1818 = vmatprep.mubr.bf16.mxu1 %v1578_v32 }
 0x862   :  { %v1481_v39 = vadd.f32 %v1480_v38, %v6925_v10  ;;  %v1482_v40 = vpop.f32.mrb[71].mxu0  ;;  %1819 = vmatmul.mubr.bf16.vlgmr.msra.gmra.mrb[64].mxu1 %v1577_v31  ;;  %v1549_v42 = vmax.f32 %v1477_v35, 0.0 }
 0x863   :  { %v1483_v41 = vadd.f32 %v1482_v40, %v6928_v11  ;;  %v1550_v43 = vmax.f32 %v1479_v37, 0.0 }
 0x864   :  { %v1551_v34 = vmax.f32 %v1481_v39, 0.0 }
 0x865   :  { %v1552_v44 = vmax.f32 %v1483_v41, 0.0 }
 0x866   :  { %v1579_v45 = vpack.c.bf16 %v1551_v34, %v1549_v42 }
 0x867   :  { %v1580_v46 = vpack.c.bf16 %v1552_v44, %v1550_v43  ;;  %v1486_v47 = vpop.f32.mrb[72].mxu0 }
 0x868   :  { %v1487_v4 = vadd.f32 %v1486_v47, %v6925_v10  ;;  %v1488_v48 = vpop.f32.mrb[73].mxu0 }
 0x869   :  { %v1489_v49 = vadd.f32 %v1488_v48, %v6928_v11  ;;  %v1490_v50 = vpop.f32.mrb[74].mxu0  ;;  %1828 = vmatprep.mubr.bf16.mxu1 %v1580_v46 }
 0x86a   :  { %v1491_v51 = vadd.f32 %v1490_v50, %v6925_v10  ;;  %v1492_v52 = vpop.f32.mrb[75].mxu0  ;;  %1829 = vmatmul.mubr.bf16.gmra.mrb[68].mxu1 %v1579_v45  ;;  %v1553_v54 = vmax.f32 %v1487_v4, 0.0 }
 0x86b   :  { %v1493_v53 = vadd.f32 %v1492_v52, %v6928_v11  ;;  %v1554_v56 = vmax.f32 %v1489_v49, 0.0 }
 0x86c   :  { %v1555_v55 = vmax.f32 %v1491_v51, 0.0 }
 0x86d   :  { %v1556_v58 = vmax.f32 %v1493_v53, 0.0 }
 0x86e   :  { %v1581_v59 = vpack.c.bf16 %v1555_v55, %v1553_v54 }
 0x86f   :  { %v1582_v14 = vpack.c.bf16 %v1556_v58, %v1554_v56  ;;  %v1496_v15 = vpop.f32.mrb[76].mxu0 }
 0x870   :  { %v1497_v17 = vadd.f32 %v1496_v15, %v6925_v10  ;;  %v1498_v18 = vpop.f32.mrb[77].mxu0 }
 0x871   :  { %v1499_v19 = vadd.f32 %v1498_v18, %v6928_v11  ;;  %v1500_v20 = vpop.f32.mrb[78].mxu0  ;;  %1838 = vmatprep.mubr.bf16.mxu1 %v1582_v14 }
 0x872   :  { %v1501_v1 = vadd.f32 %v1500_v20, %v6925_v10  ;;  %v1502_v2 = vpop.f32.mrb[79].mxu0  ;;  %1839 = vmatmul.mubr.bf16.gmra.mrb[72].mxu1 %v1581_v59  ;;  %v1557_v8 = vmax.f32 %v1497_v17, 0.0 }
 0x873   :  { %v1503_v5 = vadd.f32 %v1502_v2, %v6928_v11  ;;  %v1558_v13 = vmax.f32 %v1499_v19, 0.0 }
 0x874   :  { %v1559_v12 = vmax.f32 %v1501_v1, 0.0 }
 0x875   :  { %v1560_v16 = vmax.f32 %v1503_v5, 0.0 }
 0x876   :  { %v1583_v22 = vpack.c.bf16 %v1559_v12, %v1557_v8 }
 0x877   :  { %v1584_v23 = vpack.c.bf16 %v1560_v16, %v1558_v13  ;;  %v1506_v25 = vpop.f32.mrb[80].mxu0 }
 0x878   :  { %v1507_v26 = vadd.f32 %v1506_v25, %v6925_v10  ;;  %v1508_v27 = vpop.f32.mrb[81].mxu0 }
 0x879   :  { %v1509_v24 = vadd.f32 %v1508_v27, %v6928_v11  ;;  %v1510_v28 = vpop.f32.mrb[82].mxu0  ;;  %1848 = vmatprep.mubr.bf16.mxu1 %v1584_v23 }
 0x87a   :  { %v1511_v29 = vadd.f32 %v1510_v28, %v6925_v10  ;;  %v1512_v30 = vpop.f32.mrb[83].mxu0  ;;  %1849 = vmatmul.mubr.bf16.gmra.mrb[76].mxu1 %v1583_v22  ;;  %v1561_v32 = vmax.f32 %v1507_v26, 0.0 }
 0x87b   :  { %v1513_v31 = vadd.f32 %v1512_v30, %v6928_v11  ;;  %v1562_v35 = vmax.f32 %v1509_v24, 0.0 }
 0x87c   :  { %v1563_v33 = vmax.f32 %v1511_v29, 0.0 }
 0x87d   :  { %v1564_v36 = vmax.f32 %v1513_v31, 0.0 }
 0x87e   :  { %v1585_v37 = vpack.c.bf16 %v1563_v33, %v1561_v32 }
 0x87f   :  { %v1586_v38 = vpack.c.bf16 %v1564_v36, %v1562_v35  ;;  %v1516_v39 = vpop.f32.mrb[84].mxu0 }
 0x880   :  { %v1517_v40 = vadd.f32 %v1516_v39, %v6925_v10  ;;  %v1518_v41 = vpop.f32.mrb[85].mxu0 }
 0x881   :  { %v1519_v42 = vadd.f32 %v1518_v41, %v6928_v11  ;;  %v1520_v34 = vpop.f32.mrb[86].mxu0  ;;  %1858 = vmatprep.mubr.bf16.mxu1 %v1586_v38 }
 0x882   :  { %v1521_v43 = vadd.f32 %v1520_v34, %v6925_v10  ;;  %v1522_v44 = vpop.f32.mrb[87].mxu0  ;;  %1859 = vmatmul.mubr.bf16.gmra.mrb[80].mxu1 %v1585_v37  ;;  %v1565_v46 = vmax.f32 %v1517_v40, 0.0 }
 0x883   :  { %v1523_v45 = vadd.f32 %v1522_v44, %v6928_v11  ;;  %v1566_v4 = vmax.f32 %v1519_v42, 0.0 }
 0x884   :  { %v1567_v47 = vmax.f32 %v1521_v43, 0.0 }
 0x885   :  { %v1568_v48 = vmax.f32 %v1523_v45, 0.0 }
 0x886   :  { %v1587_v49 = vpack.c.bf16 %v1567_v47, %v1565_v46 }
 0x887   :  { %v1588_v50 = vpack.c.bf16 %v1568_v48, %v1566_v4  ;;  %v1526_v51 = vpop.f32.mrb[88].mxu0 }
 0x888   :  { %v1527_v52 = vadd.f32 %v1526_v51, %v6925_v10  ;;  %v1528_v53 = vpop.f32.mrb[89].mxu0 }
 0x889   :  { %v1529_v54 = vadd.f32 %v1528_v53, %v6928_v11  ;;  %v1530_v55 = vpop.f32.mrb[90].mxu0  ;;  %1868 = vmatprep.mubr.bf16.mxu1 %v1588_v50 }
 0x88a   :  { %v1531_v56 = vadd.f32 %v1530_v55, %v6925_v10  ;;  %v1532_v58 = vpop.f32.mrb[91].mxu0  ;;  %1869 = vmatmul.mubr.bf16.gmra.mrb[84].mxu1 %v1587_v49  ;;  %v1569_v14 = vmax.f32 %v1527_v52, 0.0 }
 0x88b   :  { %v1533_v59 = vadd.f32 %v1532_v58, %v6928_v11  ;;  %v1570_v17 = vmax.f32 %v1529_v54, 0.0 }
 0x88c   :  { %v1571_v15 = vmax.f32 %v1531_v56, 0.0 }
 0x88d   :  { %v1572_v18 = vmax.f32 %v1533_v59, 0.0 }
 0x88e   :  { %v1589_v19 = vpack.c.bf16 %v1571_v15, %v1569_v14 }
 0x88f   :  { %v1590_v20 = vpack.c.bf16 %v1572_v18, %v1570_v17  ;;  %v1536_v1 = vpop.f32.mrb[92].mxu0 }
 0x890   :  { %v1537_v2 = vadd.f32 %v1536_v1, %v6925_v10  ;;  %v1538_v5 = vpop.f32.mrb[93].mxu0 }
 0x891   :  { %v1539_v8 = vadd.f32 %v1538_v5, %v6928_v11  ;;  %v1540_v12 = vpop.f32.mrb[94].mxu0  ;;  %1878 = vmatprep.mubr.bf16.mxu1 %v1590_v20 }
 0x892   :  { %v1541_v13 = vadd.f32 %v1540_v12, %v6925_v10  ;;  %v1542_v16 = vpop.f32.mrb[95].mxu0  ;;  %1879 = vmatmul.mubr.bf16.gmra.mrb[88].mxu1 %v1589_v19  ;;  %v1573_v23 = vmax.f32 %v1537_v2, 0.0 }
 0x893   :  { %v1543_v22 = vadd.f32 %v1542_v16, %v6928_v11  ;;  %v1574_v26 = vmax.f32 %v1539_v8, 0.0 }
 0x894   :  { %v1575_v25 = vmax.f32 %v1541_v13, 0.0 }
 0x895   :  { %v1576_v27 = vmax.f32 %v1543_v22, 0.0 }
 0x896   :  { %v1591_v24 = vpack.c.bf16 %v1575_v25, %v1573_v23  ;;  %v6966_v25 = vld [vmem:[%s8098_s25] sm:$0xff]  }
 0x897   :  { %v1592_v28 = vpack.c.bf16 %v1576_v27, %v1574_v26 }
 0x899   :  { %1888 = vmatprep.mubr.bf16.mxu1 %v1592_v28  ;;  %v6075_v28 = vld [vmem:[%s8075_s13 + $0x24] ss:$16 sps:$4 sm:$0xff]  }
 0x89a   :  { %1889 = vmatmul.mubr.bf16.gmra.mrb[92].mxu1 %v1591_v24 }
 0x89b   :  { %2184 = vmatprep.mubr.bf16.mxu1 %v6419_v3 }
 0x935   :  { %v1820_v29 = vpop.f32.mrb[64].mxu1 }
 0x936   :  { %v1822_v30 = vpop.f32.mrb[65].mxu1 }
 0x937   :  { %v1824_v31 = vpop.f32.mrb[66].mxu1 }
 0x938   :  { %v1899_v32 = vpack.c.bf16 %v1824_v31, %v1820_v29  ;;  %v1826_v33 = vpop.f32.mrb[67].mxu1  ;;  %v6073_v31 = vld [vmem:[%s8075_s13 + $0x20] ss:$16 sps:$4 sm:$0xff]  }
 0x939   :  { %v1900_v10 = vpack.c.bf16 %v1826_v33, %v1822_v30 }
 0x93b   :  { %1926 = vmatprep.subr.bf16.mxu0 %v1900_v10 }
 0x93c   :  { %1927 = vmatpush1.bf16.msra.mxu0 %v1899_v32 }
 0x93d   :  { %v1830_v35 = vpop.f32.mrb[68].mxu1 }
 0x93e   :  { %v1832_v11 = vpop.f32.mrb[69].mxu1 }
 0x93f   :  { %v1834_v36 = vpop.f32.mrb[70].mxu1 }
 0x940   :  { %v1901_v37 = vpack.c.bf16 %v1834_v36, %v1830_v35  ;;  %v1836_v38 = vpop.f32.mrb[71].mxu1  ;;  %v6081_v35 = vld [vmem:[%s8075_s13 + $0x44] ss:$16 sps:$4 sm:$0xff]  }
 0x941   :  { %v1902_v39 = vpack.c.bf16 %v1836_v38, %v1832_v11  ;;  %v6079_v38 = vld [vmem:[%s8075_s13 + $0x40] ss:$16 sps:$4 sm:$0xff]  }
 0x943   :  { %1928 = vmatprep.subr.bf16.mxu0 %v1902_v39 }
 0x944   :  { %1929 = vmatpush1.bf16.msra.mxu0 %v1901_v37 }
 0x945   :  { %v1840_v40 = vpop.f32.mrb[72].mxu1 }
 0x946   :  { %v1842_v41 = vpop.f32.mrb[73].mxu1 }
 0x947   :  { %v1844_v42 = vpop.f32.mrb[74].mxu1 }
 0x948   :  { %v1903_v34 = vpack.c.bf16 %v1844_v42, %v1840_v40  ;;  %v1846_v43 = vpop.f32.mrb[75].mxu1 }
 0x949   :  { %v1904_v44 = vpack.c.bf16 %v1846_v43, %v1842_v41  ;;  %v6087_v41 = vld [vmem:[%s8075_s13 + $0x64] ss:$16 sps:$4 sm:$0xff]  }
 0x94b   :  { %1930 = vmatprep.subr.bf16.mxu0 %v1904_v44 }
 0x94c   :  { %1931 = vmatpush1.bf16.msra.mxu0 %v1903_v34 }
 0x94d   :  { %v1850_v45 = vpop.f32.mrb[76].mxu1 }
 0x94e   :  { %v1852_v46 = vpop.f32.mrb[77].mxu1 }
 0x94f   :  { %v1854_v47 = vpop.f32.mrb[78].mxu1 }
 0x950   :  { %v1905_v4 = vpack.c.bf16 %v1854_v47, %v1850_v45  ;;  %v1856_v48 = vpop.f32.mrb[79].mxu1  ;;  %v6085_v47 = vld [vmem:[%s8075_s13 + $0x60] ss:$16 sps:$4 sm:$0xff]  }
 0x951   :  { %v1906_v49 = vpack.c.bf16 %v1856_v48, %v1852_v46  ;;  %v6093_v48 = vld [vmem:[%s8075_s13 + $0x84] ss:$16 sps:$4 sm:$0xff]  }
 0x953   :  { %1932 = vmatprep.subr.bf16.mxu0 %v1906_v49 }
 0x954   :  { %1933 = vmatpush1.bf16.msra.mxu0 %v1905_v4 }
 0x955   :  { %v1860_v50 = vpop.f32.mrb[80].mxu1 }
 0x956   :  { %v1862_v51 = vpop.f32.mrb[81].mxu1 }
 0x957   :  { %v1864_v52 = vpop.f32.mrb[82].mxu1 }
 0x958   :  { %v1907_v53 = vpack.c.bf16 %v1864_v52, %v1860_v50  ;;  %v1866_v54 = vpop.f32.mrb[83].mxu1 }
 0x959   :  { %v1908_v55 = vpack.c.bf16 %v1866_v54, %v1862_v51  ;;  %v6091_v54 = vld [vmem:[%s8075_s13 + $0x80] ss:$16 sps:$4 sm:$0xff]  }
 0x95b   :  { %1934 = vmatprep.subr.bf16.mxu0 %v1908_v55 }
 0x95c   :  { %1935 = vmatpush1.bf16.msra.mxu0 %v1907_v53 }
 0x95d   :  { %v1870_v56 = vpop.f32.mrb[84].mxu1 }
 0x95e   :  { %v1872_v58 = vpop.f32.mrb[85].mxu1 }
 0x95f   :  { %v1874_v59 = vpop.f32.mrb[86].mxu1 }
 0x960   :  { %v1909_v14 = vpack.c.bf16 %v1874_v59, %v1870_v56  ;;  %v1876_v15 = vpop.f32.mrb[87].mxu1 }
 0x961   :  { %v1910_v17 = vpack.c.bf16 %v1876_v15, %v1872_v58  ;;  %v6099_v58 = vld [vmem:[%s8075_s13 + $0xa4] ss:$16 sps:$4 sm:$0xff]  }
 0x963   :  { %1936 = vmatprep.subr.bf16.mxu0 %v1910_v17 }
 0x964   :  { %1937 = vmatpush1.bf16.msra.mxu0 %v1909_v14 }
 0x965   :  { %v1880_v18 = vpop.f32.mrb[88].mxu1 }
 0x966   :  { %v1882_v19 = vpop.f32.mrb[89].mxu1 }
 0x967   :  { %v1884_v20 = vpop.f32.mrb[90].mxu1 }
 0x968   :  { %v1911_v1 = vpack.c.bf16 %v1884_v20, %v1880_v18  ;;  %v1886_v2 = vpop.f32.mrb[91].mxu1  ;;  %v6097_v20 = vld [vmem:[%s8075_s13 + $0xa0] ss:$16 sps:$4 sm:$0xff]  }
 0x969   :  { %v1912_v5 = vpack.c.bf16 %v1886_v2, %v1882_v19  ;;  %v6105_v2 = vld [vmem:[%s8075_s13 + $0xc4] ss:$16 sps:$4 sm:$0xff]  }
 0x96b   :  { %1938 = vmatprep.subr.bf16.mxu0 %v1912_v5 }
 0x96c   :  { %1939 = vmatpush1.bf16.msra.mxu0 %v1911_v1 }
 0x96d   :  { %v1890_v8 = vpop.f32.mrb[92].mxu1 }
 0x96e   :  { %v1892_v12 = vpop.f32.mrb[93].mxu1 }
 0x96f   :  { %v1894_v13 = vpop.f32.mrb[94].mxu1 }
 0x970   :  { %v1913_v16 = vpack.c.bf16 %v1894_v13, %v1890_v8  ;;  %v1896_v22 = vpop.f32.mrb[95].mxu1 }
 0x971   :  { %v1914_v23 = vpack.c.bf16 %v1896_v22, %v1892_v12  ;;  %v6103_v22 = vld [vmem:[%s8075_s13 + $0xc0] ss:$16 sps:$4 sm:$0xff]  }
 0x973   :  { %1940 = vmatprep.subr.bf16.mxu0 %v1914_v23 }
 0x974   :  { %1941 = vmatpush1.bf16.msra.mxu0 %v1913_v16 }
 0x977   :  { %1959 = vmatmul.mubr.bf16.vlgmr.msra.gmra.mrb[96].mxu0 %v6966_v25 }
 0x978   :  { %1968 = vmatprep.mubr.bf16.mxu0 %v6419_v3 }
 0x97f   :  { %1969 = vmatmul.mubr.bf16.gmra.mrb[100].mxu0 %v6763_v21  ;;  %v1625_v21 = vld [vmem:[%s8074_s12] sm:$0x3] }
 0x980   :  { %1978 = vmatprep.mubr.bf16.mxu0 %v6419_v3 }
 0x987   :  { %1979 = vmatmul.mubr.bf16.gmra.mrb[104].mxu0 %v6769_v60  ;;  %v6987_v60 = vrot.slane %v1625_v21, %v6916_v7 }
 0x988   :  { %1988 = vmatprep.mubr.bf16.mxu0 %v6419_v3 }
 0x98f   :  { %1989 = vmatmul.mubr.bf16.gmra.mrb[108].mxu0 %v6775_v57  ;;  %v6990_v57 = vrot.slane %v1625_v21, %v6922_v9 }
 0x990   :  { %1998 = vmatprep.mubr.bf16.mxu0 %v6419_v3 }
 0x997   :  { %1999 = vmatmul.mubr.bf16.gmra.mrb[112].mxu0 %v6781_v61  ;;  %v6067_v61 = vld [vmem:[%s8075_s13] ss:$16 sps:$4 sm:$0xff]  }
 0x998   :  { %2008 = vmatprep.mubr.bf16.mxu0 %v6419_v3 }
 0x99f   :  { %2009 = vmatmul.mubr.bf16.gmra.mrb[116].mxu0 %v6787_v62 }
 0x9a0   :  { %2018 = vmatprep.mubr.bf16.mxu0 %v6419_v3 }
 0x9a7   :  { %2019 = vmatmul.mubr.bf16.gmra.mrb[120].mxu0 %v6793_v63  ;;  %v6069_v63 = vld [vmem:[%s8075_s13 + $0x4] ss:$16 sps:$4 sm:$0xff]  }
 0x9a8   :  { %2028 = vmatprep.mubr.bf16.mxu0 %v6419_v3  ;;  %2622 = vmatprep.subr.bf16.mxu0 %v6069_v63 }
 0x9a9   :  { %2623 = vmatpush1.bf16.msra.mxu0 %v6067_v61  ;;  %v6111_v61 = vld [vmem:[%s8075_s13 + $0xe4] ss:$16 sps:$4 sm:$0xff]  }
 0x9aa   :  { %2624 = vmatprep.subr.bf16.mxu0 %v6075_v28  ;;  %v6109_v28 = vld [vmem:[%s8075_s13 + $0xe0] ss:$16 sps:$4 sm:$0xff]  }
 0x9ad   :  { %2625 = vmatpush1.bf16.msra.mxu0 %v6073_v31 }
 0x9ae   :  { %2626 = vmatprep.subr.bf16.mxu0 %v6081_v35 }
 0x9af   :  { %2029 = vmatmul.mubr.bf16.gmra.mrb[124].mxu0 %v6799_v0 }
 0x9b1   :  { %2627 = vmatpush1.bf16.msra.mxu0 %v6079_v38  ;;  %v6123_v38 = vld [vmem:[%s8075_s13 + $0x124] ss:$16 sps:$4 sm:$0xff]  }
 0x9b2   :  { %2628 = vmatprep.subr.bf16.mxu0 %v6087_v41 }
 0x9b5   :  { %2629 = vmatpush1.bf16.msra.mxu0 %v6085_v47 }
 0x9b6   :  { %2630 = vmatprep.subr.bf16.mxu0 %v6093_v48 }
 0x9b9   :  { %2631 = vmatpush1.bf16.msra.mxu0 %v6091_v54  ;;  %v6135_v54 = vld [vmem:[%s8075_s13 + $0x164] ss:$16 sps:$4 sm:$0xff]  }
 0x9ba   :  { %2632 = vmatprep.subr.bf16.mxu0 %v6099_v58 }
 0x9bd   :  { %2633 = vmatpush1.bf16.msra.mxu0 %v6097_v20 }
 0x9be   :  { %2634 = vmatprep.subr.bf16.mxu0 %v6105_v2 }
 0x9c1   :  { %2635 = vmatpush1.bf16.msra.mxu0 %v6103_v22  ;;  %v6147_v22 = vld [vmem:[%s8075_s13 + $0x1a4] ss:$16 sps:$4 sm:$0xff]  }
 0x9c2   :  { %2636 = vmatprep.subr.bf16.mxu0 %v6111_v61 }
 0x9c5   :  { %2637 = vmatpush1.bf16.msra.mxu0 %v6109_v28 }
 0xa4a   :  { %v1960_v62 = vpop.f32.mrb[96].mxu0 }
 0xa4b   :  { %v1961_v0 = vadd.f32 %v1960_v62, %v6987_v60  ;;  %v1962_v26 = vpop.f32.mrb[97].mxu0 }
 0xa4c   :  { %v1963_v27 = vadd.f32 %v1962_v26, %v6990_v57  ;;  %v1964_v24 = vpop.f32.mrb[98].mxu0 }
 0xa4d   :  { %v1965_v29 = vadd.f32 %v1964_v24, %v6987_v60  ;;  %v1966_v30 = vpop.f32.mrb[99].mxu0  ;;  %v2039_v33 = vmax.f32 %v1961_v0, 0.0 }
 0xa4e   :  { %v1967_v32 = vadd.f32 %v1966_v30, %v6990_v57  ;;  %v2040_v11 = vmax.f32 %v1963_v27, 0.0  ;;  %v6117_v30 = vld [vmem:[%s8075_s13 + $0x104] ss:$16 sps:$4 sm:$0xff]  }
 0xa4f   :  { %v2041_v10 = vmax.f32 %v1965_v29, 0.0  ;;  %2638 = vmatprep.subr.bf16.mxu0 %v6117_v30 }
 0xa50   :  { %v2042_v36 = vmax.f32 %v1967_v32, 0.0 }
 0xa51   :  { %v2071_v37 = vpack.c.bf16 %v2041_v10, %v2039_v33 }
 0xa52   :  { %v2072_v39 = vpack.c.bf16 %v2042_v36, %v2040_v11  ;;  %v1970_v40 = vpop.f32.mrb[100].mxu0  ;;  %v6115_v11 = vld [vmem:[%s8075_s13 + $0x100] ss:$16 sps:$4 sm:$0xff]  }
 0xa53   :  { %v1971_v42 = vadd.f32 %v1970_v40, %v6987_v60  ;;  %v1972_v34 = vpop.f32.mrb[101].mxu0  ;;  %2639 = vmatpush1.bf16.msra.mxu0 %v6115_v11 }
 0xa54   :  { %v1973_v43 = vadd.f32 %v1972_v34, %v6990_v57  ;;  %v1974_v44 = vpop.f32.mrb[102].mxu0  ;;  %2152 = vmatprep.subr.bf16.mxu1 %v2072_v39  ;;  %2640 = vmatprep.subr.bf16.mxu0 %v6123_v38 }
 0xa55   :  { %v1975_v45 = vadd.f32 %v1974_v44, %v6987_v60  ;;  %v1976_v46 = vpop.f32.mrb[103].mxu0  ;;  %2153 = vmatpush1.bf16.msra.mxu1 %v2071_v37  ;;  %v2043_v49 = vmax.f32 %v1971_v42, 0.0  ;;  %v6121_v44 = vld [vmem:[%s8075_s13 + $0x120] ss:$16 sps:$4 sm:$0xff]  }
 0xa56   :  { %v1977_v4 = vadd.f32 %v1976_v46, %v6990_v57  ;;  %v2044_v51 = vmax.f32 %v1973_v43, 0.0  ;;  %v6129_v46 = vld [vmem:[%s8075_s13 + $0x144] ss:$16 sps:$4 sm:$0xff]  }
 0xa57   :  { %v2045_v50 = vmax.f32 %v1975_v45, 0.0  ;;  %2641 = vmatpush1.bf16.msra.mxu0 %v6121_v44 }
 0xa58   :  { %v2046_v52 = vmax.f32 %v1977_v4, 0.0  ;;  %2642 = vmatprep.subr.bf16.mxu0 %v6129_v46 }
 0xa59   :  { %v2073_v53 = vpack.c.bf16 %v2045_v50, %v2043_v49  ;;  %v6127_v50 = vld [vmem:[%s8075_s13 + $0x140] ss:$16 sps:$4 sm:$0xff]  }
 0xa5a   :  { %v2074_v55 = vpack.c.bf16 %v2046_v52, %v2044_v51  ;;  %v1980_v56 = vpop.f32.mrb[104].mxu0 }
 0xa5b   :  { %v1981_v59 = vadd.f32 %v1980_v56, %v6987_v60  ;;  %v1982_v14 = vpop.f32.mrb[105].mxu0  ;;  %2643 = vmatpush1.bf16.msra.mxu0 %v6127_v50  ;;  %v6404_v50 = vld [vmem:[%s8098_s25 + $0x8] sm:$0xff]  }
 0xa5c   :  { %v1983_v15 = vadd.f32 %v1982_v14, %v6990_v57  ;;  %v1984_v17 = vpop.f32.mrb[106].mxu0  ;;  %2154 = vmatprep.subr.bf16.mxu1 %v2074_v55  ;;  %2644 = vmatprep.subr.bf16.mxu0 %v6135_v54  ;;  %v6102_v54 = vld [vmem:[%s8075_s13 + $0xac] ss:$16 sps:$4 sm:$0xff]  }
 0xa5d   :  { %v1985_v18 = vadd.f32 %v1984_v17, %v6987_v60  ;;  %v1986_v19 = vpop.f32.mrb[107].mxu0  ;;  %2155 = vmatpush1.bf16.msra.mxu1 %v2073_v53  ;;  %v2047_v5 = vmax.f32 %v1981_v59, 0.0  ;;  %v6133_v17 = vld [vmem:[%s8075_s13 + $0x160] ss:$16 sps:$4 sm:$0xff]  }
 0xa5e   :  { %v1987_v1 = vadd.f32 %v1986_v19, %v6990_v57  ;;  %v2048_v12 = vmax.f32 %v1983_v15, 0.0  ;;  %v6141_v19 = vld [vmem:[%s8075_s13 + $0x184] ss:$16 sps:$4 sm:$0xff]  }
 0xa5f   :  { %v2049_v8 = vmax.f32 %v1985_v18, 0.0  ;;  %2645 = vmatpush1.bf16.msra.mxu0 %v6133_v17  ;;  %v6112_v17 = vld [vmem:[%s8075_s13 + $0xe8] ss:$16 sps:$4 sm:$0xff]  }
 0xa60   :  { %v2050_v13 = vmax.f32 %v1987_v1, 0.0  ;;  %2646 = vmatprep.subr.bf16.mxu0 %v6141_v19  ;;  %v6118_v19 = vld [vmem:[%s8075_s13 + $0x108] ss:$16 sps:$4 sm:$0xff]  }
 0xa61   :  { %v2075_v16 = vpack.c.bf16 %v2049_v8, %v2047_v5 }
 0xa62   :  { %v2076_v23 = vpack.c.bf16 %v2050_v13, %v2048_v12  ;;  %v1990_v21 = vpop.f32.mrb[108].mxu0  ;;  %v6139_v12 = vld [vmem:[%s8075_s13 + $0x180] ss:$16 sps:$4 sm:$0xff]  }
 0xa63   :  { %v1991_v62 = vadd.f32 %v1990_v21, %v6987_v60  ;;  %v1992_v63 = vpop.f32.mrb[109].mxu0  ;;  %2647 = vmatpush1.bf16.msra.mxu0 %v6139_v12  ;;  %v6138_v12 = vld [vmem:[%s8075_s13 + $0x16c] ss:$16 sps:$4 sm:$0xff]  }
 0xa64   :  { %v1993_v0 = vadd.f32 %v1992_v63, %v6990_v57  ;;  %v1994_v26 = vpop.f32.mrb[110].mxu0  ;;  %2156 = vmatprep.subr.bf16.mxu1 %v2076_v23  ;;  %2648 = vmatprep.subr.bf16.mxu0 %v6147_v22  ;;  %v6144_v22 = vld [vmem:[%s8075_s13 + $0x18c] ss:$16 sps:$4 sm:$0xff]  }
 0xa65   :  { %v1995_v27 = vadd.f32 %v1994_v26, %v6987_v60  ;;  %v1996_v24 = vpop.f32.mrb[111].mxu0  ;;  %2157 = vmatpush1.bf16.msra.mxu1 %v2075_v16  ;;  %v2051_v31 = vmax.f32 %v1991_v62, 0.0  ;;  %v6145_v26 = vld [vmem:[%s8075_s13 + $0x1a0] ss:$16 sps:$4 sm:$0xff]  }
 0xa66   :  { %v1997_v29 = vadd.f32 %v1996_v24, %v6990_v57  ;;  %v2052_v33 = vmax.f32 %v1993_v0, 0.0  ;;  %v6153_v24 = vld [vmem:[%s8075_s13 + $0x1c4] ss:$16 sps:$4 sm:$0xff]  }
 0xa67   :  { %v2053_v32 = vmax.f32 %v1995_v27, 0.0  ;;  %2649 = vmatpush1.bf16.msra.mxu0 %v6145_v26  ;;  %v6410_v26 = vld [vmem:[%s8098_s25 + $0x38] sm:$0xff]  }
 0xa68   :  { %v2054_v10 = vmax.f32 %v1997_v29, 0.0  ;;  %2650 = vmatprep.subr.bf16.mxu0 %v6153_v24  ;;  %v6162_v24 = vld [vmem:[%s8075_s13 + $0x1ec] ss:$16 sps:$4 sm:$0xff]  }
 0xa69   :  { %v2077_v35 = vpack.c.bf16 %v2053_v32, %v2051_v31 }
 0xa6a   :  { %v2078_v36 = vpack.c.bf16 %v2054_v10, %v2052_v33  ;;  %v2000_v37 = vpop.f32.mrb[112].mxu0  ;;  %v6151_v33 = vld [vmem:[%s8075_s13 + $0x1c0] ss:$16 sps:$4 sm:$0xff]  }
 0xa6b   :  { %v2001_v39 = vadd.f32 %v2000_v37, %v6987_v60  ;;  %v2002_v40 = vpop.f32.mrb[113].mxu0  ;;  %2651 = vmatpush1.bf16.msra.mxu0 %v6151_v33 }
 0xa6c   :  { %v2003_v41 = vadd.f32 %v2002_v40, %v6990_v57  ;;  %v2004_v42 = vpop.f32.mrb[114].mxu0  ;;  %2158 = vmatprep.subr.bf16.mxu1 %v2078_v36 }
 0xa6d   :  { %v2005_v34 = vadd.f32 %v2004_v42, %v6987_v60  ;;  %v2006_v43 = vpop.f32.mrb[115].mxu0  ;;  %2159 = vmatpush1.bf16.msra.mxu1 %v2077_v35  ;;  %v2055_v47 = vmax.f32 %v2001_v39, 0.0 }
 0xa6e   :  { %v2007_v45 = vadd.f32 %v2006_v43, %v6990_v57  ;;  %v2056_v48 = vmax.f32 %v2003_v41, 0.0 }
 0xa6f   :  { %v2057_v4 = vmax.f32 %v2005_v34, 0.0 }
 0xa70   :  { %v2058_v49 = vmax.f32 %v2007_v45, 0.0 }
 0xa71   :  { %v2079_v51 = vpack.c.bf16 %v2057_v4, %v2055_v47  ;;  %v6072_v47 = vld [vmem:[%s8075_s13 + $0xc] ss:$16 sps:$4 sm:$0xff]   ;;  %v6076_v4 = vld [vmem:[%s8075_s13 + $0x28] ss:$16 sps:$4 sm:$0xff]  }
 0xa72   :  { %v2080_v52 = vpack.c.bf16 %v2058_v49, %v2056_v48  ;;  %v2010_v53 = vpop.f32.mrb[116].mxu0  ;;  %v6084_v48 = vld [vmem:[%s8075_s13 + $0x4c] ss:$16 sps:$4 sm:$0xff]   ;;  %v6082_v49 = vld [vmem:[%s8075_s13 + $0x48] ss:$16 sps:$4 sm:$0xff]  }
 0xa73   :  { %v2011_v55 = vadd.f32 %v2010_v53, %v6987_v60  ;;  %v2012_v56 = vpop.f32.mrb[117].mxu0  ;;  %v6094_v53 = vld [vmem:[%s8075_s13 + $0x88] ss:$16 sps:$4 sm:$0xff]  }
 0xa74   :  { %v2013_v58 = vadd.f32 %v2012_v56, %v6990_v57  ;;  %v2014_v59 = vpop.f32.mrb[118].mxu0  ;;  %2160 = vmatprep.subr.bf16.mxu1 %v2080_v52  ;;  %v6096_v52 = vld [vmem:[%s8075_s13 + $0x8c] ss:$16 sps:$4 sm:$0xff]   ;;  %v6100_v56 = vld [vmem:[%s8075_s13 + $0xa8] ss:$16 sps:$4 sm:$0xff]  }
 0xa75   :  { %v2015_v14 = vadd.f32 %v2014_v59, %v6987_v60  ;;  %v2016_v15 = vpop.f32.mrb[119].mxu0  ;;  %2161 = vmatpush1.bf16.msra.mxu1 %v2079_v51  ;;  %v2059_v20 = vmax.f32 %v2011_v55, 0.0  ;;  %v6088_v51 = vld [vmem:[%s8075_s13 + $0x68] ss:$16 sps:$4 sm:$0xff]   ;;  %v6405_v55 = vld [vmem:[%s8098_s25 + $0x10] sm:$0xff]  }
 0xa76   :  { %v2017_v18 = vadd.f32 %v2016_v15, %v6990_v57  ;;  %v2060_v2 = vmax.f32 %v2013_v58, 0.0  ;;  %v6108_v58 = vld [vmem:[%s8075_s13 + $0xcc] ss:$16 sps:$4 sm:$0xff]   ;;  %v6106_v59 = vld [vmem:[%s8075_s13 + $0xc8] ss:$16 sps:$4 sm:$0xff]  }
 0xa77   :  { %v2061_v1 = vmax.f32 %v2015_v14, 0.0  ;;  %v6114_v14 = vld [vmem:[%s8075_s13 + $0xec] ss:$16 sps:$4 sm:$0xff]  }
 0xa78   :  { %v2062_v5 = vmax.f32 %v2017_v18, 0.0  ;;  %v6406_v15 = vld [vmem:[%s8098_s25 + $0x18] sm:$0xff]  }
 0xa79   :  { %v2081_v8 = vpack.c.bf16 %v2061_v1, %v2059_v20  ;;  %v6120_v18 = vld [vmem:[%s8075_s13 + $0x10c] ss:$16 sps:$4 sm:$0xff]   ;;  %v6407_v1 = vld [vmem:[%s8098_s25 + $0x20] sm:$0xff]  }
 0xa7a   :  { %v2082_v13 = vpack.c.bf16 %v2062_v5, %v2060_v2  ;;  %v2020_v16 = vpop.f32.mrb[120].mxu0  ;;  %v6126_v20 = vld [vmem:[%s8075_s13 + $0x12c] ss:$16 sps:$4 sm:$0xff]   ;;  %v6124_v2 = vld [vmem:[%s8075_s13 + $0x128] ss:$16 sps:$4 sm:$0xff]  }
 0xa7b   :  { %v2021_v23 = vadd.f32 %v2020_v16, %v6987_v60  ;;  %v2022_v21 = vpop.f32.mrb[121].mxu0  ;;  %v6132_v5 = vld [vmem:[%s8075_s13 + $0x14c] ss:$16 sps:$4 sm:$0xff]   ;;  %v6136_v16 = vld [vmem:[%s8075_s13 + $0x168] ss:$16 sps:$4 sm:$0xff]  }
 0xa7c   :  { %v2023_v61 = vadd.f32 %v2022_v21, %v6990_v57  ;;  %v2024_v62 = vpop.f32.mrb[122].mxu0  ;;  %2162 = vmatprep.subr.bf16.mxu1 %v2082_v13  ;;  %v6408_v13 = vld [vmem:[%s8098_s25 + $0x28] sm:$0xff]  }
 0xa7d   :  { %v2025_v63 = vadd.f32 %v2024_v62, %v6987_v60  ;;  %v2026_v0 = vpop.f32.mrb[123].mxu0  ;;  %2163 = vmatpush1.bf16.msra.mxu1 %v2081_v8  ;;  %v2063_v28 = vmax.f32 %v2021_v23, 0.0  ;;  %v6130_v8 = vld [vmem:[%s8075_s13 + $0x148] ss:$16 sps:$4 sm:$0xff]   ;;  %v6150_v21 = vld [vmem:[%s8075_s13 + $0x1ac] ss:$16 sps:$4 sm:$0xff]  }
 0xa7e   :  { %v2027_v27 = vadd.f32 %v2026_v0, %v6990_v57  ;;  %v2064_v30 = vmax.f32 %v2023_v61, 0.0  ;;  %v6142_v23 = vld [vmem:[%s8075_s13 + $0x188] ss:$16 sps:$4 sm:$0xff]   ;;  %v6409_v61 = vld [vmem:[%s8098_s25 + $0x30] sm:$0xff]  }
 0xa7f   :  { %v2065_v29 = vmax.f32 %v2025_v63, 0.0  ;;  %v6148_v62 = vld [vmem:[%s8075_s13 + $0x1a8] ss:$16 sps:$4 sm:$0xff]   ;;  %v6156_v63 = vld [vmem:[%s8075_s13 + $0x1cc] ss:$16 sps:$4 sm:$0xff]  }
 0xa80   :  { %v2066_v31 = vmax.f32 %v2027_v27, 0.0  ;;  %v6154_v0 = vld [vmem:[%s8075_s13 + $0x1c8] ss:$16 sps:$4 sm:$0xff]   ;;  %v6159_v27 = vld [vmem:[%s8075_s13 + $0x1e4] ss:$16 sps:$4 sm:$0xff]  }
 0xa81   :  { %v2083_v32 = vpack.c.bf16 %v2065_v29, %v2063_v28  ;;  %v6157_v28 = vld [vmem:[%s8075_s13 + $0x1e0] ss:$16 sps:$4 sm:$0xff]   ;;  %v6160_v29 = vld [vmem:[%s8075_s13 + $0x1e8] ss:$16 sps:$4 sm:$0xff]   ;;  %2652 = vmatprep.subr.bf16.mxu0 %v6159_v27 }
 0xa82   :  { %v2084_v10 = vpack.c.bf16 %v2066_v31, %v2064_v30  ;;  %v2030_v35 = vpop.f32.mrb[124].mxu0  ;;  %2653 = vmatpush1.bf16.msra.mxu0 %v6157_v28  ;;  %v6165_v30 = vld [vmem:[%s8076_s15 + $0x4] ss:$16 sps:$4 sm:$0xff]   ;;  %v6168_v31 = vld [vmem:[%s8076_s15 + $0xc] ss:$16 sps:$4 sm:$0xff]  }
 0xa83   :  { %v2031_v11 = vadd.f32 %v2030_v35, %v6987_v60  ;;  %v2032_v36 = vpop.f32.mrb[125].mxu0  ;;  %3713 = vmatprep.subr.bf16.mxu0 %v6165_v30  ;;  %v6208_v27 = vld [vmem:[%s8076_s15 + $0xe8] ss:$16 sps:$4 sm:$0xff]   ;;  %v6213_v28 = vld [vmem:[%s8076_s15 + $0x104] ss:$16 sps:$4 sm:$0xff]  }
 0xa84   :  { %v2033_v37 = vadd.f32 %v2032_v36, %v6990_v57  ;;  %v2034_v38 = vpop.f32.mrb[126].mxu0  ;;  %2164 = vmatprep.subr.bf16.mxu1 %v2084_v10 }
 0xa85   :  { %v2035_v39 = vadd.f32 %v2034_v38, %v6987_v60  ;;  %v2036_v40 = vpop.f32.mrb[127].mxu0  ;;  %2165 = vmatpush1.bf16.msra.mxu1 %v2083_v32  ;;  %v2067_v42 = vmax.f32 %v2031_v11, 0.0  ;;  %v6070_v60 = vld [vmem:[%s8075_s13 + $0x8] ss:$16 sps:$4 sm:$0xff]  }
 0xa86   :  { %v2037_v41 = vadd.f32 %v2036_v40, %v6990_v57  ;;  %v2068_v43 = vmax.f32 %v2033_v37, 0.0  ;;  %v6078_v57 = vld [vmem:[%s8075_s13 + $0x2c] ss:$16 sps:$4 sm:$0xff]   ;;  %v6163_v37 = vld [vmem:[%s8076_s15] ss:$16 sps:$4 sm:$0xff]  }
 0xa87   :  { %v2069_v34 = vmax.f32 %v2035_v39, 0.0  ;;  %v6166_v38 = vld [vmem:[%s8076_s15 + $0x8] ss:$16 sps:$4 sm:$0xff]   ;;  %v6171_v39 = vld [vmem:[%s8076_s15 + $0x24] ss:$16 sps:$4 sm:$0xff]  }
 0xa88   :  { %v2070_v44 = vmax.f32 %v2037_v41, 0.0  ;;  %v6174_v40 = vld [vmem:[%s8076_s15 + $0x2c] ss:$16 sps:$4 sm:$0xff]  }
 0xa89   :  { %v2085_v45 = vpack.c.bf16 %v2069_v34, %v2067_v42  ;;  %v6169_v42 = vld [vmem:[%s8076_s15 + $0x20] ss:$16 sps:$4 sm:$0xff]   ;;  %v6172_v34 = vld [vmem:[%s8076_s15 + $0x28] ss:$16 sps:$4 sm:$0xff]  }
 0xa8a   :  { %v2086_v46 = vpack.c.bf16 %v2070_v44, %v2068_v43  ;;  %v6177_v44 = vld [vmem:[%s8076_s15 + $0x44] ss:$16 sps:$4 sm:$0xff]  }
 0xa8c   :  { %2166 = vmatprep.subr.bf16.mxu1 %v2086_v46 }
 0xa8d   :  { %2167 = vmatpush1.bf16.msra.mxu1 %v2085_v45  ;;  %v6180_v45 = vld [vmem:[%s8076_s15 + $0x4c] ss:$16 sps:$4 sm:$0xff]  }
 0xa8e   :  { %2735 = vmatprep.subr.bf16.mxu1 %v6072_v47 }
 0xa90   :  { %2185 = vmatmul.mubr.bf16.vlgmr.msra.gmra.mrb[96].mxu1 %v6966_v25  ;;  %v6090_v25 = vld [vmem:[%s8075_s13 + $0x6c] ss:$16 sps:$4 sm:$0xff]  }
 0xa91   :  { %2194 = vmatprep.mubr.bf16.mxu1 %v6419_v3  ;;  %2736 = vmatpush1.bf16.msra.mxu1 %v6070_v60 }
 0xa92   :  { %2737 = vmatprep.subr.bf16.mxu1 %v6078_v57 }
 0xa95   :  { %2738 = vmatpush1.bf16.msra.mxu1 %v6076_v4  ;;  %v6175_v4 = vld [vmem:[%s8076_s15 + $0x40] ss:$16 sps:$4 sm:$0xff]  }
 0xa96   :  { %2739 = vmatprep.subr.bf16.mxu1 %v6084_v48  ;;  %v6178_v48 = vld [vmem:[%s8076_s15 + $0x48] ss:$16 sps:$4 sm:$0xff]  }
 0xa98   :  { %2195 = vmatmul.mubr.bf16.gmra.mrb[100].mxu1 %v6404_v50 }
 0xa99   :  { %2204 = vmatprep.mubr.bf16.mxu1 %v6419_v3  ;;  %2740 = vmatpush1.bf16.msra.mxu1 %v6082_v49  ;;  %v6183_v49 = vld [vmem:[%s8076_s15 + $0x64] ss:$16 sps:$4 sm:$0xff]  }
 0xa9a   :  { %2741 = vmatprep.subr.bf16.mxu1 %v6090_v25  ;;  %v6186_v25 = vld [vmem:[%s8076_s15 + $0x6c] ss:$16 sps:$4 sm:$0xff]  }
 0xa9d   :  { %2742 = vmatpush1.bf16.msra.mxu1 %v6088_v51  ;;  %v6181_v51 = vld [vmem:[%s8076_s15 + $0x60] ss:$16 sps:$4 sm:$0xff]  }
 0xa9e   :  { %2743 = vmatprep.subr.bf16.mxu1 %v6096_v52  ;;  %v6184_v52 = vld [vmem:[%s8076_s15 + $0x68] ss:$16 sps:$4 sm:$0xff]  }
 0xaa0   :  { %2205 = vmatmul.mubr.bf16.gmra.mrb[104].mxu1 %v6405_v55  ;;  %v6192_v55 = vld [vmem:[%s8076_s15 + $0x8c] ss:$16 sps:$4 sm:$0xff]  }
 0xaa1   :  { %2214 = vmatprep.mubr.bf16.mxu1 %v6419_v3  ;;  %2744 = vmatpush1.bf16.msra.mxu1 %v6094_v53 }
 0xaa2   :  { %2745 = vmatprep.subr.bf16.mxu1 %v6102_v54  ;;  %v6189_v54 = vld [vmem:[%s8076_s15 + $0x84] ss:$16 sps:$4 sm:$0xff]  }
 0xaa5   :  { %2746 = vmatpush1.bf16.msra.mxu1 %v6100_v56 }
 0xaa6   :  { %2747 = vmatprep.subr.bf16.mxu1 %v6108_v58 }
 0xaa8   :  { %2215 = vmatmul.mubr.bf16.gmra.mrb[108].mxu1 %v6406_v15  ;;  %v6187_v15 = vld [vmem:[%s8076_s15 + $0x80] ss:$16 sps:$4 sm:$0xff]  }
 0xaa9   :  { %2224 = vmatprep.mubr.bf16.mxu1 %v6419_v3  ;;  %2748 = vmatpush1.bf16.msra.mxu1 %v6106_v59 }
 0xaaa   :  { %2749 = vmatprep.subr.bf16.mxu1 %v6114_v14 }
 0xaad   :  { %2750 = vmatpush1.bf16.msra.mxu1 %v6112_v17  ;;  %v6190_v17 = vld [vmem:[%s8076_s15 + $0x88] ss:$16 sps:$4 sm:$0xff]  }
 0xaae   :  { %2751 = vmatprep.subr.bf16.mxu1 %v6120_v18  ;;  %v6195_v18 = vld [vmem:[%s8076_s15 + $0xa4] ss:$16 sps:$4 sm:$0xff]  }
 0xab0   :  { %2225 = vmatmul.mubr.bf16.gmra.mrb[112].mxu1 %v6407_v1  ;;  %v6193_v1 = vld [vmem:[%s8076_s15 + $0xa0] ss:$16 sps:$4 sm:$0xff]  }
 0xab1   :  { %2234 = vmatprep.mubr.bf16.mxu1 %v6419_v3  ;;  %2752 = vmatpush1.bf16.msra.mxu1 %v6118_v19  ;;  %v6198_v19 = vld [vmem:[%s8076_s15 + $0xac] ss:$16 sps:$4 sm:$0xff]  }
 0xab2   :  { %2753 = vmatprep.subr.bf16.mxu1 %v6126_v20 }
 0xab5   :  { %2754 = vmatpush1.bf16.msra.mxu1 %v6124_v2  ;;  %v6196_v2 = vld [vmem:[%s8076_s15 + $0xa8] ss:$16 sps:$4 sm:$0xff]  }
 0xab6   :  { %2755 = vmatprep.subr.bf16.mxu1 %v6132_v5 }
 0xab8   :  { %2235 = vmatmul.mubr.bf16.gmra.mrb[116].mxu1 %v6408_v13 }
 0xab9   :  { %2244 = vmatprep.mubr.bf16.mxu1 %v6419_v3  ;;  %2756 = vmatpush1.bf16.msra.mxu1 %v6130_v8  ;;  %v6201_v8 = vld [vmem:[%s8076_s15 + $0xc4] ss:$16 sps:$4 sm:$0xff]  }
 0xaba   :  { %2757 = vmatprep.subr.bf16.mxu1 %v6138_v12  ;;  %v6204_v12 = vld [vmem:[%s8076_s15 + $0xcc] ss:$16 sps:$4 sm:$0xff]  }
 0xabd   :  { %2758 = vmatpush1.bf16.msra.mxu1 %v6136_v16 }
 0xabe   :  { %2759 = vmatprep.subr.bf16.mxu1 %v6144_v22 }
 0xac0   :  { %2245 = vmatmul.mubr.bf16.gmra.mrb[120].mxu1 %v6409_v61  ;;  %v6202_v61 = vld [vmem:[%s8076_s15 + $0xc8] ss:$16 sps:$4 sm:$0xff]  }
 0xac1   :  { %2254 = vmatprep.mubr.bf16.mxu1 %v6419_v3  ;;  %2760 = vmatpush1.bf16.msra.mxu1 %v6142_v23 }
 0xac2   :  { %2761 = vmatprep.subr.bf16.mxu1 %v6150_v21  ;;  %v6199_v21 = vld [vmem:[%s8076_s15 + $0xc0] ss:$16 sps:$4 sm:$0xff]  }
 0xac5   :  { %2762 = vmatpush1.bf16.msra.mxu1 %v6148_v62  ;;  %v6207_v62 = vld [vmem:[%s8076_s15 + $0xe4] ss:$16 sps:$4 sm:$0xff]  }
 0xac6   :  { %2763 = vmatprep.subr.bf16.mxu1 %v6156_v63  ;;  %v6210_v63 = vld [vmem:[%s8076_s15 + $0xec] ss:$16 sps:$4 sm:$0xff]  }
 0xac8   :  { %2255 = vmatmul.mubr.bf16.gmra.mrb[124].mxu1 %v6410_v26  ;;  %v6205_v26 = vld [vmem:[%s8076_s15 + $0xe0] ss:$16 sps:$4 sm:$0xff]  }
 0xac9   :  { %2764 = vmatpush1.bf16.msra.mxu1 %v6154_v0 }
 0xaca   :  { %2765 = vmatprep.subr.bf16.mxu1 %v6162_v24 }
 0xacd   :  { %2766 = vmatpush1.bf16.msra.mxu1 %v6160_v29  ;;  %v6216_v29 = vld [vmem:[%s8076_s15 + $0x10c] ss:$16 sps:$4 sm:$0xff]  }
 0xace   :  { %3939 = vmatprep.subr.bf16.mxu1 %v6168_v31 }
 0xb63   :  { %v2186_v32 = vpop.f32.mrb[96].mxu1 }
 0xb64   :  { %v2188_v33 = vpop.f32.mrb[97].mxu1 }
 0xb65   :  { %v2190_v10 = vpop.f32.mrb[98].mxu1 }
 0xb66   :  { %v2265_v35 = vpack.c.bf16 %v2190_v10, %v2186_v32  ;;  %v2192_v11 = vpop.f32.mrb[99].mxu1  ;;  %v6211_v10 = vld [vmem:[%s8076_s15 + $0x100] ss:$16 sps:$4 sm:$0xff]  }
 0xb67   :  { %v2266_v36 = vpack.c.bf16 %v2192_v11, %v2188_v33  ;;  %v6219_v11 = vld [vmem:[%s8076_s15 + $0x124] ss:$16 sps:$4 sm:$0xff]  }
 0xb69   :  { %2654 = vmatprep.mubr.bf16.mxu0 %v2266_v36  ;;  %2767 = vmatprep.mubr.bf16.mxu1 %v2266_v36  ;;  %v6222_v36 = vld [vmem:[%s8076_s15 + $0x12c] ss:$16 sps:$4 sm:$0xff]  }
 0xb6a   :  { %2655 = vmatmul.mubr.bf16.vlgmr.msra.gmra.mrb[128].mxu0 %v2265_v35  ;;  %2768 = vmatmul.mubr.bf16.vlgmr.msra.gmra.mrb[128].mxu1 %v2265_v35  ;;  %v6214_v35 = vld [vmem:[%s8076_s15 + $0x108] ss:$16 sps:$4 sm:$0xff]  }
 0xb6b   :  { %v2196_v41 = vpop.f32.mrb[100].mxu1  ;;  %3714 = vmatpush1.bf16.msra.mxu0 %v6163_v37  ;;  %3940 = vmatpush1.bf16.msra.mxu1 %v6166_v38  ;;  %v6217_v38 = vld [vmem:[%s8076_s15 + $0x120] ss:$16 sps:$4 sm:$0xff]  }
 0xb6c   :  { %v2198_v43 = vpop.f32.mrb[101].mxu1  ;;  %3715 = vmatprep.subr.bf16.mxu0 %v6171_v39  ;;  %3941 = vmatprep.subr.bf16.mxu1 %v6174_v40  ;;  %v6220_v39 = vld [vmem:[%s8076_s15 + $0x128] ss:$16 sps:$4 sm:$0xff]  }
 0xb6d   :  { %v2200_v46 = vpop.f32.mrb[102].mxu1 }
 0xb6e   :  { %v2267_v47 = vpack.c.bf16 %v2200_v46, %v2196_v41  ;;  %v2202_v60 = vpop.f32.mrb[103].mxu1  ;;  %v6225_v41 = vld [vmem:[%s8076_s15 + $0x144] ss:$16 sps:$4 sm:$0xff]   ;;  %v6223_v46 = vld [vmem:[%s8076_s15 + $0x140] ss:$16 sps:$4 sm:$0xff]  }
 0xb6f   :  { %v2268_v57 = vpack.c.bf16 %v2202_v60, %v2198_v43  ;;  %3716 = vmatpush1.bf16.msra.mxu0 %v6169_v42  ;;  %3942 = vmatpush1.bf16.msra.mxu1 %v6172_v34  ;;  %v6228_v42 = vld [vmem:[%s8076_s15 + $0x14c] ss:$16 sps:$4 sm:$0xff]   ;;  %v6231_v60 = vld [vmem:[%s8076_s15 + $0x164] ss:$16 sps:$4 sm:$0xff]  }
 0xb70   :  { %3717 = vmatprep.subr.bf16.mxu0 %v6177_v44  ;;  %3943 = vmatprep.subr.bf16.mxu1 %v6180_v45 }
 0xb71   :  { %2664 = vmatprep.mubr.bf16.mxu0 %v2268_v57  ;;  %2777 = vmatprep.mubr.bf16.mxu1 %v2268_v57  ;;  %v6234_v57 = vld [vmem:[%s8076_s15 + $0x16c] ss:$16 sps:$4 sm:$0xff]  }
 0xb72   :  { %2665 = vmatmul.mubr.bf16.gmra.mrb[132].mxu0 %v2267_v47  ;;  %2778 = vmatmul.mubr.bf16.gmra.mrb[132].mxu1 %v2267_v47  ;;  %v6226_v47 = vld [vmem:[%s8076_s15 + $0x148] ss:$16 sps:$4 sm:$0xff]  }
 0xb73   :  { %v2206_v50 = vpop.f32.mrb[104].mxu1  ;;  %3718 = vmatpush1.bf16.msra.mxu0 %v6175_v4  ;;  %3944 = vmatpush1.bf16.msra.mxu1 %v6178_v48  ;;  %v6229_v48 = vld [vmem:[%s8076_s15 + $0x160] ss:$16 sps:$4 sm:$0xff]  }
 0xb74   :  { %v2208_v53 = vpop.f32.mrb[105].mxu1  ;;  %3719 = vmatprep.subr.bf16.mxu0 %v6183_v49  ;;  %3945 = vmatprep.subr.bf16.mxu1 %v6186_v25  ;;  %v6232_v49 = vld [vmem:[%s8076_s15 + $0x168] ss:$16 sps:$4 sm:$0xff]  }
 0xb75   :  { %v2210_v56 = vpop.f32.mrb[106].mxu1 }
 0xb76   :  { %v2269_v58 = vpack.c.bf16 %v2210_v56, %v2206_v50  ;;  %v2212_v59 = vpop.f32.mrb[107].mxu1  ;;  %v6237_v50 = vld [vmem:[%s8076_s15 + $0x184] ss:$16 sps:$4 sm:$0xff]   ;;  %v6235_v56 = vld [vmem:[%s8076_s15 + $0x180] ss:$16 sps:$4 sm:$0xff]  }
 0xb77   :  { %v2270_v14 = vpack.c.bf16 %v2212_v59, %v2208_v53  ;;  %3720 = vmatpush1.bf16.msra.mxu0 %v6181_v51  ;;  %3946 = vmatpush1.bf16.msra.mxu1 %v6184_v52  ;;  %v6240_v51 = vld [vmem:[%s8076_s15 + $0x18c] ss:$16 sps:$4 sm:$0xff]   ;;  %v6243_v59 = vld [vmem:[%s8076_s15 + $0x1a4] ss:$16 sps:$4 sm:$0xff]  }
 0xb78   :  { %3721 = vmatprep.subr.bf16.mxu0 %v6189_v54  ;;  %3947 = vmatprep.subr.bf16.mxu1 %v6192_v55 }
 0xb79   :  { %2674 = vmatprep.mubr.bf16.mxu0 %v2270_v14  ;;  %2787 = vmatprep.mubr.bf16.mxu1 %v2270_v14  ;;  %v6246_v14 = vld [vmem:[%s8076_s15 + $0x1ac] ss:$16 sps:$4 sm:$0xff]  }
 0xb7a   :  { %2675 = vmatmul.mubr.bf16.gmra.mrb[136].mxu0 %v2269_v58  ;;  %2788 = vmatmul.mubr.bf16.gmra.mrb[136].mxu1 %v2269_v58  ;;  %v6238_v58 = vld [vmem:[%s8076_s15 + $0x188] ss:$16 sps:$4 sm:$0xff]  }
 0xb7b   :  { %v2216_v20 = vpop.f32.mrb[108].mxu1  ;;  %3722 = vmatpush1.bf16.msra.mxu0 %v6187_v15  ;;  %3948 = vmatpush1.bf16.msra.mxu1 %v6190_v17  ;;  %v6241_v17 = vld [vmem:[%s8076_s15 + $0x1a0] ss:$16 sps:$4 sm:$0xff]  }
 0xb7c   :  { %v2218_v5 = vpop.f32.mrb[109].mxu1  ;;  %3723 = vmatprep.subr.bf16.mxu0 %v6195_v18  ;;  %3949 = vmatprep.subr.bf16.mxu1 %v6198_v19  ;;  %v6244_v18 = vld [vmem:[%s8076_s15 + $0x1a8] ss:$16 sps:$4 sm:$0xff]  }
 0xb7d   :  { %v2220_v13 = vpop.f32.mrb[110].mxu1 }
 0xb7e   :  { %v2271_v16 = vpack.c.bf16 %v2220_v13, %v2216_v20  ;;  %v2222_v22 = vpop.f32.mrb[111].mxu1  ;;  %v6247_v13 = vld [vmem:[%s8076_s15 + $0x1c0] ss:$16 sps:$4 sm:$0xff]  }
 0xb7f   :  { %v2272_v23 = vpack.c.bf16 %v2222_v22, %v2218_v5  ;;  %3724 = vmatpush1.bf16.msra.mxu0 %v6193_v1  ;;  %3950 = vmatpush1.bf16.msra.mxu1 %v6196_v2  ;;  %v6255_v22 = vld [vmem:[%s8076_s15 + $0x1e4] ss:$16 sps:$4 sm:$0xff]  }
 0xb80   :  { %3725 = vmatprep.subr.bf16.mxu0 %v6201_v8  ;;  %3951 = vmatprep.subr.bf16.mxu1 %v6204_v12  ;;  %v6249_v8 = vld [vmem:[%s8076_s15 + $0x1c4] ss:$16 sps:$4 sm:$0xff]   ;;  %v6252_v12 = vld [vmem:[%s8076_s15 + $0x1cc] ss:$16 sps:$4 sm:$0xff]  }
 0xb81   :  { %2684 = vmatprep.mubr.bf16.mxu0 %v2272_v23  ;;  %2797 = vmatprep.mubr.bf16.mxu1 %v2272_v23  ;;  %v6258_v23 = vld [vmem:[%s8076_s15 + $0x1ec] ss:$16 sps:$4 sm:$0xff]  }
 0xb82   :  { %2685 = vmatmul.mubr.bf16.gmra.mrb[140].mxu0 %v2271_v16  ;;  %2798 = vmatmul.mubr.bf16.gmra.mrb[140].mxu1 %v2271_v16  ;;  %v6250_v16 = vld [vmem:[%s8076_s15 + $0x1c8] ss:$16 sps:$4 sm:$0xff]  }
 0xb83   :  { %v2226_v0 = vpop.f32.mrb[112].mxu1  ;;  %3726 = vmatpush1.bf16.msra.mxu0 %v6199_v21  ;;  %3952 = vmatpush1.bf16.msra.mxu1 %v6202_v61  ;;  %v6253_v21 = vld [vmem:[%s8076_s15 + $0x1e0] ss:$16 sps:$4 sm:$0xff]   ;;  %v6256_v61 = vld [vmem:[%s8076_s15 + $0x1e8] ss:$16 sps:$4 sm:$0xff]  }
 0xb84   :  { %v2228_v24 = vpop.f32.mrb[113].mxu1  ;;  %3727 = vmatprep.subr.bf16.mxu0 %v6207_v62  ;;  %3953 = vmatprep.subr.bf16.mxu1 %v6210_v63  ;;  %v6261_v62 = vld [vmem:[%s8076_s15 + $0x204] ss:$16 sps:$4 sm:$0xff]   ;;  %v6264_v63 = vld [vmem:[%s8076_s15 + $0x20c] ss:$16 sps:$4 sm:$0xff]  }
 0xb85   :  { %v2230_v30 = vpop.f32.mrb[114].mxu1 }
 0xb86   :  { %v2273_v31 = vpack.c.bf16 %v2230_v30, %v2226_v0  ;;  %v2232_v32 = vpop.f32.mrb[115].mxu1  ;;  %v2292_v0 = vsub.s32 2, %v6913_v6 }
 0xb87   :  { %v2274_v33 = vpack.c.bf16 %v2232_v32, %v2228_v24  ;;  %3728 = vmatpush1.bf16.msra.mxu0 %v6205_v26  ;;  %3954 = vmatpush1.bf16.msra.mxu1 %v6208_v27  ;;  %v2151_v26 = vld [vmem:[%s8077_s14] sm:$0xf]  ;;  %v2296_v27 = vsub.s32 3, %v6913_v6 }
 0xb88   :  { %3729 = vmatprep.subr.bf16.mxu0 %v6213_v28  ;;  %3955 = vmatprep.subr.bf16.mxu1 %v6216_v29  ;;  %v7449_v24 = vrot.slane %v2151_v26, %v6916_v7  ;;  %v7453_v28 = vrot.slane %v2151_v26, %v2292_v0  ;;  %v7456_v29 = vrot.slane %v2151_v26, %v6922_v9 }
 0xb89   :  { %2694 = vmatprep.mubr.bf16.mxu0 %v2274_v33  ;;  %2807 = vmatprep.mubr.bf16.mxu1 %v2274_v33  ;;  %v7460_v30 = vrot.slane %v2151_v26, %v2296_v27 }
 0xb8a   :  { %2695 = vmatmul.mubr.bf16.gmra.mrb[144].mxu0 %v2273_v31  ;;  %2808 = vmatmul.mubr.bf16.gmra.mrb[144].mxu1 %v2273_v31 }
 0xb8b   :  { %v2236_v37 = vpop.f32.mrb[116].mxu1  ;;  %3730 = vmatpush1.bf16.msra.mxu0 %v6211_v10  ;;  %3956 = vmatpush1.bf16.msra.mxu1 %v6214_v35 }
 0xb8c   :  { %v2238_v40 = vpop.f32.mrb[117].mxu1  ;;  %3731 = vmatprep.subr.bf16.mxu0 %v6219_v11  ;;  %3957 = vmatprep.subr.bf16.mxu1 %v6222_v36 }
 0xb8d   :  { %v2240_v34 = vpop.f32.mrb[118].mxu1 }
 0xb8e   :  { %v2275_v43 = vpack.c.bf16 %v2240_v34, %v2236_v37  ;;  %v2242_v44 = vpop.f32.mrb[119].mxu1 }
 0xb8f   :  { %v2276_v45 = vpack.c.bf16 %v2242_v44, %v2238_v40  ;;  %3732 = vmatpush1.bf16.msra.mxu0 %v6217_v38  ;;  %3958 = vmatpush1.bf16.msra.mxu1 %v6220_v39 }
 0xb90   :  { %3733 = vmatprep.subr.bf16.mxu0 %v6225_v41  ;;  %3959 = vmatprep.subr.bf16.mxu1 %v6228_v42 }
 0xb91   :  { %2704 = vmatprep.mubr.bf16.mxu0 %v2276_v45  ;;  %2817 = vmatprep.mubr.bf16.mxu1 %v2276_v45 }
 0xb92   :  { %2705 = vmatmul.mubr.bf16.gmra.mrb[148].mxu0 %v2275_v43  ;;  %2818 = vmatmul.mubr.bf16.gmra.mrb[148].mxu1 %v2275_v43 }
 0xb93   :  { %v2246_v4 = vpop.f32.mrb[120].mxu1  ;;  %3734 = vmatpush1.bf16.msra.mxu0 %v6223_v46  ;;  %3960 = vmatpush1.bf16.msra.mxu1 %v6226_v47 }
 0xb94   :  { %v2248_v25 = vpop.f32.mrb[121].mxu1  ;;  %3735 = vmatprep.subr.bf16.mxu0 %v6231_v60  ;;  %3961 = vmatprep.subr.bf16.mxu1 %v6234_v57 }
 0xb95   :  { %v2250_v52 = vpop.f32.mrb[122].mxu1 }
 0xb96   :  { %v2277_v53 = vpack.c.bf16 %v2250_v52, %v2246_v4  ;;  %v2252_v54 = vpop.f32.mrb[123].mxu1 }
 0xb97   :  { %v2278_v55 = vpack.c.bf16 %v2252_v54, %v2248_v25  ;;  %3736 = vmatpush1.bf16.msra.mxu0 %v6229_v48  ;;  %3962 = vmatpush1.bf16.msra.mxu1 %v6232_v49 }
 0xb98   :  { %3737 = vmatprep.subr.bf16.mxu0 %v6237_v50  ;;  %3963 = vmatprep.subr.bf16.mxu1 %v6240_v51 }
 0xb99   :  { %2714 = vmatprep.mubr.bf16.mxu0 %v2278_v55  ;;  %2827 = vmatprep.mubr.bf16.mxu1 %v2278_v55  ;;  %v6259_v55 = vld [vmem:[%s8076_s15 + $0x200] ss:$16 sps:$4 sm:$0xff]  }
 0xb9a   :  { %2715 = vmatmul.mubr.bf16.gmra.mrb[152].mxu0 %v2277_v53  ;;  %2828 = vmatmul.mubr.bf16.gmra.mrb[152].mxu1 %v2277_v53 }
 0xb9b   :  { %v2256_v15 = vpop.f32.mrb[124].mxu1  ;;  %3738 = vmatpush1.bf16.msra.mxu0 %v6235_v56  ;;  %3964 = vmatpush1.bf16.msra.mxu1 %v6238_v58  ;;  %v6262_v56 = vld [vmem:[%s8076_s15 + $0x208] ss:$16 sps:$4 sm:$0xff]  }
 0xb9c   :  { %v2258_v19 = vpop.f32.mrb[125].mxu1  ;;  %3739 = vmatprep.subr.bf16.mxu0 %v6243_v59  ;;  %3965 = vmatprep.subr.bf16.mxu1 %v6246_v14 }
 0xb9d   :  { %v2260_v20 = vpop.f32.mrb[126].mxu1 }
 0xb9e   :  { %v2279_v1 = vpack.c.bf16 %v2260_v20, %v2256_v15  ;;  %v2262_v2 = vpop.f32.mrb[127].mxu1 }
 0xb9f   :  { %v2280_v5 = vpack.c.bf16 %v2262_v2, %v2258_v19  ;;  %3740 = vmatpush1.bf16.msra.mxu0 %v6241_v17  ;;  %3966 = vmatpush1.bf16.msra.mxu1 %v6244_v18  ;;  %v6267_v17 = vld [vmem:[%s8076_s15 + $0x224] ss:$16 sps:$4 sm:$0xff]   ;;  %v6270_v18 = vld [vmem:[%s8076_s15 + $0x22c] ss:$16 sps:$4 sm:$0xff]  }
 0xba0   :  { %3741 = vmatprep.subr.bf16.mxu0 %v6249_v8  ;;  %3967 = vmatprep.subr.bf16.mxu1 %v6252_v12 }
 0xba1   :  { %2724 = vmatprep.mubr.bf16.mxu0 %v2280_v5  ;;  %2837 = vmatprep.mubr.bf16.mxu1 %v2280_v5 }
 0xba2   :  { %2725 = vmatmul.mubr.bf16.gmra.mrb[156].mxu0 %v2279_v1  ;;  %2838 = vmatmul.mubr.bf16.gmra.mrb[156].mxu1 %v2279_v1 }
 0xba3   :  { %3742 = vmatpush1.bf16.msra.mxu0 %v6247_v13  ;;  %3968 = vmatpush1.bf16.msra.mxu1 %v6250_v16 }
 0xba4   :  { %3743 = vmatprep.subr.bf16.mxu0 %v6255_v22  ;;  %3969 = vmatprep.subr.bf16.mxu1 %v6258_v23  ;;  %v6265_v23 = vld [vmem:[%s8076_s15 + $0x220] ss:$16 sps:$4 sm:$0xff]  }
 0xba7   :  { %3744 = vmatpush1.bf16.msra.mxu0 %v6253_v21  ;;  %3970 = vmatpush1.bf16.msra.mxu1 %v6256_v61  ;;  %v6268_v21 = vld [vmem:[%s8076_s15 + $0x228] ss:$16 sps:$4 sm:$0xff]   ;;  %v6273_v61 = vld [vmem:[%s8076_s15 + $0x244] ss:$16 sps:$4 sm:$0xff]  }
 0xba8   :  { %3826 = vmatprep.subr.bf16.mxu0 %v6261_v62  ;;  %4052 = vmatprep.subr.bf16.mxu1 %v6264_v63 }
 0xc3d   :  { %v2656_v31 = vpop.f32.mrb[128].mxu0  ;;  %v2769_v32 = vpop.f32.mrb[128].mxu1 }
 0xc3e   :  { %v2657_v33 = vadd.f32 %v2656_v31, %v7449_v24  ;;  %v2770_v10 = vadd.f32 %v2769_v32, %v7453_v28  ;;  %v2658_v35 = vpop.f32.mrb[129].mxu0  ;;  %v2771_v11 = vpop.f32.mrb[129].mxu1  ;;  %v6276_v32 = vld [vmem:[%s8076_s15 + $0x24c] ss:$16 sps:$4 sm:$0xff]  }
 0xc3f   :  { %v2659_v36 = vadd.f32 %v2658_v35, %v7456_v29  ;;  %v2772_v37 = vadd.f32 %v2771_v11, %v7460_v30  ;;  %v2660_v38 = vpop.f32.mrb[130].mxu0  ;;  %v2773_v39 = vpop.f32.mrb[130].mxu1 }
 0xc40   :  { %v2661_v40 = vadd.f32 %v2660_v38, %v7449_v24  ;;  %v2774_v41 = vadd.f32 %v2773_v39, %v7453_v28  ;;  %v2662_v42 = vpop.f32.mrb[131].mxu0  ;;  %v2775_v34 = vpop.f32.mrb[131].mxu1  ;;  %v2848_v45 = vmax.f32 %v2657_v33, 0.0  ;;  %v2850_v46 = vmax.f32 %v2770_v10, 0.0 }
 0xc41   :  { %v2663_v43 = vadd.f32 %v2662_v42, %v7456_v29  ;;  %v2776_v44 = vadd.f32 %v2775_v34, %v7460_v30  ;;  %v2849_v57 = vmax.f32 %v2659_v36, 0.0  ;;  %v2851_v4 = vmax.f32 %v2772_v37, 0.0  ;;  %v6271_v42 = vld [vmem:[%s8076_s15 + $0x240] ss:$16 sps:$4 sm:$0xff]   ;;  %v6274_v34 = vld [vmem:[%s8076_s15 + $0x248] ss:$16 sps:$4 sm:$0xff]  }
 0xc42   :  { %v2852_v47 = vmax.f32 %v2661_v40, 0.0  ;;  %v2854_v60 = vmax.f32 %v2774_v41, 0.0 }
 0xc43   :  { %v2853_v48 = vmax.f32 %v2663_v43, 0.0  ;;  %v2855_v49 = vmax.f32 %v2776_v44, 0.0 }
 0xc44   :  { %v2912_v25 = vpack.c.bf16 %v2852_v47, %v2848_v45  ;;  %v7470_v50 = vpack.c.bf16 %v2854_v60, %v2850_v46  ;;  %v6279_v47 = vld [vmem:[%s8076_s15 + $0x264] ss:$16 sps:$4 sm:$0xff]   ;;  %v6282_v60 = vld [vmem:[%s8076_s15 + $0x26c] ss:$16 sps:$4 sm:$0xff]  }
 0xc45   :  { %v2913_v51 = vpack.c.bf16 %v2853_v48, %v2849_v57  ;;  %v7472_v52 = vpack.c.bf16 %v2855_v49, %v2851_v4  ;;  %v2666_v53 = vpop.f32.mrb[132].mxu0  ;;  %v2779_v54 = vpop.f32.mrb[132].mxu1 }
 0xc46   :  { %v2667_v58 = vadd.f32 %v2666_v53, %v7449_v24  ;;  %v2780_v59 = vadd.f32 %v2779_v54, %v7453_v28  ;;  %v2668_v14 = vpop.f32.mrb[133].mxu0  ;;  %v2781_v15 = vpop.f32.mrb[133].mxu1 }
 0xc47   :  { %v2669_v19 = vadd.f32 %v2668_v14, %v7456_v29  ;;  %v2782_v20 = vadd.f32 %v2781_v15, %v7460_v30  ;;  %v2670_v1 = vpop.f32.mrb[134].mxu0  ;;  %v2783_v2 = vpop.f32.mrb[134].mxu1  ;;  %3745 = vmatprep.mubr.bf16.mxu0 %v2913_v51  ;;  %3971 = vmatprep.mubr.bf16.mxu1 %v2913_v51  ;;  %v6285_v14 = vld [vmem:[%s8076_s15 + $0x284] ss:$16 sps:$4 sm:$0xff]  }
 0xc48   :  { %v2671_v5 = vadd.f32 %v2670_v1, %v7449_v24  ;;  %v2784_v8 = vadd.f32 %v2783_v2, %v7453_v28  ;;  %v2672_v12 = vpop.f32.mrb[135].mxu0  ;;  %v2785_v13 = vpop.f32.mrb[135].mxu1  ;;  %3746 = vmatmul.mubr.bf16.vlgmr.msra.gmra.mrb[160].mxu0 %v2912_v25  ;;  %3972 = vmatmul.mubr.bf16.vlgmr.msra.gmra.mrb[160].mxu1 %v2912_v25  ;;  %v2856_v62 = vmax.f32 %v2667_v58, 0.0  ;;  %v2858_v63 = vmax.f32 %v2780_v59, 0.0  ;;  %v6277_v58 = vld [vmem:[%s8076_s15 + $0x260] ss:$16 sps:$4 sm:$0xff]  }
 0xc49   :  { %v2673_v16 = vadd.f32 %v2672_v12, %v7456_v29  ;;  %v2786_v22 = vadd.f32 %v2785_v13, %v7460_v30  ;;  %3827 = vmatpush1.bf16.msra.mxu0 %v6259_v55  ;;  %4053 = vmatpush1.bf16.msra.mxu1 %v6262_v56  ;;  %v2857_v33 = vmax.f32 %v2669_v19, 0.0  ;;  %v2859_v10 = vmax.f32 %v2782_v20, 0.0  ;;  %v6280_v59 = vld [vmem:[%s8076_s15 + $0x268] ss:$16 sps:$4 sm:$0xff]   ;;  %v6288_v20 = vld [vmem:[%s8076_s15 + $0x28c] ss:$16 sps:$4 sm:$0xff]  }
 0xc4a   :  { %v2860_v26 = vmax.f32 %v2671_v5, 0.0  ;;  %v2862_v31 = vmax.f32 %v2784_v8, 0.0  ;;  %3828 = vmatprep.subr.bf16.mxu0 %v6267_v17  ;;  %4054 = vmatprep.subr.bf16.mxu1 %v6270_v18 }
 0xc4b   :  { %v2861_v35 = vmax.f32 %v2673_v16, 0.0  ;;  %v2863_v11 = vmax.f32 %v2786_v22, 0.0 }
 0xc4c   :  { %v2916_v36 = vpack.c.bf16 %v2860_v26, %v2856_v62  ;;  %v7506_v37 = vpack.c.bf16 %v2862_v31, %v2858_v63  ;;  %v6286_v62 = vld [vmem:[%s8076_s15 + $0x288] ss:$16 sps:$4 sm:$0xff]  }
 0xc4d   :  { %v2917_v38 = vpack.c.bf16 %v2861_v35, %v2857_v33  ;;  %v7508_v39 = vpack.c.bf16 %v2863_v11, %v2859_v10  ;;  %v2676_v40 = vpop.f32.mrb[136].mxu0  ;;  %v2789_v41 = vpop.f32.mrb[136].mxu1  ;;  %3829 = vmatpush1.bf16.msra.mxu0 %v6265_v23  ;;  %4055 = vmatpush1.bf16.msra.mxu1 %v6268_v21  ;;  %v6291_v33 = vld [vmem:[%s8076_s15 + $0x2a4] ss:$16 sps:$4 sm:$0xff]   ;;  %v6294_v10 = vld [vmem:[%s8076_s15 + $0x2ac] ss:$16 sps:$4 sm:$0xff]  }
 0xc4e   :  { %v2677_v43 = vadd.f32 %v2676_v40, %v7449_v24  ;;  %v2790_v44 = vadd.f32 %v2789_v41, %v7453_v28  ;;  %v2678_v45 = vpop.f32.mrb[137].mxu0  ;;  %v2791_v46 = vpop.f32.mrb[137].mxu1  ;;  %3830 = vmatprep.subr.bf16.mxu0 %v6273_v61  ;;  %4056 = vmatprep.subr.bf16.mxu1 %v6276_v32  ;;  %v6283_v61 = vld [vmem:[%s8076_s15 + $0x280] ss:$16 sps:$4 sm:$0xff]  }
 0xc4f   :  { %v2679_v57 = vadd.f32 %v2678_v45, %v7456_v29  ;;  %v2792_v4 = vadd.f32 %v2791_v46, %v7460_v30  ;;  %v2680_v48 = vpop.f32.mrb[138].mxu0  ;;  %v2793_v49 = vpop.f32.mrb[138].mxu1  ;;  %3755 = vmatprep.mubr.bf16.mxu0 %v2917_v38  ;;  %3981 = vmatprep.mubr.bf16.mxu1 %v2917_v38  ;;  %v6289_v45 = vld [vmem:[%s8076_s15 + $0x2a0] ss:$16 sps:$4 sm:$0xff]   ;;  %v6292_v46 = vld [vmem:[%s8076_s15 + $0x2a8] ss:$16 sps:$4 sm:$0xff]  }
 0xc50   :  { %v2681_v25 = vadd.f32 %v2680_v48, %v7449_v24  ;;  %v2794_v51 = vadd.f32 %v2793_v49, %v7453_v28  ;;  %v2682_v53 = vpop.f32.mrb[139].mxu0  ;;  %v2795_v54 = vpop.f32.mrb[139].mxu1  ;;  %3756 = vmatmul.mubr.bf16.gmra.mrb[164].mxu0 %v2916_v36  ;;  %3982 = vmatmul.mubr.bf16.gmra.mrb[164].mxu1 %v2916_v36  ;;  %v2864_v15 = vmax.f32 %v2677_v43, 0.0  ;;  %v2866_v17 = vmax.f32 %v2790_v44, 0.0  ;;  %v6300_v49 = vld [vmem:[%s8076_s15 + $0x2cc] ss:$16 sps:$4 sm:$0xff]  }
 0xc51   :  { %v2683_v55 = vadd.f32 %v2682_v53, %v7456_v29  ;;  %v2796_v56 = vadd.f32 %v2795_v54, %v7460_v30  ;;  %3831 = vmatpush1.bf16.msra.mxu0 %v6271_v42  ;;  %4057 = vmatpush1.bf16.msra.mxu1 %v6274_v34  ;;  %v2865_v1 = vmax.f32 %v2679_v57, 0.0  ;;  %v2867_v2 = vmax.f32 %v2792_v4, 0.0 }
 0xc52   :  { %v2868_v18 = vmax.f32 %v2681_v25, 0.0  ;;  %v2870_v19 = vmax.f32 %v2794_v51, 0.0  ;;  %3832 = vmatprep.subr.bf16.mxu0 %v6279_v47  ;;  %4058 = vmatprep.subr.bf16.mxu1 %v6282_v60  ;;  %v6297_v47 = vld [vmem:[%s8076_s15 + $0x2c4] ss:$16 sps:$4 sm:$0xff]  }
 0xc53   :  { %v2869_v5 = vmax.f32 %v2683_v55, 0.0  ;;  %v2871_v8 = vmax.f32 %v2796_v56, 0.0 }
 0xc54   :  { %v2920_v12 = vpack.c.bf16 %v2868_v18, %v2864_v15  ;;  %v7542_v13 = vpack.c.bf16 %v2870_v19, %v2866_v17  ;;  %v6295_v17 = vld [vmem:[%s8076_s15 + $0x2c0] ss:$16 sps:$4 sm:$0xff]   ;;  %v6298_v18 = vld [vmem:[%s8076_s15 + $0x2c8] ss:$16 sps:$4 sm:$0xff]  }
 0xc55   :  { %v2921_v16 = vpack.c.bf16 %v2869_v5, %v2865_v1  ;;  %v7544_v22 = vpack.c.bf16 %v2871_v8, %v2867_v2  ;;  %v2686_v23 = vpop.f32.mrb[140].mxu0  ;;  %v2799_v21 = vpop.f32.mrb[140].mxu1  ;;  %3833 = vmatpush1.bf16.msra.mxu0 %v6277_v58  ;;  %4059 = vmatpush1.bf16.msra.mxu1 %v6280_v59  ;;  %v6303_v5 = vld [vmem:[%s8076_s15 + $0x2e4] ss:$16 sps:$4 sm:$0xff]   ;;  %v6306_v8 = vld [vmem:[%s8076_s15 + $0x2ec] ss:$16 sps:$4 sm:$0xff]  }
 0xc56   :  { %v2687_v63 = vadd.f32 %v2686_v23, %v7449_v24  ;;  %v2800_v26 = vadd.f32 %v2799_v21, %v7453_v28  ;;  %v2688_v31 = vpop.f32.mrb[141].mxu0  ;;  %v2801_v32 = vpop.f32.mrb[141].mxu1  ;;  %3834 = vmatprep.subr.bf16.mxu0 %v6285_v14  ;;  %4060 = vmatprep.subr.bf16.mxu1 %v6288_v20 }
 0xc57   :  { %v2689_v35 = vadd.f32 %v2688_v31, %v7456_v29  ;;  %v2802_v11 = vadd.f32 %v2801_v32, %v7460_v30  ;;  %v2690_v36 = vpop.f32.mrb[142].mxu0  ;;  %v2803_v38 = vpop.f32.mrb[142].mxu1  ;;  %3765 = vmatprep.mubr.bf16.mxu0 %v2921_v16  ;;  %3991 = vmatprep.mubr.bf16.mxu1 %v2921_v16 }
 0xc58   :  { %v2691_v40 = vadd.f32 %v2690_v36, %v7449_v24  ;;  %v2804_v41 = vadd.f32 %v2803_v38, %v7453_v28  ;;  %v2692_v42 = vpop.f32.mrb[143].mxu0  ;;  %v2805_v34 = vpop.f32.mrb[143].mxu1  ;;  %3766 = vmatmul.mubr.bf16.gmra.mrb[168].mxu0 %v2920_v12  ;;  %3992 = vmatmul.mubr.bf16.gmra.mrb[168].mxu1 %v2920_v12  ;;  %v2872_v60 = vmax.f32 %v2687_v63, 0.0  ;;  %v2874_v57 = vmax.f32 %v2800_v26, 0.0 }
 0xc59   :  { %v2693_v43 = vadd.f32 %v2692_v42, %v7456_v29  ;;  %v2806_v44 = vadd.f32 %v2805_v34, %v7460_v30  ;;  %3835 = vmatpush1.bf16.msra.mxu0 %v6283_v61  ;;  %4061 = vmatpush1.bf16.msra.mxu1 %v6286_v62  ;;  %v2873_v25 = vmax.f32 %v2689_v35, 0.0  ;;  %v2875_v51 = vmax.f32 %v2802_v11, 0.0  ;;  %v6309_v35 = vld [vmem:[%s8076_s15 + $0x304] ss:$16 sps:$4 sm:$0xff]  }
 0xc5a   :  { %v2876_v4 = vmax.f32 %v2691_v40, 0.0  ;;  %v2878_v48 = vmax.f32 %v2804_v41, 0.0  ;;  %3836 = vmatprep.subr.bf16.mxu0 %v6291_v33  ;;  %4062 = vmatprep.subr.bf16.mxu1 %v6294_v10  ;;  %v6301_v33 = vld [vmem:[%s8076_s15 + $0x2e0] ss:$16 sps:$4 sm:$0xff]   ;;  %v6304_v10 = vld [vmem:[%s8076_s15 + $0x2e8] ss:$16 sps:$4 sm:$0xff]  }
 0xc5b   :  { %v2877_v53 = vmax.f32 %v2693_v43, 0.0  ;;  %v2879_v54 = vmax.f32 %v2806_v44, 0.0  ;;  %v6312_v41 = vld [vmem:[%s8076_s15 + $0x30c] ss:$16 sps:$4 sm:$0xff]  }
 0xc5c   :  { %v2924_v55 = vpack.c.bf16 %v2876_v4, %v2872_v60  ;;  %v7578_v56 = vpack.c.bf16 %v2878_v48, %v2874_v57  ;;  %v6307_v48 = vld [vmem:[%s8076_s15 + $0x300] ss:$16 sps:$4 sm:$0xff]  }
 0xc5d   :  { %v2925_v58 = vpack.c.bf16 %v2877_v53, %v2873_v25  ;;  %v7580_v59 = vpack.c.bf16 %v2879_v54, %v2875_v51  ;;  %v2696_v14 = vpop.f32.mrb[144].mxu0  ;;  %v2809_v15 = vpop.f32.mrb[144].mxu1  ;;  %3837 = vmatpush1.bf16.msra.mxu0 %v6289_v45  ;;  %4063 = vmatpush1.bf16.msra.mxu1 %v6292_v46 }
 0xc5e   :  { %v2697_v19 = vadd.f32 %v2696_v14, %v7449_v24  ;;  %v2810_v20 = vadd.f32 %v2809_v15, %v7453_v28  ;;  %v2698_v1 = vpop.f32.mrb[145].mxu0  ;;  %v2811_v2 = vpop.f32.mrb[145].mxu1  ;;  %3838 = vmatprep.subr.bf16.mxu0 %v6297_v47  ;;  %4064 = vmatprep.subr.bf16.mxu1 %v6300_v49  ;;  %v6310_v49 = vld [vmem:[%s8076_s15 + $0x308] ss:$16 sps:$4 sm:$0xff]  }
 0xc5f   :  { %v2699_v12 = vadd.f32 %v2698_v1, %v7456_v29  ;;  %v2812_v16 = vadd.f32 %v2811_v2, %v7460_v30  ;;  %v2700_v23 = vpop.f32.mrb[146].mxu0  ;;  %v2813_v21 = vpop.f32.mrb[146].mxu1  ;;  %3775 = vmatprep.mubr.bf16.mxu0 %v2925_v58  ;;  %4001 = vmatprep.mubr.bf16.mxu1 %v2925_v58  ;;  %v6318_v58 = vld [vmem:[%s8076_s15 + $0x32c] ss:$16 sps:$4 sm:$0xff]  }
 0xc60   :  { %v2701_v61 = vadd.f32 %v2700_v23, %v7449_v24  ;;  %v2814_v62 = vadd.f32 %v2813_v21, %v7453_v28  ;;  %v2702_v63 = vpop.f32.mrb[147].mxu0  ;;  %v2815_v26 = vpop.f32.mrb[147].mxu1  ;;  %3776 = vmatmul.mubr.bf16.gmra.mrb[172].mxu0 %v2924_v55  ;;  %4002 = vmatmul.mubr.bf16.gmra.mrb[172].mxu1 %v2924_v55  ;;  %v2880_v11 = vmax.f32 %v2697_v19, 0.0  ;;  %v2882_v36 = vmax.f32 %v2810_v20, 0.0  ;;  %v6315_v55 = vld [vmem:[%s8076_s15 + $0x324] ss:$16 sps:$4 sm:$0xff]  }
 0xc61   :  { %v2703_v31 = vadd.f32 %v2702_v63, %v7456_v29  ;;  %v2816_v32 = vadd.f32 %v2815_v26, %v7460_v30  ;;  %3839 = vmatpush1.bf16.msra.mxu0 %v6295_v17  ;;  %4065 = vmatpush1.bf16.msra.mxu1 %v6298_v18  ;;  %v2881_v42 = vmax.f32 %v2699_v12, 0.0  ;;  %v2883_v34 = vmax.f32 %v2812_v16, 0.0  ;;  %v6313_v12 = vld [vmem:[%s8076_s15 + $0x320] ss:$16 sps:$4 sm:$0xff]   ;;  %v6316_v16 = vld [vmem:[%s8076_s15 + $0x328] ss:$16 sps:$4 sm:$0xff]  }
 0xc62   :  { %v2884_v38 = vmax.f32 %v2701_v61, 0.0  ;;  %v2886_v40 = vmax.f32 %v2814_v62, 0.0  ;;  %3840 = vmatprep.subr.bf16.mxu0 %v6303_v5  ;;  %4066 = vmatprep.subr.bf16.mxu1 %v6306_v8  ;;  %v6321_v23 = vld [vmem:[%s8076_s15 + $0x344] ss:$16 sps:$4 sm:$0xff]   ;;  %v6324_v26 = vld [vmem:[%s8076_s15 + $0x34c] ss:$16 sps:$4 sm:$0xff]  }
 0xc63   :  { %v2885_v43 = vmax.f32 %v2703_v31, 0.0  ;;  %v2887_v44 = vmax.f32 %v2816_v32, 0.0 }
 0xc64   :  { %v2928_v45 = vpack.c.bf16 %v2884_v38, %v2880_v11  ;;  %v7614_v46 = vpack.c.bf16 %v2886_v40, %v2882_v36 }
 0xc65   :  { %v2929_v47 = vpack.c.bf16 %v2885_v43, %v2881_v42  ;;  %v7616_v60 = vpack.c.bf16 %v2887_v44, %v2883_v34  ;;  %v2706_v57 = vpop.f32.mrb[148].mxu0  ;;  %v2819_v4 = vpop.f32.mrb[148].mxu1  ;;  %3841 = vmatpush1.bf16.msra.mxu0 %v6301_v33  ;;  %4067 = vmatpush1.bf16.msra.mxu1 %v6304_v10  ;;  %v6319_v42 = vld [vmem:[%s8076_s15 + $0x340] ss:$16 sps:$4 sm:$0xff]   ;;  %v6322_v34 = vld [vmem:[%s8076_s15 + $0x348] ss:$16 sps:$4 sm:$0xff]  }
 0xc66   :  { %v2707_v25 = vadd.f32 %v2706_v57, %v7449_v24  ;;  %v2820_v51 = vadd.f32 %v2819_v4, %v7453_v28  ;;  %v2708_v53 = vpop.f32.mrb[149].mxu0  ;;  %v2821_v54 = vpop.f32.mrb[149].mxu1  ;;  %3842 = vmatprep.subr.bf16.mxu0 %v6309_v35  ;;  %4068 = vmatprep.subr.bf16.mxu1 %v6312_v41  ;;  %v6327_v57 = vld [vmem:[%s8076_s15 + $0x364] ss:$16 sps:$4 sm:$0xff]   ;;  %v6330_v4 = vld [vmem:[%s8076_s15 + $0x36c] ss:$16 sps:$4 sm:$0xff]  }
 0xc67   :  { %v2709_v14 = vadd.f32 %v2708_v53, %v7456_v29  ;;  %v2822_v15 = vadd.f32 %v2821_v54, %v7460_v30  ;;  %v2710_v17 = vpop.f32.mrb[150].mxu0  ;;  %v2823_v18 = vpop.f32.mrb[150].mxu1  ;;  %3785 = vmatprep.mubr.bf16.mxu0 %v2929_v47  ;;  %4011 = vmatprep.mubr.bf16.mxu1 %v2929_v47 }
 0xc68   :  { %v2711_v19 = vadd.f32 %v2710_v17, %v7449_v24  ;;  %v2824_v20 = vadd.f32 %v2823_v18, %v7453_v28  ;;  %v2712_v1 = vpop.f32.mrb[151].mxu0  ;;  %v2825_v2 = vpop.f32.mrb[151].mxu1  ;;  %3786 = vmatmul.mubr.bf16.gmra.mrb[176].mxu0 %v2928_v45  ;;  %4012 = vmatmul.mubr.bf16.gmra.mrb[176].mxu1 %v2928_v45  ;;  %v2888_v21 = vmax.f32 %v2707_v25, 0.0  ;;  %v2890_v61 = vmax.f32 %v2820_v51, 0.0  ;;  %v6325_v17 = vld [vmem:[%s8076_s15 + $0x360] ss:$16 sps:$4 sm:$0xff]  }
 0xc69   :  { %v2713_v5 = vadd.f32 %v2712_v1, %v7456_v29  ;;  %v2826_v8 = vadd.f32 %v2825_v2, %v7460_v30  ;;  %3843 = vmatpush1.bf16.msra.mxu0 %v6307_v48  ;;  %4069 = vmatpush1.bf16.msra.mxu1 %v6310_v49  ;;  %v2889_v31 = vmax.f32 %v2709_v14, 0.0  ;;  %v2891_v32 = vmax.f32 %v2822_v15, 0.0  ;;  %v6328_v18 = vld [vmem:[%s8076_s15 + $0x368] ss:$16 sps:$4 sm:$0xff]  }
 0xc6a   :  { %v2892_v62 = vmax.f32 %v2711_v19, 0.0  ;;  %v2894_v63 = vmax.f32 %v2824_v20, 0.0  ;;  %3844 = vmatprep.subr.bf16.mxu0 %v6315_v55  ;;  %4070 = vmatprep.subr.bf16.mxu1 %v6318_v58  ;;  %v6333_v19 = vld [vmem:[%s8076_s15 + $0x384] ss:$16 sps:$4 sm:$0xff]  }
 0xc6b   :  { %v2893_v33 = vmax.f32 %v2713_v5, 0.0  ;;  %v2895_v10 = vmax.f32 %v2826_v8, 0.0  ;;  %v6336_v8 = vld [vmem:[%s8076_s15 + $0x38c] ss:$16 sps:$4 sm:$0xff]  }
 0xc6c   :  { %v2932_v35 = vpack.c.bf16 %v2892_v62, %v2888_v21  ;;  %v7650_v11 = vpack.c.bf16 %v2894_v63, %v2890_v61 }
 0xc6d   :  { %v2933_v36 = vpack.c.bf16 %v2893_v33, %v2889_v31  ;;  %v7652_v38 = vpack.c.bf16 %v2895_v10, %v2891_v32  ;;  %v2716_v40 = vpop.f32.mrb[152].mxu0  ;;  %v2829_v41 = vpop.f32.mrb[152].mxu1  ;;  %3845 = vmatpush1.bf16.msra.mxu0 %v6313_v12  ;;  %4071 = vmatpush1.bf16.msra.mxu1 %v6316_v16  ;;  %v6331_v33 = vld [vmem:[%s8076_s15 + $0x380] ss:$16 sps:$4 sm:$0xff]   ;;  %v6334_v10 = vld [vmem:[%s8076_s15 + $0x388] ss:$16 sps:$4 sm:$0xff]  }
 0xc6e   :  { %v2717_v43 = vadd.f32 %v2716_v40, %v7449_v24  ;;  %v2830_v44 = vadd.f32 %v2829_v41, %v7453_v28  ;;  %v2718_v45 = vpop.f32.mrb[153].mxu0  ;;  %v2831_v47 = vpop.f32.mrb[153].mxu1  ;;  %3846 = vmatprep.subr.bf16.mxu0 %v6321_v23  ;;  %4072 = vmatprep.subr.bf16.mxu1 %v6324_v26 }
 0xc6f   :  { %v2719_v48 = vadd.f32 %v2718_v45, %v7456_v29  ;;  %v2832_v49 = vadd.f32 %v2831_v47, %v7460_v30  ;;  %v2720_v25 = vpop.f32.mrb[154].mxu0  ;;  %v2833_v51 = vpop.f32.mrb[154].mxu1  ;;  %3795 = vmatprep.mubr.bf16.mxu0 %v2933_v36  ;;  %4021 = vmatprep.mubr.bf16.mxu1 %v2933_v36 }
 0xc70   :  { %v2721_v53 = vadd.f32 %v2720_v25, %v7449_v24  ;;  %v2834_v54 = vadd.f32 %v2833_v51, %v7453_v28  ;;  %v2722_v55 = vpop.f32.mrb[155].mxu0  ;;  %v2835_v58 = vpop.f32.mrb[155].mxu1  ;;  %3796 = vmatmul.mubr.bf16.gmra.mrb[180].mxu0 %v2932_v35  ;;  %4022 = vmatmul.mubr.bf16.gmra.mrb[180].mxu1 %v2932_v35  ;;  %v2896_v20 = vmax.f32 %v2717_v43, 0.0  ;;  %v2898_v1 = vmax.f32 %v2830_v44, 0.0 }
 0xc71   :  { %v2723_v14 = vadd.f32 %v2722_v55, %v7456_v29  ;;  %v2836_v15 = vadd.f32 %v2835_v58, %v7460_v30  ;;  %3847 = vmatpush1.bf16.msra.mxu0 %v6319_v42  ;;  %4073 = vmatpush1.bf16.msra.mxu1 %v6322_v34  ;;  %v2897_v12 = vmax.f32 %v2719_v48, 0.0  ;;  %v2899_v16 = vmax.f32 %v2832_v49, 0.0  ;;  %v6339_v42 = vld [vmem:[%s8076_s15 + $0x3a4] ss:$16 sps:$4 sm:$0xff]   ;;  %v6342_v34 = vld [vmem:[%s8076_s15 + $0x3ac] ss:$16 sps:$4 sm:$0xff]  }
 0xc72   :  { %v2900_v2 = vmax.f32 %v2721_v53, 0.0  ;;  %v2902_v5 = vmax.f32 %v2834_v54, 0.0  ;;  %3848 = vmatprep.subr.bf16.mxu0 %v6327_v57  ;;  %4074 = vmatprep.subr.bf16.mxu1 %v6330_v4  ;;  %v6337_v53 = vld [vmem:[%s8076_s15 + $0x3a0] ss:$16 sps:$4 sm:$0xff]  }
 0xc73   :  { %v2901_v23 = vmax.f32 %v2723_v14, 0.0  ;;  %v2903_v21 = vmax.f32 %v2836_v15, 0.0 }
 0xc74   :  { %v2936_v61 = vpack.c.bf16 %v2900_v2, %v2896_v20  ;;  %v7686_v62 = vpack.c.bf16 %v2902_v5, %v2898_v1  ;;  %v6343_v5 = vld [vmem:[%s8076_s15 + $0x3c0] ss:$16 sps:$4 sm:$0xff]  }
 0xc75   :  { %v2937_v63 = vpack.c.bf16 %v2901_v23, %v2897_v12  ;;  %v7688_v26 = vpack.c.bf16 %v2903_v21, %v2899_v16  ;;  %v2726_v31 = vpop.f32.mrb[156].mxu0  ;;  %v2839_v32 = vpop.f32.mrb[156].mxu1  ;;  %3849 = vmatpush1.bf16.msra.mxu0 %v6325_v17  ;;  %4075 = vmatpush1.bf16.msra.mxu1 %v6328_v18  ;;  %v6351_v12 = vld [vmem:[%s8076_s15 + $0x3e4] ss:$16 sps:$4 sm:$0xff]   ;;  %v6354_v16 = vld [vmem:[%s8076_s15 + $0x3ec] ss:$16 sps:$4 sm:$0xff]  }
 0xc76   :  { %v2727_v35 = vadd.f32 %v2726_v31, %v7449_v24  ;;  %v2840_v36 = vadd.f32 %v2839_v32, %v7453_v28  ;;  %v2728_v40 = vpop.f32.mrb[157].mxu0  ;;  %v2841_v41 = vpop.f32.mrb[157].mxu1  ;;  %3850 = vmatprep.subr.bf16.mxu0 %v6333_v19  ;;  %4076 = vmatprep.subr.bf16.mxu1 %v6336_v8  ;;  %v6346_v8 = vld [vmem:[%s8076_s15 + $0x3c8] ss:$16 sps:$4 sm:$0xff]   ;;  %v6349_v23 = vld [vmem:[%s8076_s15 + $0x3e0] ss:$16 sps:$4 sm:$0xff]  }
 0xc77   :  { %v2729_v43 = vadd.f32 %v2728_v40, %v7456_v29  ;;  %v2842_v44 = vadd.f32 %v2841_v41, %v7460_v30  ;;  %v2730_v45 = vpop.f32.mrb[158].mxu0  ;;  %v2843_v47 = vpop.f32.mrb[158].mxu1  ;;  %3805 = vmatprep.mubr.bf16.mxu0 %v2937_v63  ;;  %4031 = vmatprep.mubr.bf16.mxu1 %v2937_v63  ;;  %v6352_v21 = vld [vmem:[%s8076_s15 + $0x3e8] ss:$16 sps:$4 sm:$0xff]  }
 0xc78   :  { %v2731_v57 = vadd.f32 %v2730_v45, %v7449_v24  ;;  %v2844_v4 = vadd.f32 %v2843_v47, %v7453_v28  ;;  %v2732_v48 = vpop.f32.mrb[159].mxu0  ;;  %v2845_v49 = vpop.f32.mrb[159].mxu1  ;;  %3806 = vmatmul.mubr.bf16.gmra.mrb[184].mxu0 %v2936_v61  ;;  %4032 = vmatmul.mubr.bf16.gmra.mrb[184].mxu1 %v2936_v61  ;;  %v6340_v24 = vld [vmem:[%s8076_s15 + $0x3a8] ss:$16 sps:$4 sm:$0xff]   ;;  %v6345_v28 = vld [vmem:[%s8076_s15 + $0x3c4] ss:$16 sps:$4 sm:$0xff]  }
 0xc79   :  { %v2733_v25 = vadd.f32 %v2732_v48, %v7456_v29  ;;  %v2846_v51 = vadd.f32 %v2845_v49, %v7460_v30  ;;  %3851 = vmatpush1.bf16.msra.mxu0 %v6331_v33  ;;  %4077 = vmatpush1.bf16.msra.mxu1 %v6334_v10  ;;  %v2904_v54 = vmax.f32 %v2727_v35, 0.0  ;;  %v2906_v55 = vmax.f32 %v2840_v36, 0.0  ;;  %v6348_v30 = vld [vmem:[%s8076_s15 + $0x3cc] ss:$16 sps:$4 sm:$0xff]  }
 0xc7a   :  { %v2908_v58 = vmax.f32 %v2731_v57, 0.0  ;;  %v2910_v29 = vmax.f32 %v2844_v4, 0.0  ;;  %3852 = vmatprep.subr.bf16.mxu0 %v6339_v42  ;;  %4078 = vmatprep.subr.bf16.mxu1 %v6342_v34  ;;  %v2905_v14 = vmax.f32 %v2729_v43, 0.0  ;;  %v2907_v15 = vmax.f32 %v2842_v44, 0.0 }
 0xc7b   :  { %v2909_v17 = vmax.f32 %v2733_v25, 0.0  ;;  %v2911_v18 = vmax.f32 %v2846_v51, 0.0 }
 0xc7c   :  { %v2940_v19 = vpack.c.bf16 %v2908_v58, %v2904_v54  ;;  %v2942_v20 = vpack.c.bf16 %v2910_v29, %v2906_v55 }
 0xc7d   :  { %v2941_v1 = vpack.c.bf16 %v2909_v17, %v2905_v14  ;;  %v2943_v2 = vpack.c.bf16 %v2911_v18, %v2907_v15  ;;  %3853 = vmatpush1.bf16.msra.mxu0 %v6337_v53  ;;  %4079 = vmatpush1.bf16.msra.mxu1 %v6340_v24 }
 0xc7e   :  { %3854 = vmatprep.subr.bf16.mxu0 %v6345_v28  ;;  %4080 = vmatprep.subr.bf16.mxu1 %v6348_v30 }
 0xc7f   :  { %3815 = vmatprep.mubr.bf16.mxu0 %v2941_v1  ;;  %4041 = vmatprep.mubr.bf16.mxu1 %v2941_v1 }
 0xc80   :  { %3816 = vmatmul.mubr.bf16.gmra.mrb[188].mxu0 %v2940_v19  ;;  %4042 = vmatmul.mubr.bf16.gmra.mrb[188].mxu1 %v2940_v19 }
 0xc81   :  { %3855 = vmatpush1.bf16.msra.mxu0 %v6343_v5  ;;  %3858 = vmatprep.mubr.bf16.mxu0 %v7472_v52 }
 0xc82   :  { %4081 = vmatpush1.bf16.msra.mxu1 %v6346_v8  ;;  %4084 = vmatprep.mubr.bf16.mxu1 %v7472_v52 }
 0xc83   :  { %3856 = vmatprep.subr.bf16.mxu0 %v6351_v12  ;;  %4082 = vmatprep.subr.bf16.mxu1 %v6354_v16 }
 0xc85   :  { %3857 = vmatpush1.bf16.msra.mxu0 %v6349_v23 }
 0xc86   :  { %4083 = vmatpush1.bf16.msra.mxu1 %v6352_v21 }
 0xc88   :  { %3859 = vmatmul.mubr.bf16.vlgmr.msra.gmra.mrb[160].mxu0 %v7470_v50 }
 0xc89   :  { %4085 = vmatmul.mubr.bf16.vlgmr.msra.gmra.mrb[160].mxu1 %v7470_v50  ;;  %3868 = vmatprep.mubr.bf16.mxu0 %v7508_v39 }
 0xc8a   :  { %4094 = vmatprep.mubr.bf16.mxu1 %v7508_v39 }
 0xc90   :  { %3869 = vmatmul.mubr.bf16.gmra.mrb[164].mxu0 %v7506_v37 }
 0xc91   :  { %4095 = vmatmul.mubr.bf16.gmra.mrb[164].mxu1 %v7506_v37  ;;  %3878 = vmatprep.mubr.bf16.mxu0 %v7544_v22 }
 0xc92   :  { %4104 = vmatprep.mubr.bf16.mxu1 %v7544_v22 }
 0xc98   :  { %3879 = vmatmul.mubr.bf16.gmra.mrb[168].mxu0 %v7542_v13 }
 0xc99   :  { %4105 = vmatmul.mubr.bf16.gmra.mrb[168].mxu1 %v7542_v13  ;;  %3888 = vmatprep.mubr.bf16.mxu0 %v7580_v59 }
 0xc9a   :  { %4114 = vmatprep.mubr.bf16.mxu1 %v7580_v59 }
 0xca0   :  { %3889 = vmatmul.mubr.bf16.gmra.mrb[172].mxu0 %v7578_v56 }
 0xca1   :  { %4115 = vmatmul.mubr.bf16.gmra.mrb[172].mxu1 %v7578_v56  ;;  %3898 = vmatprep.mubr.bf16.mxu0 %v7616_v60 }
 0xca2   :  { %4124 = vmatprep.mubr.bf16.mxu1 %v7616_v60 }
 0xca8   :  { %3899 = vmatmul.mubr.bf16.gmra.mrb[176].mxu0 %v7614_v46 }
 0xca9   :  { %4125 = vmatmul.mubr.bf16.gmra.mrb[176].mxu1 %v7614_v46  ;;  %3908 = vmatprep.mubr.bf16.mxu0 %v7652_v38 }
 0xcaa   :  { %4134 = vmatprep.mubr.bf16.mxu1 %v7652_v38 }
 0xcb0   :  { %3909 = vmatmul.mubr.bf16.gmra.mrb[180].mxu0 %v7650_v11 }
 0xcb1   :  { %4135 = vmatmul.mubr.bf16.gmra.mrb[180].mxu1 %v7650_v11  ;;  %3918 = vmatprep.mubr.bf16.mxu0 %v7688_v26 }
 0xcb2   :  { %4144 = vmatprep.mubr.bf16.mxu1 %v7688_v26 }
 0xcb8   :  { %3919 = vmatmul.mubr.bf16.gmra.mrb[184].mxu0 %v7686_v62 }
 0xcb9   :  { %4145 = vmatmul.mubr.bf16.gmra.mrb[184].mxu1 %v7686_v62  ;;  %3928 = vmatprep.mubr.bf16.mxu0 %v2943_v2 }
 0xcba   :  { %4154 = vmatprep.mubr.bf16.mxu1 %v2943_v2 }
 0xcc0   :  { %3929 = vmatmul.mubr.bf16.gmra.mrb[188].mxu0 %v2942_v20 }
 0xcc1   :  { %4155 = vmatmul.mubr.bf16.gmra.mrb[188].mxu1 %v2942_v20  ;;  %4250 = vmatprep.mubr.bf16.mxu0 %v6419_v3 }
 0xcc2   :  { %4363 = vmatprep.mubr.bf16.mxu1 %v6419_v3 }
 0xd5b   :  { %v3860_v50 = vpop.f32.mrb[160].mxu0 }
 0xd5c   :  { %v4086_v52 = vpop.f32.mrb[160].mxu1  ;;  %v3862_v37 = vpop.f32.mrb[161].mxu0 }
 0xd5d   :  { %v4088_v39 = vpop.f32.mrb[161].mxu1  ;;  %v3864_v13 = vpop.f32.mrb[162].mxu0 }
 0xd5e   :  { %v4165_v22 = vpack.c.bf16 %v3864_v13, %v3860_v50  ;;  %v4090_v56 = vpop.f32.mrb[162].mxu1  ;;  %v3866_v59 = vpop.f32.mrb[163].mxu0 }
 0xd5f   :  { %v4167_v46 = vpack.c.bf16 %v4090_v56, %v4086_v52  ;;  %v4166_v60 = vpack.c.bf16 %v3866_v59, %v3862_v37  ;;  %v4092_v11 = vpop.f32.mrb[163].mxu1 }
 0xd60   :  { %v4168_v38 = vpack.c.bf16 %v4092_v11, %v4088_v39 }
 0xd61   :  { %4218 = vmatprep.subr.bf16.mxu0 %v4166_v60 }
 0xd62   :  { %4331 = vmatprep.subr.bf16.mxu1 %v4168_v38  ;;  %4219 = vmatpush1.bf16.msra.mxu0 %v4165_v22 }
 0xd63   :  { %4332 = vmatpush1.bf16.msra.mxu1 %v4167_v46  ;;  %v3870_v61 = vpop.f32.mrb[164].mxu0 }
 0xd64   :  { %v4096_v62 = vpop.f32.mrb[164].mxu1  ;;  %v3872_v63 = vpop.f32.mrb[165].mxu0 }
 0xd65   :  { %v4098_v26 = vpop.f32.mrb[165].mxu1  ;;  %v3874_v31 = vpop.f32.mrb[166].mxu0 }
 0xd66   :  { %v4169_v32 = vpack.c.bf16 %v3874_v31, %v3870_v61  ;;  %v4100_v33 = vpop.f32.mrb[166].mxu1  ;;  %v3876_v10 = vpop.f32.mrb[167].mxu0 }
 0xd67   :  { %v4171_v35 = vpack.c.bf16 %v4100_v33, %v4096_v62  ;;  %v4170_v36 = vpack.c.bf16 %v3876_v10, %v3872_v63  ;;  %v4102_v40 = vpop.f32.mrb[167].mxu1 }
 0xd68   :  { %v4172_v41 = vpack.c.bf16 %v4102_v40, %v4098_v26 }
 0xd69   :  { %4220 = vmatprep.subr.bf16.mxu0 %v4170_v36 }
 0xd6a   :  { %4333 = vmatprep.subr.bf16.mxu1 %v4172_v41  ;;  %4221 = vmatpush1.bf16.msra.mxu0 %v4169_v32 }
 0xd6b   :  { %4334 = vmatpush1.bf16.msra.mxu1 %v4171_v35  ;;  %v3880_v42 = vpop.f32.mrb[168].mxu0 }
 0xd6c   :  { %v4106_v34 = vpop.f32.mrb[168].mxu1  ;;  %v3882_v43 = vpop.f32.mrb[169].mxu0 }
 0xd6d   :  { %v4108_v44 = vpop.f32.mrb[169].mxu1  ;;  %v3884_v45 = vpop.f32.mrb[170].mxu0 }
 0xd6e   :  { %v4173_v47 = vpack.c.bf16 %v3884_v45, %v3880_v42  ;;  %v4110_v57 = vpop.f32.mrb[170].mxu1  ;;  %v3886_v4 = vpop.f32.mrb[171].mxu0 }
 0xd6f   :  { %v4175_v48 = vpack.c.bf16 %v4110_v57, %v4106_v34  ;;  %v4174_v49 = vpack.c.bf16 %v3886_v4, %v3882_v43  ;;  %v4112_v25 = vpop.f32.mrb[171].mxu1 }
 0xd70   :  { %v4176_v51 = vpack.c.bf16 %v4112_v25, %v4108_v44 }
 0xd71   :  { %4222 = vmatprep.subr.bf16.mxu0 %v4174_v49 }
 0xd72   :  { %4335 = vmatprep.subr.bf16.mxu1 %v4176_v51  ;;  %4223 = vmatpush1.bf16.msra.mxu0 %v4173_v47 }
 0xd73   :  { %4336 = vmatpush1.bf16.msra.mxu1 %v4175_v48  ;;  %v3890_v53 = vpop.f32.mrb[172].mxu0 }
 0xd74   :  { %v4116_v24 = vpop.f32.mrb[172].mxu1  ;;  %v3892_v28 = vpop.f32.mrb[173].mxu0 }
 0xd75   :  { %v4118_v54 = vpop.f32.mrb[173].mxu1  ;;  %v3894_v55 = vpop.f32.mrb[174].mxu0 }
 0xd76   :  { %v4177_v58 = vpack.c.bf16 %v3894_v55, %v3890_v53  ;;  %v4120_v29 = vpop.f32.mrb[174].mxu1  ;;  %v3896_v30 = vpop.f32.mrb[175].mxu0  ;;  %v6413_v55 = vld [vmem:[%s8098_s25 + $0x10] sm:$0xff]  }
 0xd77   :  { %v4179_v14 = vpack.c.bf16 %v4120_v29, %v4116_v24  ;;  %v4178_v15 = vpack.c.bf16 %v3896_v30, %v3892_v28  ;;  %v4122_v17 = vpop.f32.mrb[175].mxu1  ;;  %v6411_v28 = vld [vmem:[%s8098_s25] sm:$0xff]   ;;  %v6416_v30 = vld [vmem:[%s8098_s25 + $0x28] sm:$0xff]  }
 0xd78   :  { %v4180_v18 = vpack.c.bf16 %v4122_v17, %v4118_v54  ;;  %v6412_v54 = vld [vmem:[%s8098_s25 + $0x8] sm:$0xff]   ;;  %v6415_v29 = vld [vmem:[%s8098_s25 + $0x20] sm:$0xff]  }
 0xd79   :  { %4224 = vmatprep.subr.bf16.mxu0 %v4178_v15  ;;  %v6418_v15 = vld [vmem:[%s8098_s25 + $0x38] sm:$0xff]   ;;  %v6356_v17 = vld [vmem:[%s8079_s18 + $0x40] sm:$0xff]  }
 0xd7a   :  { %4337 = vmatprep.subr.bf16.mxu1 %v4180_v18  ;;  %4225 = vmatpush1.bf16.msra.mxu0 %v4177_v58  ;;  %v6414_v58 = vld [vmem:[%s8098_s25 + $0x18] sm:$0xff]   ;;  %v6357_v18 = vld [vmem:[%s8079_s18] sm:$0xff]  }
 0xd7b   :  { %4338 = vmatpush1.bf16.msra.mxu1 %v4179_v14  ;;  %v3900_v19 = vpop.f32.mrb[176].mxu0  ;;  %v6417_v14 = vld [vmem:[%s8098_s25 + $0x30] sm:$0xff]  }
 0xd7c   :  { %v4126_v20 = vpop.f32.mrb[176].mxu1  ;;  %v3902_v1 = vpop.f32.mrb[177].mxu0 }
 0xd7d   :  { %v4128_v2 = vpop.f32.mrb[177].mxu1  ;;  %v3904_v5 = vpop.f32.mrb[178].mxu0 }
 0xd7e   :  { %v4181_v8 = vpack.c.bf16 %v3904_v5, %v3900_v19  ;;  %v4130_v12 = vpop.f32.mrb[178].mxu1  ;;  %v3906_v16 = vpop.f32.mrb[179].mxu0  ;;  %v6358_v19 = vld [vmem:[%s8079_s18 + $0x48] sm:$0xff]   ;;  %v6362_v5 = vld [vmem:[%s8079_s18 + $0x58] sm:$0xff]  }
 0xd7f   :  { %v4183_v23 = vpack.c.bf16 %v4130_v12, %v4126_v20  ;;  %v4182_v21 = vpack.c.bf16 %v3906_v16, %v3902_v1  ;;  %v4132_v50 = vpop.f32.mrb[179].mxu1  ;;  %v6359_v20 = vld [vmem:[%s8079_s18 + $0x8] sm:$0xff]   ;;  %v6360_v1 = vld [vmem:[%s8079_s18 + $0x50] sm:$0xff]   ;;  %v6364_v12 = vld [vmem:[%s8079_s18 + $0x60] sm:$0xff]  }
 0xd80   :  { %v4184_v52 = vpack.c.bf16 %v4132_v50, %v4128_v2  ;;  %v6361_v2 = vld [vmem:[%s8079_s18 + $0x10] sm:$0xff]   ;;  %v6365_v16 = vld [vmem:[%s8079_s18 + $0x20] sm:$0xff]   ;;  %v6367_v50 = vld [vmem:[%s8079_s18 + $0x28] sm:$0xff]  }
 0xd81   :  { %4226 = vmatprep.subr.bf16.mxu0 %v4182_v21  ;;  %v3072_v21 = vld [vmem:[%s8080_s16] sm:$0xf] }
 0xd82   :  { %4339 = vmatprep.subr.bf16.mxu1 %v4184_v52  ;;  %4227 = vmatpush1.bf16.msra.mxu0 %v4181_v8  ;;  %v6363_v8 = vld [vmem:[%s8079_s18 + $0x18] sm:$0xff]   ;;  %v6368_v52 = vld [vmem:[%s8079_s18 + $0x70] sm:$0xff]  }
 0xd83   :  { %4340 = vmatpush1.bf16.msra.mxu1 %v4183_v23  ;;  %v3910_v37 = vpop.f32.mrb[180].mxu0  ;;  %v6366_v23 = vld [vmem:[%s8079_s18 + $0x68] sm:$0xff]  }
 0xd84   :  { %v4136_v39 = vpop.f32.mrb[180].mxu1  ;;  %v3912_v13 = vpop.f32.mrb[181].mxu0 }
 0xd85   :  { %v4138_v22 = vpop.f32.mrb[181].mxu1  ;;  %v3914_v56 = vpop.f32.mrb[182].mxu0 }
 0xd86   :  { %v4185_v59 = vpack.c.bf16 %v3914_v56, %v3910_v37  ;;  %v4140_v46 = vpop.f32.mrb[182].mxu1  ;;  %v3916_v60 = vpop.f32.mrb[183].mxu0  ;;  %v7852_v37 = vrot.slane %v3072_v21, %v6916_v7 }
 0xd87   :  { %v4187_v11 = vpack.c.bf16 %v4140_v46, %v4136_v39  ;;  %v4186_v38 = vpack.c.bf16 %v3916_v60, %v3912_v13  ;;  %v4142_v61 = vpop.f32.mrb[183].mxu1  ;;  %v7855_v39 = vrot.slane %v3072_v21, %v6922_v9  ;;  %v7859_v13 = vrot.slane %v3072_v21, %v2292_v0 }
 0xd88   :  { %v4188_v62 = vpack.c.bf16 %v4142_v61, %v4138_v22  ;;  %v7863_v22 = vrot.slane %v3072_v21, %v2296_v27 }
 0xd89   :  { %4228 = vmatprep.subr.bf16.mxu0 %v4186_v38 }
 0xd8a   :  { %4341 = vmatprep.subr.bf16.mxu1 %v4188_v62  ;;  %4229 = vmatpush1.bf16.msra.mxu0 %v4185_v59 }
 0xd8b   :  { %4342 = vmatpush1.bf16.msra.mxu1 %v4187_v11  ;;  %v3920_v63 = vpop.f32.mrb[184].mxu0 }
 0xd8c   :  { %v4146_v26 = vpop.f32.mrb[184].mxu1  ;;  %v3922_v31 = vpop.f32.mrb[185].mxu0 }
 0xd8d   :  { %v4148_v32 = vpop.f32.mrb[185].mxu1  ;;  %v3924_v33 = vpop.f32.mrb[186].mxu0 }
 0xd8e   :  { %v4189_v10 = vpack.c.bf16 %v3924_v33, %v3920_v63  ;;  %v4150_v35 = vpop.f32.mrb[186].mxu1  ;;  %v3926_v36 = vpop.f32.mrb[187].mxu0 }
 0xd8f   :  { %v4191_v40 = vpack.c.bf16 %v4150_v35, %v4146_v26  ;;  %v4190_v41 = vpack.c.bf16 %v3926_v36, %v3922_v31  ;;  %v4152_v42 = vpop.f32.mrb[187].mxu1 }
 0xd90   :  { %v4192_v34 = vpack.c.bf16 %v4152_v42, %v4148_v32 }
 0xd91   :  { %4230 = vmatprep.subr.bf16.mxu0 %v4190_v41 }
 0xd92   :  { %4343 = vmatprep.subr.bf16.mxu1 %v4192_v34  ;;  %4231 = vmatpush1.bf16.msra.mxu0 %v4189_v10 }
 0xd93   :  { %4344 = vmatpush1.bf16.msra.mxu1 %v4191_v40  ;;  %v3930_v43 = vpop.f32.mrb[188].mxu0 }
 0xd94   :  { %v4156_v44 = vpop.f32.mrb[188].mxu1  ;;  %v3932_v45 = vpop.f32.mrb[189].mxu0 }
 0xd95   :  { %v4158_v47 = vpop.f32.mrb[189].mxu1  ;;  %v3934_v57 = vpop.f32.mrb[190].mxu0 }
 0xd96   :  { %v4193_v4 = vpack.c.bf16 %v3934_v57, %v3930_v43  ;;  %v4160_v48 = vpop.f32.mrb[190].mxu1  ;;  %v3936_v49 = vpop.f32.mrb[191].mxu0 }
 0xd97   :  { %v4195_v25 = vpack.c.bf16 %v4160_v48, %v4156_v44  ;;  %v4194_v51 = vpack.c.bf16 %v3936_v49, %v3932_v45  ;;  %v4162_v53 = vpop.f32.mrb[191].mxu1 }
 0xd98   :  { %v4196_v24 = vpack.c.bf16 %v4162_v53, %v4158_v47 }
 0xd99   :  { %4232 = vmatprep.subr.bf16.mxu0 %v4194_v51 }
 0xd9a   :  { %4345 = vmatprep.subr.bf16.mxu1 %v4196_v24  ;;  %4233 = vmatpush1.bf16.msra.mxu0 %v4193_v4 }
 0xd9b   :  { %4346 = vmatpush1.bf16.msra.mxu1 %v4195_v25 }
 0xd9c   :  { %5559 = vmatprep.subr.bf16.mxu1 %v6356_v17 }
 0xd9d   :  { %4251 = vmatmul.mubr.bf16.vlgmr.msra.gmra.mrb[192].mxu0 %v6411_v28 }
 0xd9e   :  { %4260 = vmatprep.mubr.bf16.mxu0 %v6419_v3  ;;  %4364 = vmatmul.mubr.bf16.vlgmr.msra.gmra.mrb[192].mxu1 %v6411_v28 }
 0xd9f   :  { %4373 = vmatprep.mubr.bf16.mxu1 %v6419_v3  ;;  %5560 = vmatpush3.bf16.msra.mxu1 %v6357_v18 }
 0xda0   :  { %5561 = vmatprep.subr.bf16.mxu1 %v6358_v19 }
 0xda3   :  { %5562 = vmatpush3.bf16.msra.mxu1 %v6359_v20 }
 0xda4   :  { %5563 = vmatprep.subr.bf16.mxu1 %v6360_v1 }
 0xda5   :  { %4261 = vmatmul.mubr.bf16.gmra.mrb[196].mxu0 %v6412_v54 }
 0xda6   :  { %4270 = vmatprep.mubr.bf16.mxu0 %v6419_v3  ;;  %4374 = vmatmul.mubr.bf16.gmra.mrb[196].mxu1 %v6412_v54 }
 0xda7   :  { %4383 = vmatprep.mubr.bf16.mxu1 %v6419_v3  ;;  %5564 = vmatpush3.bf16.msra.mxu1 %v6361_v2 }
 0xda8   :  { %5565 = vmatprep.subr.bf16.mxu1 %v6362_v5 }
 0xdab   :  { %5566 = vmatpush3.bf16.msra.mxu1 %v6363_v8 }
 0xdac   :  { %5567 = vmatprep.subr.bf16.mxu1 %v6364_v12 }
 0xdad   :  { %4271 = vmatmul.mubr.bf16.gmra.mrb[200].mxu0 %v6413_v55 }
 0xdae   :  { %4280 = vmatprep.mubr.bf16.mxu0 %v6419_v3  ;;  %4384 = vmatmul.mubr.bf16.gmra.mrb[200].mxu1 %v6413_v55 }
 0xdaf   :  { %4393 = vmatprep.mubr.bf16.mxu1 %v6419_v3  ;;  %5568 = vmatpush3.bf16.msra.mxu1 %v6365_v16 }
 0xdb0   :  { %5569 = vmatprep.subr.bf16.mxu1 %v6366_v23 }
 0xdb3   :  { %5570 = vmatpush3.bf16.msra.mxu1 %v6367_v50 }
 0xdb4   :  { %5571 = vmatprep.subr.bf16.mxu1 %v6368_v52 }
 0xdb5   :  { %4281 = vmatmul.mubr.bf16.gmra.mrb[204].mxu0 %v6414_v58 }
 0xdb6   :  { %4290 = vmatprep.mubr.bf16.mxu0 %v6419_v3  ;;  %4394 = vmatmul.mubr.bf16.gmra.mrb[204].mxu1 %v6414_v58 }
 0xdb7   :  { %4403 = vmatprep.mubr.bf16.mxu1 %v6419_v3 }
 0xdbd   :  { %4291 = vmatmul.mubr.bf16.gmra.mrb[208].mxu0 %v6415_v29 }
 0xdbe   :  { %4300 = vmatprep.mubr.bf16.mxu0 %v6419_v3  ;;  %4404 = vmatmul.mubr.bf16.gmra.mrb[208].mxu1 %v6415_v29 }
 0xdbf   :  { %4413 = vmatprep.mubr.bf16.mxu1 %v6419_v3 }
 0xdc5   :  { %4301 = vmatmul.mubr.bf16.gmra.mrb[212].mxu0 %v6416_v30 }
 0xdc6   :  { %4310 = vmatprep.mubr.bf16.mxu0 %v6419_v3  ;;  %4414 = vmatmul.mubr.bf16.gmra.mrb[212].mxu1 %v6416_v30 }
 0xdc7   :  { %4423 = vmatprep.mubr.bf16.mxu1 %v6419_v3 }
 0xdcd   :  { %4311 = vmatmul.mubr.bf16.gmra.mrb[216].mxu0 %v6417_v14 }
 0xdce   :  { %4320 = vmatprep.mubr.bf16.mxu0 %v6419_v3  ;;  %4424 = vmatmul.mubr.bf16.gmra.mrb[216].mxu1 %v6417_v14 }
 0xdcf   :  { %4433 = vmatprep.mubr.bf16.mxu1 %v6419_v3 }
 0xdd5   :  { %4321 = vmatmul.mubr.bf16.gmra.mrb[220].mxu0 %v6418_v15 }
 0xdd6   :  { %4434 = vmatmul.mubr.bf16.gmra.mrb[220].mxu1 %v6418_v15  ;;  %4580 = vmatprep.mubr.bf16.mxu0 %v6419_v3 }
 0xe70   :  { %v4252_v56 = vpop.f32.mrb[192].mxu0 }
 0xe71   :  { %v4253_v59 = vadd.f32 %v4252_v56, %v7852_v37  ;;  %v4254_v46 = vpop.f32.mrb[193].mxu0  ;;  %v4365_v60 = vpop.f32.mrb[192].mxu1 }
 0xe72   :  { %v4255_v7 = vadd.f32 %v4254_v46, %v7855_v39  ;;  %v4256_v11 = vpop.f32.mrb[194].mxu0  ;;  %v4366_v9 = vadd.f32 %v4365_v60, %v7859_v13  ;;  %v4367_v38 = vpop.f32.mrb[193].mxu1 }
 0xe73   :  { %v4257_v0 = vadd.f32 %v4256_v11, %v7852_v37  ;;  %v4258_v61 = vpop.f32.mrb[195].mxu0  ;;  %v4368_v62 = vadd.f32 %v4367_v38, %v7863_v22  ;;  %v4369_v6 = vpop.f32.mrb[194].mxu1  ;;  %v4444_v32 = vmax.f32 %v4253_v59, 0.0 }
 0xe74   :  { %v4259_v27 = vadd.f32 %v4258_v61, %v7855_v39  ;;  %v4446_v63 = vmax.f32 %v4366_v9, 0.0  ;;  %v4370_v26 = vadd.f32 %v4369_v6, %v7859_v13  ;;  %v4371_v31 = vpop.f32.mrb[195].mxu1  ;;  %v4445_v36 = vmax.f32 %v4255_v7, 0.0 }
 0xe75   :  { %v4448_v33 = vmax.f32 %v4257_v0, 0.0  ;;  %v4447_v10 = vmax.f32 %v4368_v62, 0.0  ;;  %v4372_v35 = vadd.f32 %v4371_v31, %v7863_v22 }
 0xe76   :  { %v4449_v40 = vmax.f32 %v4259_v27, 0.0  ;;  %v4450_v41 = vmax.f32 %v4370_v26, 0.0 }
 0xe77   :  { %v4508_v42 = vpack.c.bf16 %v4448_v33, %v4444_v32  ;;  %v4451_v34 = vmax.f32 %v4372_v35, 0.0 }
 0xe78   :  { %v4509_v43 = vpack.c.bf16 %v4449_v40, %v4445_v36  ;;  %v4262_v44 = vpop.f32.mrb[196].mxu0  ;;  %v7873_v45 = vpack.c.bf16 %v4450_v41, %v4446_v63 }
 0xe79   :  { %v4263_v47 = vadd.f32 %v4262_v44, %v7852_v37  ;;  %v4264_v57 = vpop.f32.mrb[197].mxu0  ;;  %v7876_v4 = vpack.c.bf16 %v4451_v34, %v4447_v10  ;;  %v4375_v48 = vpop.f32.mrb[196].mxu1 }
 0xe7a   :  { %v4265_v49 = vadd.f32 %v4264_v57, %v7855_v39  ;;  %v4266_v25 = vpop.f32.mrb[198].mxu0  ;;  %4548 = vmatprep.subr.bf16.mxu0 %v4509_v43  ;;  %v4376_v51 = vadd.f32 %v4375_v48, %v7859_v13  ;;  %v4377_v53 = vpop.f32.mrb[197].mxu1 }
 0xe7b   :  { %v4267_v24 = vadd.f32 %v4266_v25, %v7852_v37  ;;  %v4268_v28 = vpop.f32.mrb[199].mxu0  ;;  %4549 = vmatpush1.bf16.msra.mxu0 %v4508_v42  ;;  %v4378_v54 = vadd.f32 %v4377_v53, %v7863_v22  ;;  %v4379_v55 = vpop.f32.mrb[198].mxu1  ;;  %v4452_v15 = vmax.f32 %v4263_v47, 0.0 }
 0xe7c   :  { %v4269_v58 = vadd.f32 %v4268_v28, %v7855_v39  ;;  %v4454_v29 = vmax.f32 %v4376_v51, 0.0  ;;  %v4380_v30 = vadd.f32 %v4379_v55, %v7859_v13  ;;  %v4381_v14 = vpop.f32.mrb[199].mxu1  ;;  %v4453_v20 = vmax.f32 %v4265_v49, 0.0 }
 0xe7d   :  { %v4456_v17 = vmax.f32 %v4267_v24, 0.0  ;;  %v4455_v18 = vmax.f32 %v4378_v54, 0.0  ;;  %v4382_v19 = vadd.f32 %v4381_v14, %v7863_v22 }
 0xe7e   :  { %v4457_v1 = vmax.f32 %v4269_v58, 0.0  ;;  %v4458_v2 = vmax.f32 %v4380_v30, 0.0 }
 0xe7f   :  { %v4512_v5 = vpack.c.bf16 %v4456_v17, %v4452_v15  ;;  %v4459_v8 = vmax.f32 %v4382_v19, 0.0 }
 0xe80   :  { %v4513_v12 = vpack.c.bf16 %v4457_v1, %v4453_v20  ;;  %v4272_v16 = vpop.f32.mrb[200].mxu0  ;;  %v7885_v23 = vpack.c.bf16 %v4458_v2, %v4454_v29 }
 0xe81   :  { %v4273_v21 = vadd.f32 %v4272_v16, %v7852_v37  ;;  %v4274_v50 = vpop.f32.mrb[201].mxu0  ;;  %v7888_v52 = vpack.c.bf16 %v4459_v8, %v4455_v18  ;;  %v4385_v56 = vpop.f32.mrb[200].mxu1 }
 0xe82   :  { %v4275_v59 = vadd.f32 %v4274_v50, %v7855_v39  ;;  %v4276_v46 = vpop.f32.mrb[202].mxu0  ;;  %4550 = vmatprep.subr.bf16.mxu0 %v4513_v12  ;;  %v4386_v60 = vadd.f32 %v4385_v56, %v7859_v13  ;;  %v4387_v7 = vpop.f32.mrb[201].mxu1 }
 0xe83   :  { %v4277_v11 = vadd.f32 %v4276_v46, %v7852_v37  ;;  %v4278_v9 = vpop.f32.mrb[203].mxu0  ;;  %4551 = vmatpush1.bf16.msra.mxu0 %v4512_v5  ;;  %v4388_v38 = vadd.f32 %v4387_v7, %v7863_v22  ;;  %v4389_v0 = vpop.f32.mrb[202].mxu1  ;;  %v4460_v63 = vmax.f32 %v4273_v21, 0.0 }
 0xe84   :  { %v4279_v61 = vadd.f32 %v4278_v9, %v7855_v39  ;;  %v4462_v62 = vmax.f32 %v4386_v60, 0.0  ;;  %v4390_v6 = vadd.f32 %v4389_v0, %v7859_v13  ;;  %v4391_v27 = vpop.f32.mrb[203].mxu1  ;;  %v4461_v33 = vmax.f32 %v4275_v59, 0.0 }
 0xe85   :  { %v4464_v26 = vmax.f32 %v4277_v11, 0.0  ;;  %v4463_v31 = vmax.f32 %v4388_v38, 0.0  ;;  %v4392_v32 = vadd.f32 %v4391_v27, %v7863_v22 }
 0xe86   :  { %v4465_v10 = vmax.f32 %v4279_v61, 0.0  ;;  %v4466_v35 = vmax.f32 %v4390_v6, 0.0 }
 0xe87   :  { %v4516_v36 = vpack.c.bf16 %v4464_v26, %v4460_v63  ;;  %v4467_v40 = vmax.f32 %v4392_v32, 0.0 }
 0xe88   :  { %v4517_v41 = vpack.c.bf16 %v4465_v10, %v4461_v33  ;;  %v4282_v42 = vpop.f32.mrb[204].mxu0  ;;  %v7897_v34 = vpack.c.bf16 %v4466_v35, %v4462_v62 }
 0xe89   :  { %v4283_v43 = vadd.f32 %v4282_v42, %v7852_v37  ;;  %v4284_v44 = vpop.f32.mrb[205].mxu0  ;;  %v7900_v47 = vpack.c.bf16 %v4467_v40, %v4463_v31  ;;  %v4395_v57 = vpop.f32.mrb[204].mxu1 }
 0xe8a   :  { %v4285_v48 = vadd.f32 %v4284_v44, %v7855_v39  ;;  %v4286_v49 = vpop.f32.mrb[206].mxu0  ;;  %4552 = vmatprep.subr.bf16.mxu0 %v4517_v41  ;;  %v4396_v25 = vadd.f32 %v4395_v57, %v7859_v13  ;;  %v4397_v51 = vpop.f32.mrb[205].mxu1 }
 0xe8b   :  { %v4287_v53 = vadd.f32 %v4286_v49, %v7852_v37  ;;  %v4288_v24 = vpop.f32.mrb[207].mxu0  ;;  %4553 = vmatpush1.bf16.msra.mxu0 %v4516_v36  ;;  %v4398_v28 = vadd.f32 %v4397_v51, %v7863_v22  ;;  %v4399_v54 = vpop.f32.mrb[206].mxu1  ;;  %v4468_v14 = vmax.f32 %v4283_v43, 0.0 }
 0xe8c   :  { %v4289_v55 = vadd.f32 %v4288_v24, %v7855_v39  ;;  %v4470_v58 = vmax.f32 %v4396_v25, 0.0  ;;  %v4400_v29 = vadd.f32 %v4399_v54, %v7859_v13  ;;  %v4401_v30 = vpop.f32.mrb[207].mxu1  ;;  %v4469_v19 = vmax.f32 %v4285_v48, 0.0 }
 0xe8d   :  { %v4472_v15 = vmax.f32 %v4287_v53, 0.0  ;;  %v4471_v17 = vmax.f32 %v4398_v28, 0.0  ;;  %v4402_v18 = vadd.f32 %v4401_v30, %v7863_v22 }
 0xe8e   :  { %v4473_v20 = vmax.f32 %v4289_v55, 0.0  ;;  %v4474_v1 = vmax.f32 %v4400_v29, 0.0 }
 0xe8f   :  { %v4520_v2 = vpack.c.bf16 %v4472_v15, %v4468_v14  ;;  %v4475_v5 = vmax.f32 %v4402_v18, 0.0 }
 0xe90   :  { %v4521_v8 = vpack.c.bf16 %v4473_v20, %v4469_v19  ;;  %v4292_v12 = vpop.f32.mrb[208].mxu0  ;;  %v7909_v16 = vpack.c.bf16 %v4474_v1, %v4470_v58 }
 0xe91   :  { %v4293_v21 = vadd.f32 %v4292_v12, %v7852_v37  ;;  %v4294_v50 = vpop.f32.mrb[209].mxu0  ;;  %v7912_v56 = vpack.c.bf16 %v4475_v5, %v4471_v17  ;;  %v4405_v59 = vpop.f32.mrb[208].mxu1 }
 0xe92   :  { %v4295_v46 = vadd.f32 %v4294_v50, %v7855_v39  ;;  %v4296_v60 = vpop.f32.mrb[210].mxu0  ;;  %4554 = vmatprep.subr.bf16.mxu0 %v4521_v8  ;;  %v4406_v7 = vadd.f32 %v4405_v59, %v7859_v13  ;;  %v4407_v11 = vpop.f32.mrb[209].mxu1 }
 0xe93   :  { %v4297_v9 = vadd.f32 %v4296_v60, %v7852_v37  ;;  %v4298_v38 = vpop.f32.mrb[211].mxu0  ;;  %4555 = vmatpush1.bf16.msra.mxu0 %v4520_v2  ;;  %v4408_v0 = vadd.f32 %v4407_v11, %v7863_v22  ;;  %v4409_v61 = vpop.f32.mrb[210].mxu1  ;;  %v4476_v26 = vmax.f32 %v4293_v21, 0.0 }
 0xe94   :  { %v4299_v62 = vadd.f32 %v4298_v38, %v7855_v39  ;;  %v4478_v6 = vmax.f32 %v4406_v7, 0.0  ;;  %v4410_v27 = vadd.f32 %v4409_v61, %v7859_v13  ;;  %v4411_v63 = vpop.f32.mrb[211].mxu1  ;;  %v4477_v10 = vmax.f32 %v4295_v46, 0.0 }
 0xe95   :  { %v4480_v31 = vmax.f32 %v4297_v9, 0.0  ;;  %v4479_v32 = vmax.f32 %v4408_v0, 0.0  ;;  %v4412_v33 = vadd.f32 %v4411_v63, %v7863_v22 }
 0xe96   :  { %v4481_v35 = vmax.f32 %v4299_v62, 0.0  ;;  %v4482_v36 = vmax.f32 %v4410_v27, 0.0 }
 0xe97   :  { %v4524_v40 = vpack.c.bf16 %v4480_v31, %v4476_v26  ;;  %v4483_v41 = vmax.f32 %v4412_v33, 0.0 }
 0xe98   :  { %v4525_v42 = vpack.c.bf16 %v4481_v35, %v4477_v10  ;;  %v4302_v43 = vpop.f32.mrb[212].mxu0  ;;  %v7921_v44 = vpack.c.bf16 %v4482_v36, %v4478_v6 }
 0xe99   :  { %v4303_v57 = vadd.f32 %v4302_v43, %v7852_v37  ;;  %v4304_v48 = vpop.f32.mrb[213].mxu0  ;;  %v7924_v49 = vpack.c.bf16 %v4483_v41, %v4479_v32  ;;  %v4415_v25 = vpop.f32.mrb[212].mxu1 }
 0xe9a   :  { %v4305_v51 = vadd.f32 %v4304_v48, %v7855_v39  ;;  %v4306_v53 = vpop.f32.mrb[214].mxu0  ;;  %4556 = vmatprep.subr.bf16.mxu0 %v4525_v42  ;;  %v4416_v24 = vadd.f32 %v4415_v25, %v7859_v13  ;;  %v4417_v28 = vpop.f32.mrb[213].mxu1 }
 0xe9b   :  { %v4307_v54 = vadd.f32 %v4306_v53, %v7852_v37  ;;  %v4308_v55 = vpop.f32.mrb[215].mxu0  ;;  %4557 = vmatpush1.bf16.msra.mxu0 %v4524_v40  ;;  %v4418_v58 = vadd.f32 %v4417_v28, %v7863_v22  ;;  %v4419_v29 = vpop.f32.mrb[214].mxu1  ;;  %v4484_v18 = vmax.f32 %v4303_v57, 0.0 }
 0xe9c   :  { %v4309_v30 = vadd.f32 %v4308_v55, %v7855_v39  ;;  %v4486_v14 = vmax.f32 %v4416_v24, 0.0  ;;  %v4420_v15 = vadd.f32 %v4419_v29, %v7859_v13  ;;  %v4421_v17 = vpop.f32.mrb[215].mxu1  ;;  %v4485_v2 = vmax.f32 %v4305_v51, 0.0 }
 0xe9d   :  { %v4488_v19 = vmax.f32 %v4307_v54, 0.0  ;;  %v4487_v20 = vmax.f32 %v4418_v58, 0.0  ;;  %v4422_v1 = vadd.f32 %v4421_v17, %v7863_v22 }
 0xe9e   :  { %v4489_v5 = vmax.f32 %v4309_v30, 0.0  ;;  %v4490_v8 = vmax.f32 %v4420_v15, 0.0 }
 0xe9f   :  { %v4528_v12 = vpack.c.bf16 %v4488_v19, %v4484_v18  ;;  %v4491_v21 = vmax.f32 %v4422_v1, 0.0 }
 0xea0   :  { %v4529_v50 = vpack.c.bf16 %v4489_v5, %v4485_v2  ;;  %v4312_v59 = vpop.f32.mrb[216].mxu0  ;;  %v7933_v46 = vpack.c.bf16 %v4490_v8, %v4486_v14 }
 0xea1   :  { %v4313_v60 = vadd.f32 %v4312_v59, %v7852_v37  ;;  %v4314_v7 = vpop.f32.mrb[217].mxu0  ;;  %v7936_v11 = vpack.c.bf16 %v4491_v21, %v4487_v20  ;;  %v4425_v9 = vpop.f32.mrb[216].mxu1 }
 0xea2   :  { %v4315_v38 = vadd.f32 %v4314_v7, %v7855_v39  ;;  %v4316_v0 = vpop.f32.mrb[218].mxu0  ;;  %4558 = vmatprep.subr.bf16.mxu0 %v4529_v50  ;;  %v4426_v61 = vadd.f32 %v4425_v9, %v7859_v13  ;;  %v4427_v62 = vpop.f32.mrb[217].mxu1 }
 0xea3   :  { %v4317_v6 = vadd.f32 %v4316_v0, %v7852_v37  ;;  %v4318_v27 = vpop.f32.mrb[219].mxu0  ;;  %4559 = vmatpush1.bf16.msra.mxu0 %v4528_v12  ;;  %v4428_v63 = vadd.f32 %v4427_v62, %v7863_v22  ;;  %v4429_v26 = vpop.f32.mrb[218].mxu1  ;;  %v4492_v35 = vmax.f32 %v4313_v60, 0.0 }
 0xea4   :  { %v4319_v31 = vadd.f32 %v4318_v27, %v7855_v39  ;;  %v4494_v32 = vmax.f32 %v4426_v61, 0.0  ;;  %v4430_v33 = vadd.f32 %v4429_v26, %v7859_v13  ;;  %v4431_v10 = vpop.f32.mrb[219].mxu1  ;;  %v4493_v42 = vmax.f32 %v4315_v38, 0.0  ;;  %v6385_v27 = vld [vmem:[%s8079_s18 + $0xb0] sm:$0xff]   ;;  %v6387_v26 = vld [vmem:[%s8079_s18 + $0xb8] sm:$0xff]  }
 0xea5   :  { %v4496_v36 = vmax.f32 %v4317_v6, 0.0  ;;  %v4495_v40 = vmax.f32 %v4428_v63, 0.0  ;;  %v4432_v41 = vadd.f32 %v4431_v10, %v7863_v22  ;;  %v6384_v6 = vld [vmem:[%s8079_s18 + $0xf0] sm:$0xff]   ;;  %v6386_v63 = vld [vmem:[%s8079_s18 + $0xf8] sm:$0xff]  }
 0xea6   :  { %v4497_v43 = vmax.f32 %v4319_v31, 0.0  ;;  %v4498_v57 = vmax.f32 %v4430_v33, 0.0 }
 0xea7   :  { %v4532_v48 = vpack.c.bf16 %v4496_v36, %v4492_v35  ;;  %v4499_v25 = vmax.f32 %v4432_v41, 0.0 }
 0xea8   :  { %v4533_v51 = vpack.c.bf16 %v4497_v43, %v4493_v42  ;;  %v4322_v53 = vpop.f32.mrb[220].mxu0  ;;  %v4534_v24 = vpack.c.bf16 %v4498_v57, %v4494_v32 }
 0xea9   :  { %v4323_v28 = vadd.f32 %v4322_v53, %v7852_v37  ;;  %v4324_v54 = vpop.f32.mrb[221].mxu0  ;;  %v4535_v55 = vpack.c.bf16 %v4499_v25, %v4495_v40  ;;  %v4435_v58 = vpop.f32.mrb[220].mxu1  ;;  %v6420_v25 = vmov 0.0   ;;  %v6389_v53 = vld [vmem:[%s8081_s20 + $0x8] sm:$0xff]  }
 0xeaa   :  { %v4325_v29 = vadd.f32 %v4324_v54, %v7855_v39  ;;  %v4326_v30 = vpop.f32.mrb[222].mxu0  ;;  %4560 = vmatprep.subr.bf16.mxu0 %v4533_v51  ;;  %v4436_v14 = vadd.f32 %v4435_v58, %v7859_v13  ;;  %v4437_v15 = vpop.f32.mrb[221].mxu1  ;;  %v6388_v51 = vld [vmem:[%s8081_s20] sm:$0xff]   ;;  %v6394_v58 = vld [vmem:[%s8081_s20 + $0x30] sm:$0xff]  }
 0xeab   :  { %v4327_v17 = vadd.f32 %v4326_v30, %v7852_v37  ;;  %v4328_v18 = vpop.f32.mrb[223].mxu0  ;;  %4561 = vmatpush1.bf16.msra.mxu0 %v4532_v48  ;;  %v4438_v19 = vadd.f32 %v4437_v15, %v7863_v22  ;;  %v4439_v20 = vpop.f32.mrb[222].mxu1  ;;  %v4500_v12 = vmax.f32 %v4323_v28, 0.0  ;;  %v6391_v28 = vld [vmem:[%s8081_s20 + $0x18] sm:$0xff]   ;;  %v6392_v54 = vld [vmem:[%s8081_s20 + $0x20] sm:$0xff]  }
 0xeac   :  { %v4329_v1 = vadd.f32 %v4328_v18, %v7855_v39  ;;  %v4502_v2 = vmax.f32 %v4436_v14, 0.0  ;;  %v4440_v5 = vadd.f32 %v4439_v20, %v7859_v13  ;;  %v4441_v8 = vpop.f32.mrb[223].mxu1  ;;  %v4501_v60 = vmax.f32 %v4325_v29, 0.0  ;;  %v6355_v39 = vld [vmem:[%s8078_s17] sm:$0xff]   ;;  %v6370_v13 = vld [vmem:[%s8079_s18 + $0x78] sm:$0xff]  }
 0xead   :  { %v4504_v21 = vmax.f32 %v4327_v17, 0.0  ;;  %v4503_v50 = vmax.f32 %v4438_v19, 0.0  ;;  %v4442_v59 = vadd.f32 %v4441_v8, %v7863_v22  ;;  %v6371_v22 = vld [vmem:[%s8079_s18 + $0x38] sm:$0xff]   ;;  %v5389_v20 = vld [vmem:[%s8082_s19] ss:$0 sm:$0xff] }
 0xeae   :  { %v4505_v7 = vmax.f32 %v4329_v1, 0.0  ;;  %v4506_v9 = vmax.f32 %v4440_v5, 0.0  ;;  %v6395_v29 = vld [vmem:[%s8081_s20 + $0x38] sm:$0xff]  }
 0xeaf   :  { %v4536_v37 = vpack.c.bf16 %v4504_v21, %v4500_v12  ;;  %v4507_v38 = vmax.f32 %v4442_v59, 0.0 }
 0xeb0   :  { %v4537_v0 = vpack.c.bf16 %v4505_v7, %v4501_v60  ;;  %v4538_v61 = vpack.c.bf16 %v4506_v9, %v4502_v2 }
 0xeb1   :  { %v4539_v62 = vpack.c.bf16 %v4507_v38, %v4503_v50 }
 0xeb2   :  { %4562 = vmatprep.subr.bf16.mxu0 %v4537_v0  ;;  %v5422_v0 = vld [vmem:[%s8083_s21] ss:$0 sm:$0xff] }
 0xeb3   :  { %4563 = vmatpush1.bf16.msra.mxu0 %v4536_v37 }
 0xeb4   :  { %4591 = vmatprep.subr.bf16.mxu0 %v7876_v4  ;;  %v6373_v4 = vld [vmem:[%s8079_s18 + $0x80] sm:$0xff]  }
 0xeb6   :  { %4581 = vmatmul.mubr.bf16.vlgmr.msra.gmra.mrb[224].mxu0 %v6355_v39 }
 0xeb7   :  { %4592 = vmatpush1.bf16.msra.mxu0 %v7873_v45  ;;  %4623 = vmatprep.mubr.bf16.mxu0 %v6419_v3  ;;  %v6369_v3 = vld [vmem:[%s8079_s18 + $0x30] sm:$0xff]   ;;  %v6372_v45 = vld [vmem:[%s8079_s18 + $0xc0] sm:$0xff]  }
 0xeb8   :  { %4593 = vmatprep.subr.bf16.mxu0 %v7888_v52  ;;  %5572 = vmatpush3.bf16.msra.mxu1 %v6369_v3  ;;  %v6375_v52 = vld [vmem:[%s8079_s18 + $0x88] sm:$0xff]  }
 0xeb9   :  { %5573 = vmatprep.subr.bf16.mxu1 %v6370_v13 }
 0xebb   :  { %4594 = vmatpush1.bf16.msra.mxu0 %v7885_v23  ;;  %v6374_v23 = vld [vmem:[%s8079_s18 + $0xc8] sm:$0xff]  }
 0xebc   :  { %4595 = vmatprep.subr.bf16.mxu0 %v7900_v47  ;;  %5574 = vmatpush3.bf16.msra.mxu1 %v6371_v22  ;;  %v6377_v47 = vld [vmem:[%s8079_s18 + $0x90] sm:$0xff]  }
 0xebd   :  { %5868 = vmatprep.subr.bf16.mxu1 %v6420_v25 }
 0xebf   :  { %4596 = vmatpush1.bf16.msra.mxu0 %v7897_v34  ;;  %v6376_v34 = vld [vmem:[%s8079_s18 + $0xd0] sm:$0xff]  }
 0xec0   :  { %4597 = vmatprep.subr.bf16.mxu0 %v7912_v56  ;;  %v6379_v56 = vld [vmem:[%s8079_s18 + $0x98] sm:$0xff]  }
 0xec3   :  { %4598 = vmatpush1.bf16.msra.mxu0 %v7909_v16  ;;  %v6378_v16 = vld [vmem:[%s8079_s18 + $0xd8] sm:$0xff]  }
 0xec4   :  { %4599 = vmatprep.subr.bf16.mxu0 %v7924_v49  ;;  %v6381_v49 = vld [vmem:[%s8079_s18 + $0xa0] sm:$0xff]  }
 0xec7   :  { %4600 = vmatpush1.bf16.msra.mxu0 %v7921_v44  ;;  %v6380_v44 = vld [vmem:[%s8079_s18 + $0xe0] sm:$0xff]  }
 0xec8   :  { %4601 = vmatprep.subr.bf16.mxu0 %v7936_v11  ;;  %v6383_v11 = vld [vmem:[%s8079_s18 + $0xa8] sm:$0xff]  }
 0xecb   :  { %4602 = vmatpush1.bf16.msra.mxu0 %v7933_v46  ;;  %v6382_v46 = vld [vmem:[%s8079_s18 + $0xe8] sm:$0xff]  }
 0xecc   :  { %4603 = vmatprep.subr.bf16.mxu0 %v4535_v55  ;;  %v6393_v55 = vld [vmem:[%s8081_s20 + $0x28] sm:$0xff]  }
 0xecf   :  { %4604 = vmatpush1.bf16.msra.mxu0 %v4534_v24  ;;  %v6390_v24 = vld [vmem:[%s8081_s20 + $0x10] sm:$0xff]  }
 0xed0   :  { %4605 = vmatprep.subr.bf16.mxu0 %v4539_v62 }
 0xed3   :  { %4606 = vmatpush1.bf16.msra.mxu0 %v4538_v61 }
 0xed4   :  { %5581 = vmatprep.subr.bf16.mxu0 %v6372_v45 }
 0xed6   :  { %4624 = vmatmul.mubr.bf16.vlgmr.msra.gmra.mrb[228].mxu0 %v6355_v39 }
 0xed7   :  { %5582 = vmatpush3.bf16.msra.mxu0 %v6373_v4 }
 0xed8   :  { %5583 = vmatprep.subr.bf16.mxu0 %v6374_v23 }
 0xedb   :  { %5584 = vmatpush3.bf16.msra.mxu0 %v6375_v52 }
 0xedc   :  { %5585 = vmatprep.subr.bf16.mxu0 %v6376_v34 }
 0xedf   :  { %5586 = vmatpush3.bf16.msra.mxu0 %v6377_v47 }
 0xee0   :  { %5587 = vmatprep.subr.bf16.mxu0 %v6378_v16 }
 0xee3   :  { %5588 = vmatpush3.bf16.msra.mxu0 %v6379_v56 }
 0xee4   :  { %5589 = vmatprep.subr.bf16.mxu0 %v6380_v44 }
 0xee7   :  { %5590 = vmatpush3.bf16.msra.mxu0 %v6381_v49 }
 0xee8   :  { %5591 = vmatprep.subr.bf16.mxu0 %v6382_v46 }
 0xeeb   :  { %5592 = vmatpush3.bf16.msra.mxu0 %v6383_v11 }
 0xeec   :  { %5593 = vmatprep.subr.bf16.mxu0 %v6384_v6 }
 0xeef   :  { %5594 = vmatpush3.bf16.msra.mxu0 %v6385_v27 }
 0xef0   :  { %5595 = vmatprep.subr.bf16.mxu0 %v6386_v63 }
 0xef3   :  { %5596 = vmatpush3.bf16.msra.mxu0 %v6387_v26 }
 0xf89   :  { %v4582_v31 = vpop.f32.mrb[224].mxu0 }
 0xf8a   :  { %v4584_v32 = vpop.f32.mrb[225].mxu0 }
 0xf8b   :  { %v4586_v33 = vpop.f32.mrb[226].mxu0 }
 0xf8c   :  { %v4634_v10 = vpack.c.bf16 %v4586_v33, %v4582_v31  ;;  %v4588_v35 = vpop.f32.mrb[227].mxu0 }
 0xf8d   :  { %v4635_v36 = vpack.c.bf16 %v4588_v35, %v4584_v32 }
 0xf8f   :  { %4933 = vmatprep.mubr.bf16.mxu1 %v4635_v36 }
 0xf90   :  { %4934 = vmatmul.mubr.bf16.vlgmr.msra.gmra.mrb[224].mxu1 %v4634_v10 }
 0xf91   :  { %5869 = vmatpush3.bf16.msra.mxu1 %v6388_v51  ;;  %5884 = vmatprep.mubr.msk.bf16.mxu1 %vm6421_vm0, %v6420_v25 }
 0xf92   :  { %5870 = vmatprep.subr.bf16.mxu1 %v6420_v25 }
 0xf95   :  { %5871 = vmatpush3.bf16.msra.mxu1 %v6389_v53 }
 0xf96   :  { %5872 = vmatprep.subr.bf16.mxu1 %v6420_v25 }
 0xf99   :  { %5873 = vmatpush3.bf16.msra.mxu1 %v6390_v24 }
 0xf9a   :  { %5874 = vmatprep.subr.bf16.mxu1 %v6420_v25 }
 0xf9d   :  { %5875 = vmatpush3.bf16.msra.mxu1 %v6391_v28 }
 0xf9e   :  { %5876 = vmatprep.subr.bf16.mxu1 %v6420_v25 }
 0xfa1   :  { %5877 = vmatpush3.bf16.msra.mxu1 %v6392_v54 }
 0xfa2   :  { %5878 = vmatprep.subr.bf16.mxu1 %v6420_v25 }
 0xfa5   :  { %5879 = vmatpush3.bf16.msra.mxu1 %v6393_v55 }
 0xfa6   :  { %5880 = vmatprep.subr.bf16.mxu1 %v6420_v25 }
 0xfa9   :  { %v4625_v40 = vpop.f32.mrb[228].mxu0  ;;  %5881 = vmatpush3.bf16.msra.mxu1 %v6394_v58 }
 0xfaa   :  { %v4627_v41 = vpop.f32.mrb[229].mxu0  ;;  %5882 = vmatprep.subr.bf16.mxu1 %v6420_v25 }
 0xfab   :  { %v4629_v42 = vpop.f32.mrb[230].mxu0 }
 0xfac   :  { %v4636_v43 = vpack.c.bf16 %v4629_v42, %v4625_v40  ;;  %v4631_v57 = vpop.f32.mrb[231].mxu0 }
 0xfad   :  { %v4637_v48 = vpack.c.bf16 %v4631_v57, %v4627_v41  ;;  %5883 = vmatpush3.bf16.msra.mxu1 %v6395_v29 }
 0xfaf   :  { %4974 = vmatprep.mubr.bf16.mxu0 %v4637_v48 }
 0xfb0   :  { %4975 = vmatmul.mubr.bf16.vlgmr.msra.gmra.mrb[232].mxu0 %v4636_v43 }
0x1063   :  { %v5575_v30 = vpop.f32.mrb[224].mxu1 }
0x1064   :  { %v5576_v14 = vpop.f32.mrb[225].mxu1 }
0x1065   :  { %v5577_v15 = vadd.f32 %v5576_v14, %v5575_v30  ;;  %v5578_v17 = vpop.f32.mrb[226].mxu1 }
0x1066   :  { %v5579_v18 = vpop.f32.mrb[227].mxu1 }
0x1067   :  { %v5580_v19 = vadd.f32 %v5579_v18, %v5578_v17  ;;  %v4936_v5 = vadd.f32 %v5577_v15, %v5389_v20 }
0x1069   :  { %v4939_v50 = vadd.f32 %v5580_v19, %v5389_v20 }
0x1083   :  { %v5597_v1 = vpop.f32.mrb[232].mxu0 }
0x1084   :  { %v5598_v2 = vpop.f32.mrb[233].mxu0 }
0x1085   :  { %v5599_v8 = vadd.f32 %v5598_v2, %v5597_v1  ;;  %v5600_v12 = vpop.f32.mrb[234].mxu0 }
0x1086   :  { %v5601_v21 = vpop.f32.mrb[235].mxu0 }
0x1087   :  { %v4977_v59 = vadd.f32 %v5599_v8, %v4936_v5  ;;  %v5602_v60 = vadd.f32 %v5601_v21, %v5600_v12 }
0x1089   :  { %v4980_v7 = vadd.f32 %v5602_v60, %v4939_v50  ;;  %v4983_v9 = vmax.f32 %v4977_v59, 0.0 }
0x108b   :  { %v4984_v37 = vmax.f32 %v4980_v7, 0.0 }
0x108d   :  { %v4985_v38 = vpack.c.bf16 %v4984_v37, %v4983_v9 }
0x108f   :  { %5885 = vmatmul.mubr.bf16.vlgmr.msra.gmra.mrb[228].mxu1 %v4985_v38 }
0x1162   :  { %v5091_v61 = vpop.f32.mrb[228].mxu1 }
0x1163   :  { %v5092_v62 = vadd.f32 %v5422_v0, %v5091_v61  ;;  %v5886_v39 = vpop.f32.mrb[229].mxu1 }
0x1164   :  { %v5094_v3 = vpop.f32.mrb[230].mxu1 }
0x1165   :  { %5098 = vst [vmem:[%s8084_s22] sm:$0xff] %v5092_v62  ;;  %v5095_v13 = vadd.f32 %v5422_v0, %v5094_v3  ;;  %v5887_v22 = vpop.f32.mrb[231].mxu1 }
0x1167   :  { %5099 = vst [vmem:[%s8084_s22 + $0x8] sm:$0xff] %v5095_v13 }

</bundles_post_ra>
